<compile_context>
chip_gen: v7x
topology: tpu7x:2x2x1
jax: 0.10.0
libtpu: 0.0.40
codegen_flags: <defaults>
</compile_context>

<pallas_src>
import numpy as np
import jax
import jax.numpy as jnp
from jax.experimental import pallas as pl
from jax.experimental.pallas import tpu as pltpu

EPS = 1e-5
ROWS_PER_BLOCK = 512        # 512 x 128 x 4 B = 256 KB per input block


def _biasfree_ln_kernel(x_ref, w_ref, a_ref, o_ref):
    """x_ref: (tm, L) packed tokens (G tokens of C channels per row, L = G*C)
       w_ref: (1, L)  weight tiled G times
       a_ref: (L, L)  block-diagonal averaging matrix (1/C inside each token's segment)."""
    x = x_ref[...].astype(jnp.float32)
    a = a_ref[...]
    # per-token mean, broadcast to every lane of that token's segment (MXU)
    mu = jnp.dot(x, a, preferred_element_type=jnp.float32,
                 precision=jax.lax.Precision.HIGHEST)
    d = x - mu
    # biased variance (unbiased=False), broadcast the same way
    var = jnp.dot(d * d, a, preferred_element_type=jnp.float32,
                  precision=jax.lax.Precision.HIGHEST)
    # BiasFree: scale x itself (no mean subtraction in the output), no bias term
    y = x * jax.lax.rsqrt(var + EPS) * w_ref[...].astype(jnp.float32)
    o_ref[...] = y.astype(o_ref.dtype)


def biasfree_layernorm(x, weight):
    """BiasFree_LayerNorm over the last dim of x (any leading dims)."""
    orig_shape = x.shape
    C = orig_shape[-1]
    M = int(np.prod(orig_shape[:-1]))
    x2 = x.reshape(M, C)

    # Pack G tokens per 128-lane row when the channel count divides 128
    # (free reinterpretation of the row-major buffer).  Otherwise fall back to G=1.
    G = 128 // C if (C < 128 and 128 % C == 0) else 1
    L = G * C

    Mg = pl.cdiv(M, G)                       # packed rows
    if Mg > ROWS_PER_BLOCK:
        tm = ROWS_PER_BLOCK
        Mg_pad = pl.cdiv(Mg, tm) * tm
    else:                                    # single block == full array (any size ok)
        tm = Mg
        Mg_pad = Mg
    M_pad = Mg_pad * G
    if M_pad != M:
        # zero tokens normalize to zero (var=0, eps keeps rsqrt finite); sliced off below
        x2 = jnp.pad(x2, ((0, M_pad - M), (0, 0)))
    xg = x2.reshape(Mg_pad, L)

    # Block-diagonal averaging matrix: A[i, j] = 1/C if i, j belong to the same token.
    grp = np.arange(L) // C
    avg = jnp.asarray((grp[:, None] == grp[None, :]).astype(np.float32) / C)
    w_tiled = jnp.tile(weight.astype(x.dtype).reshape(1, C), (1, G))     # (1, L)

    out = pl.pallas_call(
        _biasfree_ln_kernel,
        out_shape=jax.ShapeDtypeStruct((Mg_pad, L), x.dtype),
        grid=(Mg_pad // tm,),
        in_specs=[pl.BlockSpec((tm, L), lambda i: (i, 0)),
                  pl.BlockSpec((1, L), lambda i: (0, 0)),
                  pl.BlockSpec((L, L), lambda i: (0, 0))],
        out_specs=pl.BlockSpec((tm, L), lambda i: (i, 0)),
        compiler_params=pltpu.CompilerParams(
            dimension_semantics=("parallel",)),
    )(xg, w_tiled, avg)

    return out.reshape(M_pad, C)[:M].reshape(orig_shape)


def _reference(x, weight):
    """Pure-JAX mirror of the PyTorch forward (var with unbiased=False)."""
    mu = jnp.mean(x, axis=-1, keepdims=True)
    var = jnp.mean((x - mu) ** 2, axis=-1, keepdims=True)
    return x / jnp.sqrt(var + EPS) * weight


if __name__ == "__main__":
    key = jax.random.PRNGKey(0)
    kx, kw = jax.random.split(key)

    # (b, h*w, c) tokens as produced by to_3d() in DiffMSR: 64x64 feature map, dim=16
    B, N, C = 2, 4096, 16
    x = jax.random.normal(kx, (B, N, C), dtype=jnp.float32)
    # nn.Parameter(torch.ones(C)) init, perturbed so the scale actually matters in the check
    weight = jnp.ones((C,), jnp.float32) + 0.1 * jax.random.normal(kw, (C,), jnp.float32)

    fwd = jax.jit(biasfree_layernorm)
    y = jax.block_until_ready(fwd(x, weight))
    y_ref = _reference(x, weight)

    assert y.shape == x.shape, y.shape
    np.testing.assert_allclose(np.asarray(y), np.asarray(y_ref), rtol=1e-4, atol=1e-4)
    print("KERNEL_OK")
</pallas_src>

<mosaic_0001>
module attributes {stable_mosaic.version = 11 : i64} {
  func.func @_biasfree_ln_kernel(%arg0: i32, %arg1: memref<512x128xf32, #tpu.memory_space<vmem>>, %arg2: memref<1x128xf32, #tpu.memory_space<vmem>>, %arg3: memref<128x128xf32, #tpu.memory_space<vmem>>, %arg4: memref<512x128xf32, #tpu.memory_space<vmem>>) attributes {dimension_semantics = [#tpu.dimension_semantics<parallel>], iteration_bounds = array<i64: 2>, scalar_prefetch = 0 : i64, scratch_operands = 0 : i64, tpu.core_type = #tpu.core_type<tc>, window_params = [{transform_indices = @transform_0, window_bounds = array<i64: 512, 128>}, {pipeline_mode = #tpu.pipeline_mode<synchronous>, transform_indices = @transform_1, window_bounds = array<i64: 1, 128>}, {pipeline_mode = #tpu.pipeline_mode<synchronous>, transform_indices = @transform_2, window_bounds = array<i64: 128, 128>}, {transform_indices = @transform_3, window_bounds = array<i64: 512, 128>}]} {
    %c0 = arith.constant 0 : index
    %c0_0 = arith.constant 0 : index
    %0 = vector.load %arg1[%c0, %c0_0] : memref<512x128xf32, #tpu.memory_space<vmem>>, vector<512x128xf32>
    %c0_1 = arith.constant 0 : index
    %c0_2 = arith.constant 0 : index
    %1 = vector.load %arg3[%c0_1, %c0_2] : memref<128x128xf32, #tpu.memory_space<vmem>>, vector<128x128xf32>
    %cst = arith.constant dense<0.000000e+00> : vector<512x128xf32>
    %2 = tpu.matmul %0, %1, %cst {dimension_numbers = #tpu.dot_dimension_numbers<[1], [0], [0], [1], [0, 0, 1, 1], [], []>, precision = #tpu.contract_precision<fp32>} : vector<512x128xf32>, vector<128x128xf32>, vector<512x128xf32> -> vector<512x128xf32>
    %3 = arith.subf %0, %2 : vector<512x128xf32>
    %4 = arith.mulf %3, %3 : vector<512x128xf32>
    %cst_3 = arith.constant dense<0.000000e+00> : vector<512x128xf32>
    %5 = tpu.matmul %4, %1, %cst_3 {dimension_numbers = #tpu.dot_dimension_numbers<[1], [0], [0], [1], [0, 0, 1, 1], [], []>, precision = #tpu.contract_precision<fp32>} : vector<512x128xf32>, vector<128x128xf32>, vector<512x128xf32> -> vector<512x128xf32>
    %cst_4 = arith.constant 9.99999974E-6 : f32
    %6 = vector.broadcast %cst_4 : f32 to vector<512x128xf32>
    %7 = arith.addf %5, %6 : vector<512x128xf32>
    %8 = math.rsqrt %7 : vector<512x128xf32>
    %9 = arith.mulf %0, %8 : vector<512x128xf32>
    %c0_5 = arith.constant 0 : index
    %c0_6 = arith.constant 0 : index
    %10 = vector.load %arg2[%c0_5, %c0_6] : memref<1x128xf32, #tpu.memory_space<vmem>>, vector<1x128xf32>
    %11 = vector.broadcast %10 : vector<1x128xf32> to vector<512x128xf32>
    %12 = arith.mulf %9, %11 : vector<512x128xf32>
    %c0_7 = arith.constant 0 : index
    %c0_8 = arith.constant 0 : index
    %13 = vector.load %arg4[%c0_7, %c0_8] : memref<512x128xf32, #tpu.memory_space<vmem>>, vector<512x128xf32>
    tpu.vector_store %arg4[%c0_7, %c0_8], %12 {strides = array<i32>} : memref<512x128xf32, #tpu.memory_space<vmem>>, vector<512x128xf32>,
    return
  }
  func.func @transform_0(%arg0: i32) -> (i32, i32) {
    %c0_i32 = arith.constant 0 : i32
    %c0_i32_0 = arith.constant 0 : i32
    return %arg0, %c0_i32 : i32, i32
  }
  func.func @transform_1(%arg0: i32) -> (i32, i32) {
    %c0_i32 = arith.constant 0 : i32
    %c0_i32_0 = arith.constant 0 : i32
    %c0_i32_1 = arith.constant 0 : i32
    return %c0_i32, %c0_i32_0 : i32, i32
  }
  func.func @transform_2(%arg0: i32) -> (i32, i32) {
    %c0_i32 = arith.constant 0 : i32
    %c0_i32_0 = arith.constant 0 : i32
    %c0_i32_1 = arith.constant 0 : i32
    return %c0_i32, %c0_i32_0 : i32, i32
  }
  func.func @transform_3(%arg0: i32) -> (i32, i32) {
    %c0_i32 = arith.constant 0 : i32
    %c0_i32_0 = arith.constant 0 : i32
    return %arg0, %c0_i32 : i32, i32
  }
}

</mosaic_0001>

<bundles_post_ra>
// kernel: biasfree_layernorm.1
= control target key start
LH: loop header
LB: loop body
LE: loop exit
PB: predicated region body
PF: predicated region fallthrough
CT: control target
= control target key end

     0   :  { %s11289_s12 = smov 0   ;;  %s14122_s0 = inlined_call_operand.vmem [shape: f32[1024,128], index: 0, kind: input, shape index: {}]   ;;  %s14123_s1 = inlined_call_operand.vmem [shape: f32[1,128], index: 1, kind: input, shape index: {}]   ;;  %s14124_s2 = inlined_call_operand.vmem [shape: f32[128,128], index: 2, kind: input, shape index: {}]   ;;  %s14125_s3 = inlined_call_operand.vmem [shape: f32[1024,128], index: 3, kind: output, shape index: {}]  }
   0x1 LB: > { %s7401_s13 = sadd.s32 4294967295, %s11267_s12   ;;  %p7405_p0 = scmp.ge.s32.totalorder %s11267_s12, 1  ;;  %s11267_s12 = sphi %s11289_s12, %s13_s12  }
   0x2   : > { %p138_p1 = scmp.lt.s32.totalorder %s11267_s12, 3 }
   0x4   : > { %p139_p2 = pnand %p7405_p0, %p138_p1 }
   0x6   : > { %142 = sbr.rel (%p139_p2) target bundleno = 1913 (0x779), region = 32 }
   0xd   : > { %v238_v0 = vld [vmem:[%s14124_s2] sm:$0xff]  ;;  %v239_v1 = vld [vmem:[%s14124_s2 + $0x8] sm:$0xff]  ;;  %v11306_v2 = vld [vmem:[%s14124_s2 + $0x10] sm:$0xff]  ;;  %s7406_s20 = sshll.u32 %s7401_s13, 6 }
   0xe   : > { %v255_v3 = vand.u32 4294901760, %v238_v0  ;;  %v258_v4 = vand.u32 4294901760, %v239_v1  ;;  %v11311_v5 = vld [vmem:[%s14124_s2 + $0x18] sm:$0xff]  ;;  %v261_v6 = vand.u32 4294901760, %v11306_v2  ;;  %v11317_v7 = vld [vmem:[%s14124_s2 + $0x20] sm:$0xff]  ;;  %v11322_v8 = vld [vmem:[%s14124_s2 + $0x28] sm:$0xff] }
   0xf   : > { %v264_v9 = vand.u32 4294901760, %v11311_v5  ;;  %v267_v11 = vand.u32 4294901760, %v11317_v7  ;;  %v270_v12 = vand.u32 4294901760, %v11322_v8  ;;  %v11338_v14 = vld [vmem:[%s14124_s2 + $0x30] sm:$0xff]  ;;  %v11343_v15 = vld [vmem:[%s14124_s2 + $0x38] sm:$0xff]  ;;  %p163_p3 = scmp.lt.s32.totalorder %s7406_s20, 127 }
  0x10   : > { %v11325_v10 = vpack.c.bf16 %v258_v4, %v255_v3  ;;  %v14145_v17 = vand.u32 4294901760, %v11338_v14  ;;  %v14142_v18 = vand.u32 4294901760, %v11343_v15  ;;  %v11363_v19 = vld [vmem:[%s14124_s2 + $0x40] sm:$0xff]  ;;  %v11368_v20 = vld [vmem:[%s14124_s2 + $0x48] sm:$0xff]  ;;  %v11394_v25 = vld [vmem:[%s14124_s2 + $0x50] sm:$0xff]  ;;  %v11416_v33 = vsub.f32 %v238_v0, %v255_v3 }
  0x11   : > { %v11333_v13 = vpack.c.bf16 %v264_v9, %v261_v6  ;;  %s15693_s20 = smov (!%p163_p3, %s7406_s20), 127  ;;  %v11356_v16 = vpack.c.bf16 %v270_v12, %v267_v11  ;;  %v14140_v23 = vand.u32 4294901760, %v11363_v19  ;;  %v14139_v24 = vand.u32 4294901760, %v11368_v20  ;;  %v11399_v26 = vld [vmem:[%s14124_s2 + $0x58] sm:$0xff]  ;;  %v11413_v31 = vld [vmem:[%s14124_s2 + $0x60] sm:$0xff]  ;;  %v11429_v35 = vld [vmem:[%s14124_s2 + $0x68] sm:$0xff] }
  0x12   : > { %14814 = vst [vmem:[#allocation2_spill] sm:$0xff] %v11325_v10  ;;  %9910 = vmatprep.subr.bf16.mxu0 %v11325_v10  ;;  %10102 = vmatprep.subr.bf16.mxu1 %v11325_v10  ;;  %s7407_s8 = sshll.u32 %s15693_s20, 3  ;;  %v11387_v22 = vpack.c.bf16 %v14142_v18, %v14145_v17  ;;  %v14138_v29 = vand.u32 4294901760, %v11394_v25  ;;  %v14136_v30 = vand.u32 4294901760, %v11399_v26  ;;  %14820 = vst [vmem:[#allocation8_spill] sm:$0xff] %v11416_v33  ;;  %v14135_v39 = vand.u32 4294901760, %v11413_v31 }
  0x13   : > { %14815 = vst [vmem:[#allocation3_spill] sm:$0xff] %v11333_v13  ;;  %9912 = vmatpush3.bf16.msra.mxu0 %v11325_v10  ;;  %10104 = vmatpush3.bf16.msra.mxu1 %v11325_v10  ;;  %14816 = vst [vmem:[#allocation4_spill] sm:$0xff] %v11356_v16  ;;  %s11377_s11 = scalar_lea.vmem %s14122_s0, %s7407_s8  ;;  %v11424_v34 = vpack.c.bf16 %v14139_v24, %v14140_v23  ;;  %v11432_v37 = vsub.f32 %v239_v1, %v258_v4  ;;  %v14134_v43 = vand.u32 4294901760, %v11429_v35  ;;  %v11460_v48 = vld [vmem:[%s14124_s2 + $0x70] sm:$0xff]  ;;  %v11465_v49 = vld [vmem:[%s14124_s2 + $0x78] sm:$0xff]  ;;  %s13926_s30 = scalar_lea.vmem %s14125_s3, %s7407_s8 }
  0x14   : > { %9914 = vmatprep.subr.bf16.mxu0 %v11333_v13  ;;  %10106 = vmatprep.subr.bf16.mxu1 %v11333_v13  ;;  %v174_v21 = vld [vmem:[%s11377_s11] sm:$0xff]  ;;  %14817 = vst [vmem:[#allocation5_spill] sm:$0xff] %v11387_v22  ;;  %v175_v32 = vld [vmem:[%s11377_s11 + $0x8] sm:$0xff]  ;;  %v176_v38 = vld [vmem:[%s11377_s11 + $0x10] sm:$0xff]  ;;  %v11447_v42 = vpack.c.bf16 %v14136_v30, %v14138_v29  ;;  %v14129_v44 = vand.u32 4294901760, %v11416_v33  ;;  %v11471_v52 = vsub.f32 %v11306_v2, %v261_v6  ;;  %v14132_v58 = vand.u32 4294901760, %v11460_v48 }
  0x15   : > { %v11401_v27 = vand.u32 4294901760, %v174_v21  ;;  %14821 = vst [vmem:[#allocation9_spill] sm:$0xff] %v11424_v34  ;;  %14822 = vst [vmem:[#allocation10_spill] sm:$0xff] %v11432_v37  ;;  %v11440_v41 = vand.u32 4294901760, %v175_v32  ;;  %v11451_v45 = vand.u32 4294901760, %v176_v38  ;;  %v177_v46 = vld [vmem:[%s11377_s11 + $0x18] sm:$0xff]  ;;  %v11476_v53 = vsub.f32 %v11311_v5, %v264_v9 }
  0x16   : > { %14824 = vst [vmem:[#allocation12_spill] sm:$0xff] %v11447_v42  ;;  %v178_v47 = vld [vmem:[%s11377_s11 + $0x20] sm:$0xff]  ;;  %v14127_v51 = vand.u32 4294901760, %v11432_v37  ;;  %v11482_v55 = vand.u32 4294901760, %v177_v46  ;;  %v179_v57 = vld [vmem:[%s11377_s11 + $0x28] sm:$0xff]  ;;  %v14131_v59 = vand.u32 4294901760, %v11465_v49  ;;  %v979_v60 = vsub.f32 %v11416_v33, %v14129_v44 }
  0x17   : > { %9916 = vmatpush3.bf16.msra.mxu0 %v11333_v13  ;;  %10108 = vmatpush3.bf16.msra.mxu1 %v11333_v13  ;;  %14818 = vst [vmem:[#allocation6_spill] sm:$0xff] %v11401_v27  ;;  %v11405_v28 = vsub.f32 %v174_v21, %v11401_v27  ;;  %14823 = vst [vmem:[#allocation11_spill] sm:$0xff] %v11440_v41  ;;  %v11480_v54 = vsub.f32 %v175_v32, %v11440_v41  ;;  %v11484_v56 = vand.u32 4294901760, %v178_v47  ;;  %v180_v0 = vld [vmem:[%s11377_s11 + $0x30] sm:$0xff]  ;;  %v181_v4 = vld [vmem:[%s11377_s11 + $0x38] sm:$0xff] }
  0x18   : > { %9918 = vmatprep.subr.bf16.mxu0 %v11356_v16  ;;  %10110 = vmatprep.subr.bf16.mxu1 %v11356_v16  ;;  %14825 = vst [vmem:[#allocation13_spill] sm:$0xff] %v11451_v45  ;;  %14827 = vst [vmem:[#allocation15_spill] sm:$0xff] %v11482_v55  ;;  %v11494_v61 = vsub.f32 %v176_v38, %v11451_v45  ;;  %v11502_v62 = vpack.c.bf16 %v14134_v43, %v14135_v39  ;;  %v14128_v1 = vand.u32 4294901760, %v11471_v52  ;;  %v186_v17 = vld [vmem:[%s11377_s11 + $0x60] sm:$0xff] }
  0x19   : > { %14819 = vst [vmem:[#allocation7_spill] sm:$0xff] %v11405_v28  ;;  %v14126_v36 = vand.u32 4294901760, %v11405_v28  ;;  %14826 = vst [vmem:[#allocation14_spill] sm:$0xff] %v11480_v54  ;;  %v986_v63 = vsub.f32 %v11432_v37, %v14127_v51  ;;  %v14130_v2 = vand.u32 4294901760, %v11476_v53  ;;  %v11511_v3 = vand.u32 4294901760, %v179_v57 }
  0x1a   : > { %14828 = vst [vmem:[#allocation16_spill] sm:$0xff] %v11484_v56  ;;  %14829 = vst [vmem:[#allocation17_spill] sm:$0xff] %v11494_v61  ;;  %v11517_v5 = vsub.f32 %v11317_v7, %v267_v11  ;;  %v14133_v6 = vand.u32 4294901760, %v11480_v54  ;;  %v11521_v9 = vsub.f32 %v177_v46, %v11482_v55  ;;  %v11524_v21 = vsub.f32 %v178_v47, %v11484_v56  ;;  %v182_v47 = vld [vmem:[%s11377_s11 + $0x40] sm:$0xff] }
  0x1b   : > { %9920 = vmatpush3.bf16.msra.mxu0 %v11356_v16  ;;  %10112 = vmatpush3.bf16.msra.mxu1 %v11356_v16  ;;  %v338_v40 = vsub.f32 %v11405_v28, %v14126_v36  ;;  %14830 = vst [vmem:[#allocation18_spill] sm:$0xff] %v11502_v62  ;;  %14831 = vst [vmem:[#allocation19_spill] sm:$0xff] %v11511_v3  ;;  %v11531_v32 = vpack.c.bf16 %v14131_v59, %v14132_v58  ;;  %v980_v38 = vand.u32 4294901760, %v979_v60  ;;  %v183_v59 = vld [vmem:[%s11377_s11 + $0x48] sm:$0xff]  ;;  %v200_v28 = vld [vmem:[%s11377_s11 + $0xd0] sm:$0xff] }
  0x1c   : > { %9922 = vmatprep.subr.bf16.mxu0 %v11387_v22  ;;  %10114 = vmatprep.subr.bf16.mxu1 %v11387_v22  ;;  %14832 = vst [vmem:[#allocation20_spill] sm:$0xff] %v11521_v9  ;;  %14833 = vst [vmem:[#allocation21_spill] sm:$0xff] %v11524_v21  ;;  %v14137_v7 = vand.u32 4294901760, %v11494_v61  ;;  %v11534_v11 = vand.u32 4294901760, %v180_v0  ;;  %v11538_v46 = vand.u32 4294901760, %v181_v4  ;;  %v1000_v60 = vsub.f32 %v11476_v53, %v14130_v2 }
  0x1d   : > { %v339_v50 = vand.u32 4294901760, %v338_v40  ;;  %14834 = vst [vmem:[#allocation22_spill] sm:$0xff] %v11531_v32  ;;  %v987_v40 = vand.u32 4294901760, %v986_v63  ;;  %v11549_v36 = vsub.f32 %v179_v57, %v11511_v3  ;;  %v14141_v51 = vand.u32 4294901760, %v11517_v5 }
  0x1e   : > { %14835 = vst [vmem:[#allocation23_spill] sm:$0xff] %v11534_v11  ;;  %14836 = vst [vmem:[#allocation24_spill] sm:$0xff] %v11538_v46  ;;  %v11555_v63 = vsub.f32 %v11322_v8, %v270_v12  ;;  %v14144_v44 = vand.u32 4294901760, %v11521_v9  ;;  %v14143_v2 = vand.u32 4294901760, %v11524_v21  ;;  %v358_v57 = vsub.f32 %v11494_v61, %v14137_v7  ;;  %v184_v12 = vld [vmem:[%s11377_s11 + $0x50] sm:$0xff] }
  0x1f   : > { %9924 = vmatpush3.bf16.msra.mxu0 %v11387_v22  ;;  %10116 = vmatpush3.bf16.msra.mxu1 %v11387_v22  ;;  %14837 = vst [vmem:[#allocation25_spill] sm:$0xff] %v11549_v36  ;;  %v11568_v58 = vsub.f32 %v180_v0, %v11534_v11  ;;  %v11570_v8 = vand.u32 4294901760, %v182_v47  ;;  %v11578_v43 = vsub.f32 %v181_v4, %v11538_v46  ;;  %v1001_v30 = vand.u32 4294901760, %v1000_v60  ;;  %v185_v60 = vld [vmem:[%s11377_s11 + $0x58] sm:$0xff]  ;;  %v191_v22 = vld [vmem:[%s11377_s11 + $0x88] sm:$0xff] }
  0x20   : > { %9926 = vmatprep.subr.bf16.mxu0 %v11424_v34  ;;  %10118 = vmatprep.subr.bf16.mxu1 %v11424_v34  ;;  %v11582_v7 = vand.u32 4294901760, %v183_v59  ;;  %v1007_v29 = vsub.f32 %v11517_v5, %v14141_v51  ;;  %v14146_v24 = vand.u32 4294901760, %v11555_v63  ;;  %v368_v4 = vsub.f32 %v11521_v9, %v14144_v44 }
  0x21   : > { %8405 = vmatprep.mubr.f32.mxu0 %v339_v50  ;;  %v993_v50 = vsub.f32 %v11471_v52, %v14128_v1  ;;  %v348_v1 = vsub.f32 %v11480_v54, %v14133_v6  ;;  %14838 = vst [vmem:[#allocation26_spill] sm:$0xff] %v11568_v58  ;;  %14839 = vst [vmem:[#allocation27_spill] sm:$0xff] %v11570_v8  ;;  %v11575_v6 = vpack.c.bf16 %v987_v40, %v980_v38 }
  0x22   : > { %14841 = vst [vmem:[#allocation29_spill] sm:$0xff] %v11578_v43  ;;  %14842 = vst [vmem:[#allocation30_spill] sm:$0xff] %v11582_v7  ;;  %v378_v40 = vsub.f32 %v11524_v21, %v14143_v2  ;;  %v359_v23 = vand.u32 4294901760, %v358_v57  ;;  %v11600_v18 = vsub.f32 %v182_v47, %v11570_v8  ;;  %v1008_v57 = vand.u32 4294901760, %v1007_v29 }
  0x23   : > { %9928 = vmatpush3.bf16.msra.mxu0 %v11424_v34  ;;  %10120 = vmatpush3.bf16.msra.mxu1 %v11424_v34  ;;  %14840 = vst [vmem:[#allocation28_spill] sm:$0xff] %v11575_v6  ;;  %v994_v39 = vand.u32 4294901760, %v993_v50  ;;  %v349_v38 = vand.u32 4294901760, %v348_v1  ;;  %v11594_v50 = vand.u32 4294901760, %v184_v12  ;;  %v1014_v1 = vsub.f32 %v11555_v63, %v14146_v24 }
  0x24   : > { %9930 = vmatprep.subr.bf16.mxu0 %v11447_v42  ;;  %10122 = vmatprep.subr.bf16.mxu1 %v11447_v42  ;;  %14844 = vst [vmem:[#allocation32_spill] sm:$0xff] %v11600_v18  ;;  %v11613_v47 = vsub.f32 %v183_v59, %v11582_v7  ;;  %v11615_v51 = vand.u32 4294901760, %v185_v60  ;;  %v369_v0 = vand.u32 4294901760, %v368_v4  ;;  %v379_v29 = vand.u32 4294901760, %v378_v40  ;;  %v187_v4 = vld [vmem:[%s11377_s11 + $0x68] sm:$0xff] }
  0x25   : > { %14843 = vst [vmem:[#allocation31_spill] sm:$0xff] %v11594_v50  ;;  %v11608_v44 = vpack.c.bf16 %v1001_v30, %v994_v39  ;;  %v1015_v24 = vand.u32 4294901760, %v1014_v1  ;;  %v11621_v30 = vsub.f32 %v184_v12, %v11594_v50  ;;  %v14850_v39 = vand.u32 4294901760, %v11568_v58  ;;  %v188_v1 = vld [vmem:[%s11377_s11 + $0x70] sm:$0xff] }
  0x26   : > { %14846 = vst [vmem:[#allocation34_spill] sm:$0xff] %v11613_v47  ;;  %14847 = vst [vmem:[#allocation35_spill] sm:$0xff] %v11615_v51  ;;  %v11640_v40 = vsub.f32 %v185_v60, %v11615_v51  ;;  %v189_v60 = vld [vmem:[%s11377_s11 + $0x78] sm:$0xff]  ;;  %v14887_v13 = vand.u32 4294901760, %v11368_v20 }
  0x27   : > { %9932 = vmatpush3.bf16.msra.mxu0 %v11447_v42  ;;  %10124 = vmatpush3.bf16.msra.mxu1 %v11447_v42  ;;  %14845 = vst [vmem:[#allocation33_spill] sm:$0xff] %v11608_v44  ;;  %14849 = vst [vmem:[#allocation36_spill] sm:$0xff] %v11621_v30  ;;  %v398_v59 = vsub.f32 %v11568_v58, %v14850_v39  ;;  %v14855_v39 = vand.u32 4294901760, %v11338_v14  ;;  %v14857_v42 = vand.u32 4294901760, %v11343_v15 }
  0x28   : > { %9934 = vmatprep.subr.bf16.mxu0 %v11502_v62  ;;  %10126 = vmatprep.subr.bf16.mxu1 %v11502_v62  ;;  %14854 = vst [vmem:[#allocation39_spill] sm:$0xff] %v11640_v40  ;;  %v11759_v61 = vsub.f32 %v11368_v20, %v14887_v13 }
  0x29   : > { %v11650_v34 = vsub.f32 %v11343_v15, %v14857_v42 }
  0x2a   : > { %14888 = vst [vmem:[#allocation62_spill] sm:$0xff] %v11759_v61 }
  0x2b   : > { %9936 = vmatpush3.bf16.msra.mxu0 %v11502_v62  ;;  %10128 = vmatpush3.bf16.msra.mxu1 %v11502_v62  ;;  %v11645_v62 = vsub.f32 %v11338_v14, %v14855_v39  ;;  %14858 = vst [vmem:[#allocation41_spill] sm:$0xff] %v11650_v34  ;;  %v14861_v14 = vand.u32 4294901760, %v11600_v18 }
  0x2c   : > { %9938 = vmatprep.subr.bf16.mxu0 %v11531_v32  ;;  %10130 = vmatprep.subr.bf16.mxu1 %v11531_v32 }
  0x2d   : > { %14856 = vst [vmem:[#allocation40_spill] sm:$0xff] %v11645_v62  ;;  %v418_v39 = vsub.f32 %v11600_v18, %v14861_v14  ;;  %v14170_v14 = vand.u32 4294901760, %v11645_v62 }
  0x2f   : > { %9940 = vmatpush3.bf16.msra.mxu0 %v11531_v32  ;;  %10132 = vmatpush3.bf16.msra.mxu1 %v11531_v32  ;;  %v14848_v32 = vand.u32 4294901760, %v11549_v36 }
  0x30   : > { %9942 = vmatprep.subr.bf16.mxu0 %v11575_v6  ;;  %10134 = vmatprep.subr.bf16.mxu1 %v11575_v6 }
  0x31   : > { %v388_v2 = vsub.f32 %v11549_v36, %v14848_v32  ;;  %v14852_v32 = vand.u32 4294901760, %v11578_v43 }
  0x32   : > { %8406 = vmatmul.mubr.f32.vlgmr.msra.gmra.mrb[0].mxu0 %v349_v38  ;;  %v11628_v38 = vand.u32 4294901760, %v186_v17 }
  0x33   : > { %9944 = vmatpush3.bf16.msra.mxu0 %v11575_v6  ;;  %8408 = vmatprep.mubr.f32.mxu0 %v359_v23  ;;  %v408_v12 = vsub.f32 %v11578_v43, %v14852_v32  ;;  %v11636_v6 = vpack.c.bf16 %v1015_v24, %v1008_v57  ;;  %v389_v32 = vand.u32 4294901760, %v388_v2  ;;  %v11653_v57 = vand.u32 4294901760, %v187_v4  ;;  %v190_v2 = vld [vmem:[%s11377_s11 + $0x80] sm:$0xff] }
  0x34   : > { %14851 = vst [vmem:[#allocation37_spill] sm:$0xff] %v11628_v38  ;;  %9946 = vmatprep.subr.bf16.mxu0 %v11608_v44  ;;  %v11655_v23 = vand.u32 4294901760, %v188_v1  ;;  %v399_v43 = vand.u32 4294901760, %v398_v59  ;;  %v11663_v15 = vsub.f32 %v186_v17, %v11628_v38  ;;  %v11671_v59 = vand.u32 4294901760, %v189_v60 }
  0x35   : > { %14853 = vst [vmem:[#allocation38_spill] sm:$0xff] %v11636_v6  ;;  %14859 = vst [vmem:[#allocation42_spill] sm:$0xff] %v11653_v57  ;;  %v409_v42 = vand.u32 4294901760, %v408_v12  ;;  %v11678_v12 = vsub.f32 %v187_v4, %v11653_v57  ;;  %v11686_v58 = vand.u32 4294901760, %v190_v2  ;;  %v192_v4 = vld [vmem:[%s11377_s11 + $0x90] sm:$0xff] }
  0x36   : > { %8409 = vmatmul.mubr.f32.gmra.mrb[2].mxu0 %v369_v0  ;;  %14860 = vst [vmem:[#allocation43_spill] sm:$0xff] %v11655_v23  ;;  %14862 = vst [vmem:[#allocation44_spill] sm:$0xff] %v11663_v15  ;;  %v14863_v0 = vand.u32 4294901760, %v11613_v47  ;;  %v11681_v18 = vsub.f32 %v188_v1, %v11655_v23  ;;  %v14872_v21 = vand.u32 4294901760, %v11663_v15 }
  0x37   : > { %8411 = vmatprep.mubr.f32.mxu0 %v379_v29  ;;  %9948 = vmatpush3.bf16.msra.mxu0 %v11608_v44  ;;  %14864 = vst [vmem:[#allocation45_spill] sm:$0xff] %v11671_v59  ;;  %v14865_v44 = vand.u32 4294901760, %v11621_v30  ;;  %14866 = vst [vmem:[#allocation46_spill] sm:$0xff] %v11678_v12  ;;  %v419_v29 = vand.u32 4294901760, %v418_v39  ;;  %v11700_v39 = vsub.f32 %v189_v60, %v11671_v59  ;;  %v14877_v36 = vand.u32 4294901760, %v11678_v12 }
  0x38   : > { %9950 = vmatprep.subr.bf16.mxu0 %v11636_v6  ;;  %v428_v24 = vsub.f32 %v11613_v47, %v14863_v0  ;;  %14867 = vst [vmem:[#allocation47_spill] sm:$0xff] %v11681_v18  ;;  %v14177_v0 = vand.u32 4294901760, %v11650_v34  ;;  %14868 = vst [vmem:[#allocation48_spill] sm:$0xff] %v11686_v58  ;;  %v11702_v47 = vand.u32 4294901760, %v191_v22  ;;  %v11710_v60 = vsub.f32 %v190_v2, %v11686_v58 }
  0x39   : > { %v438_v17 = vsub.f32 %v11621_v30, %v14865_v44  ;;  %v1021_v44 = vsub.f32 %v11645_v62, %v14170_v14  ;;  %14870 = vst [vmem:[#allocation49_spill] sm:$0xff] %v11700_v39  ;;  %v14196_v30 = vand.u32 4294901760, %v11700_v39  ;;  %v14878_v2 = vand.u32 4294901760, %v11681_v18 }
  0x3a   : > { %8412 = vmatmul.mubr.f32.gmra.mrb[4].mxu0 %v389_v32  ;;  %v1028_v1 = vsub.f32 %v11650_v34, %v14177_v0  ;;  %v14869_v32 = vand.u32 4294901760, %v11640_v40  ;;  %14871 = vst [vmem:[#allocation50_spill] sm:$0xff] %v11702_v47  ;;  %v429_v14 = vand.u32 4294901760, %v428_v24  ;;  %14873 = vst [vmem:[#allocation51_spill] sm:$0xff] %v11710_v60 }
  0x3b   : > { %8414 = vmatprep.mubr.f32.mxu0 %v399_v43  ;;  %9952 = vmatpush3.bf16.msra.mxu0 %v11636_v6  ;;  %v1022_v6 = vand.u32 4294901760, %v1021_v44  ;;  %v439_v0 = vand.u32 4294901760, %v438_v17  ;;  %v193_v44 = vld [vmem:[%s11377_s11 + $0x98] sm:$0xff] }
  0x3c   : > { %v448_v43 = vsub.f32 %v11640_v40, %v14869_v32  ;;  %v1029_v16 = vand.u32 4294901760, %v1028_v1  ;;  %v458_v32 = vsub.f32 %v11663_v15, %v14872_v21  ;;  %v11712_v40 = vand.u32 4294901760, %v192_v4 }
  0x3d   : > { %v11720_v1 = vsub.f32 %v191_v22, %v11702_v47  ;;  %v468_v21 = vsub.f32 %v11678_v12, %v14877_v36  ;;  %v478_v15 = vsub.f32 %v11681_v18, %v14878_v2  ;;  %v11729_v9 = vand.u32 4294901760, %v193_v44 }
  0x3e   : > { %8415 = vmatmul.mubr.f32.gmra.mrb[6].mxu0 %v409_v42  ;;  %14874 = vst [vmem:[#allocation52_spill] sm:$0xff] %v11712_v40  ;;  %v194_v42 = vld [vmem:[%s11377_s11 + $0xa0] sm:$0xff]  ;;  %v11716_v24 = vpack.c.bf16 %v1029_v16, %v1022_v6  ;;  %v449_v17 = vand.u32 4294901760, %v448_v43  ;;  %v196_v16 = vld [vmem:[%s11377_s11 + $0xb0] sm:$0xff]  ;;  %v459_v6 = vand.u32 4294901760, %v458_v32  ;;  %v488_v2 = vsub.f32 %v11700_v39, %v14196_v30 }
  0x3f   : > { %8417 = vmatprep.mubr.f32.mxu0 %v419_v29  ;;  %14876 = vst [vmem:[#allocation54_spill] sm:$0xff] %v11720_v1  ;;  %v195_v29 = vld [vmem:[%s11377_s11 + $0xa8] sm:$0xff]  ;;  %14879 = vst [vmem:[#allocation55_spill] sm:$0xff] %v11729_v9  ;;  %v11737_v43 = vand.u32 4294901760, %v194_v42  ;;  %v11746_v32 = vand.u32 4294901760, %v196_v16  ;;  %v14884_v22 = vand.u32 4294901760, %v11363_v19 }
  0x40   : > { %14875 = vst [vmem:[#allocation53_spill] sm:$0xff] %v11716_v24  ;;  %9954 = vmatprep.subr.bf16.mxu0 %v11716_v24  ;;  %v11740_v36 = vand.u32 4294901760, %v195_v29  ;;  %v469_v18 = vand.u32 4294901760, %v468_v21  ;;  %v479_v12 = vand.u32 4294901760, %v478_v15  ;;  %v14889_v30 = vand.u32 4294901760, %v11710_v60  ;;  %v197_v15 = vld [vmem:[%s11377_s11 + $0xb8] sm:$0xff] }
  0x41   : > { %14881 = vst [vmem:[#allocation57_spill] sm:$0xff] %v11737_v43  ;;  %9956 = vmatpush3.bf16.msra.mxu0 %v11716_v24  ;;  %14883 = vst [vmem:[#allocation59_spill] sm:$0xff] %v11746_v32  ;;  %v11754_v24 = vsub.f32 %v193_v44, %v11729_v9  ;;  %v198_v21 = vld [vmem:[%s11377_s11 + $0xc0] sm:$0xff]  ;;  %v489_v20 = vand.u32 4294901760, %v488_v2  ;;  %v199_v2 = vld [vmem:[%s11377_s11 + $0xc8] sm:$0xff]  ;;  %v14896_v39 = vand.u32 4294901760, %v11759_v61 }
  0x42   : > { %8418 = vmatmul.mubr.f32.gmra.mrb[8].mxu0 %v429_v14  ;;  %v11735_v14 = vsub.f32 %v192_v4, %v11712_v40  ;;  %14882 = vst [vmem:[#allocation58_spill] sm:$0xff] %v11740_v36  ;;  %v11751_v4 = vsub.f32 %v11363_v19, %v14884_v22  ;;  %v11772_v22 = vsub.f32 %v195_v29, %v11740_v36  ;;  %v11785_v29 = vand.u32 4294901760, %v197_v15 }
  0x43   : > { %8420 = vmatprep.mubr.f32.mxu0 %v439_v0  ;;  %14886 = vst [vmem:[#allocation61_spill] sm:$0xff] %v11754_v24  ;;  %v498_v0 = vsub.f32 %v11710_v60, %v14889_v30  ;;  %v11779_v19 = vsub.f32 %v196_v16, %v11746_v32  ;;  %v11787_v13 = vand.u32 4294901760, %v198_v21  ;;  %v11800_v9 = vand.u32 4294901760, %v199_v2 }
  0x44   : > { %14880 = vst [vmem:[#allocation56_spill] sm:$0xff] %v11735_v14  ;;  %14885 = vst [vmem:[#allocation60_spill] sm:$0xff] %v11751_v4  ;;  %v14205_v44 = vand.u32 4294901760, %v11751_v4 }
  0x45   : > { %14891 = vst [vmem:[#allocation64_spill] sm:$0xff] %v11772_v22  ;;  %14893 = vst [vmem:[#allocation65_spill] sm:$0xff] %v11779_v19  ;;  %v499_v16 = vand.u32 4294901760, %v498_v0 }
  0x46   : > { %8421 = vmatmul.mubr.f32.gmra.mrb[10].mxu0 %v449_v17  ;;  %v11766_v17 = vsub.f32 %v194_v42, %v11737_v43  ;;  %v1035_v42 = vsub.f32 %v11751_v4, %v14205_v44  ;;  %14894 = vst [vmem:[#allocation66_spill] sm:$0xff] %v11785_v29  ;;  %14895 = vst [vmem:[#allocation67_spill] sm:$0xff] %v11787_v13  ;;  %v11817_v43 = vand.u32 4294901760, %v200_v28 }
  0x47   : > { %8423 = vmatprep.mubr.f32.mxu0 %v459_v6  ;;  %v14892_v6 = vand.u32 4294901760, %v11720_v1  ;;  %14898 = vst [vmem:[#allocation68_spill] sm:$0xff] %v11800_v9 }
  0x48   : > { %14890 = vst [vmem:[#allocation63_spill] sm:$0xff] %v11766_v17  ;;  %v1036_v44 = vand.u32 4294901760, %v1035_v42  ;;  %v11810_v42 = vsub.f32 %v198_v21, %v11787_v13  ;;  %14903 = vst [vmem:[#allocation72_spill] sm:$0xff] %v11817_v43  ;;  %v11830_v21 = vsub.f32 %v199_v2, %v11800_v9  ;;  %v11843_v2 = vsub.f32 %v200_v28, %v11817_v43 }
  0x49   : > { %v508_v30 = vsub.f32 %v11720_v1, %v14892_v6  ;;  %v1042_v6 = vsub.f32 %v11759_v61, %v14896_v39  ;;  %v14897_v1 = vand.u32 4294901760, %v11735_v14  ;;  %v201_v39 = vld [vmem:[%s11377_s11 + $0xd8] sm:$0xff] }
  0x4a   : > { %8424 = vmatmul.mubr.f32.gmra.mrb[12].mxu0 %v469_v18  ;;  %v14218_v18 = vand.u32 4294901760, %v11766_v17  ;;  %14901 = vst [vmem:[#allocation70_spill] sm:$0xff] %v11810_v42  ;;  %14907 = vst [vmem:[#allocation74_spill] sm:$0xff] %v11830_v21  ;;  %v14925_v13 = vand.u32 4294901760, %v11843_v2 }
  0x4b   : > { %8426 = vmatprep.mubr.f32.mxu0 %v479_v12  ;;  %v518_v54 = vsub.f32 %v11735_v14, %v14897_v1  ;;  %v1043_v32 = vand.u32 4294901760, %v1042_v6  ;;  %v509_v36 = vand.u32 4294901760, %v508_v30  ;;  %v14899_v12 = vand.u32 4294901760, %v11754_v24  ;;  %14911 = vst [vmem:[#allocation77_spill] sm:$0xff] %v11843_v2 }
  0x4c   : > { %v11807_v1 = vsub.f32 %v197_v15, %v11785_v29  ;;  %v538_v6 = vsub.f32 %v11766_v17, %v14218_v18  ;;  %v14904_v14 = vand.u32 4294901760, %v11772_v22  ;;  %v598_v29 = vsub.f32 %v11843_v2, %v14925_v13 }
  0x4d   : > { %v528_v0 = vsub.f32 %v11754_v24, %v14899_v12  ;;  %v11812_v60 = vpack.c.bf16 %v1043_v32, %v1036_v44  ;;  %v519_v30 = vand.u32 4294901760, %v518_v54  ;;  %v11823_v12 = vand.u32 4294901760, %v201_v39 }
  0x4e   : > { %8427 = vmatmul.mubr.f32.gmra.mrb[14].mxu0 %v489_v20  ;;  %14900 = vst [vmem:[#allocation69_spill] sm:$0xff] %v11807_v1  ;;  %v202_v20 = vld [vmem:[%s11377_s11 + $0xe0] sm:$0xff]  ;;  %v548_v15 = vsub.f32 %v11772_v22, %v14904_v14  ;;  %v14906_v32 = vand.u32 4294901760, %v11779_v19  ;;  %v14908_v44 = vand.u32 4294901760, %v11394_v25  ;;  %v204_v22 = vld [vmem:[%s11377_s11 + $0xf0] sm:$0xff]  ;;  %v14915_v24 = vand.u32 4294901760, %v11807_v1 }
  0x4f   : > { %14902 = vst [vmem:[#allocation71_spill] sm:$0xff] %v11812_v60  ;;  %8429 = vmatprep.mubr.f32.mxu0 %v499_v16  ;;  %14905 = vst [vmem:[#allocation73_spill] sm:$0xff] %v11823_v12  ;;  %9958 = vmatprep.subr.bf16.mxu0 %v11812_v60  ;;  %v529_v14 = vand.u32 4294901760, %v528_v0  ;;  %v11840_v17 = vand.u32 4294901760, %v202_v20  ;;  %v599_v2 = vand.u32 4294901760, %v598_v29 }
  0x50   : > { %v558_v54 = vsub.f32 %v11779_v19, %v14906_v32  ;;  %9960 = vmatpush3.bf16.msra.mxu0 %v11812_v60  ;;  %v11836_v16 = vsub.f32 %v11394_v25, %v14908_v44  ;;  %v539_v32 = vand.u32 4294901760, %v538_v6  ;;  %v203_v60 = vld [vmem:[%s11377_s11 + $0xe8] sm:$0xff]  ;;  %v14912_v25 = vand.u32 4294901760, %v11399_v26  ;;  %v205_v6 = vld [vmem:[%s11377_s11 + $0xf8] sm:$0xff] }
  0x51   : > { %14910 = vst [vmem:[#allocation76_spill] sm:$0xff] %v11840_v17  ;;  %v549_v0 = vand.u32 4294901760, %v548_v15  ;;  %v11853_v44 = vsub.f32 %v201_v39, %v11823_v12  ;;  %v14916_v15 = vand.u32 4294901760, %v11810_v42  ;;  %v206_v12 = vld [vmem:[%s11377_s11 + $0x100] sm:$0xff] }
  0x52   : > { %14909 = vst [vmem:[#allocation75_spill] sm:$0xff] %v11836_v16  ;;  %8430 = vmatmul.mubr.f32.gmra.mrb[16].mxu0 %v509_v36  ;;  %v14231_v19 = vand.u32 4294901760, %v11836_v16  ;;  %v11850_v36 = vsub.f32 %v11399_v26, %v14912_v25  ;;  %v568_v26 = vsub.f32 %v11807_v1, %v14915_v24  ;;  %v11868_v25 = vsub.f32 %v202_v20, %v11840_v17 }
  0x53   : > { %8432 = vmatprep.mubr.f32.mxu0 %v519_v30  ;;  %14914 = vst [vmem:[#allocation79_spill] sm:$0xff] %v11853_v44  ;;  %v559_v30 = vand.u32 4294901760, %v558_v54  ;;  %v578_v39 = vsub.f32 %v11810_v42, %v14916_v15  ;;  %v11870_v54 = vand.u32 4294901760, %v203_v60  ;;  %v11881_v20 = vand.u32 4294901760, %v205_v6 }
  0x54   : > { %14913 = vst [vmem:[#allocation78_spill] sm:$0xff] %v11850_v36  ;;  %v1049_v28 = vsub.f32 %v11836_v16, %v14231_v19  ;;  %14917 = vst [vmem:[#allocation80_spill] sm:$0xff] %v11868_v25  ;;  %v14920_v24 = vand.u32 4294901760, %v11850_v36  ;;  %v11883_v42 = vand.u32 4294901760, %v206_v12  ;;  %v569_v43 = vand.u32 4294901760, %v568_v26 }
  0x55   : > { %14918 = vst [vmem:[#allocation81_spill] sm:$0xff] %v11870_v54  ;;  %14921 = vst [vmem:[#allocation83_spill] sm:$0xff] %v11881_v20  ;;  %v11890_v9 = vsub.f32 %v203_v60, %v11870_v54  ;;  %v579_v15 = vand.u32 4294901760, %v578_v39  ;;  %v14928_v26 = vand.u32 4294901760, %v11853_v44  ;;  %v11906_v60 = vsub.f32 %v205_v6, %v11881_v20 }
  0x56   : > { %8433 = vmatmul.mubr.f32.gmra.mrb[18].mxu0 %v529_v14  ;;  %v11875_v14 = vand.u32 4294901760, %v204_v22  ;;  %v1050_v18 = vand.u32 4294901760, %v1049_v28  ;;  %v1056_v1 = vsub.f32 %v11850_v36, %v14920_v24  ;;  %14922 = vst [vmem:[#allocation84_spill] sm:$0xff] %v11883_v42  ;;  %v207_v24 = vld [vmem:[%s11377_s11 + $0x108] sm:$0xff]  ;;  %v208_v28 = vld [vmem:[%s11377_s11 + $0x110] sm:$0xff]  ;;  %v14957_v54 = vand.u32 4294901760, %v11465_v49 }
  0x57   : > { %8435 = vmatprep.mubr.f32.mxu0 %v539_v32  ;;  %v14923_v32 = vand.u32 4294901760, %v11830_v21  ;;  %14924 = vst [vmem:[#allocation85_spill] sm:$0xff] %v11890_v9  ;;  %14929 = vst [vmem:[#allocation88_spill] sm:$0xff] %v11906_v60  ;;  %v11911_v39 = vand.u32 4294901760, %v207_v24 }
  0x58   : > { %14919 = vst [vmem:[#allocation82_spill] sm:$0xff] %v11875_v14  ;;  %v1057_v17 = vand.u32 4294901760, %v1056_v1  ;;  %v11897_v1 = vsub.f32 %v204_v22, %v11875_v14 }
  0x59   : > { %v588_v19 = vsub.f32 %v11830_v21, %v14923_v32  ;;  %v608_v32 = vsub.f32 %v11853_v44, %v14928_v26  ;;  %14931 = vst [vmem:[#allocation90_spill] sm:$0xff] %v11911_v39  ;;  %v11939_v29 = vsub.f32 %v207_v24, %v11911_v39  ;;  %v211_v26 = vld [vmem:[%s11377_s11 + $0x128] sm:$0xff] }
  0x5a   : > { %8436 = vmatmul.mubr.f32.gmra.mrb[20].mxu0 %v549_v0  ;;  %14926 = vst [vmem:[#allocation86_spill] sm:$0xff] %v11897_v1  ;;  %v11899_v0 = vpack.c.bf16 %v1057_v17, %v1050_v18  ;;  %v14932_v17 = vand.u32 4294901760, %v11413_v31  ;;  %v14934_v18 = vand.u32 4294901760, %v11868_v25  ;;  %v14942_v39 = vand.u32 4294901760, %v11897_v1 }
  0x5b   : > { %8438 = vmatprep.mubr.f32.mxu0 %v559_v30  ;;  %v11909_v30 = vsub.f32 %v206_v12, %v11883_v42  ;;  %v589_v13 = vand.u32 4294901760, %v588_v19  ;;  %v14935_v12 = vand.u32 4294901760, %v11429_v35  ;;  %14938 = vst [vmem:[#allocation94_spill] sm:$0xff] %v11939_v29  ;;  %v11963_v20 = vand.u32 4294901760, %v211_v26 }
  0x5c   : > { %14927 = vst [vmem:[#allocation87_spill] sm:$0xff] %v11899_v0  ;;  %9962 = vmatprep.subr.bf16.mxu0 %v11899_v0  ;;  %v11917_v22 = vsub.f32 %v11413_v31, %v14932_v17  ;;  %v618_v6 = vsub.f32 %v11868_v25, %v14934_v18  ;;  %v11929_v31 = vand.u32 4294901760, %v208_v28  ;;  %v609_v17 = vand.u32 4294901760, %v608_v32  ;;  %v210_v18 = vld [vmem:[%s11377_s11 + $0x120] sm:$0xff] }
  0x5d   : > { %14930 = vst [vmem:[#allocation89_spill] sm:$0xff] %v11909_v30  ;;  %v11926_v44 = vsub.f32 %v11429_v35, %v14935_v12  ;;  %9964 = vmatpush3.bf16.msra.mxu0 %v11899_v0  ;;  %v14939_v0 = vand.u32 4294901760, %v11890_v9  ;;  %v212_v35 = vld [vmem:[%s11377_s11 + $0x130] sm:$0xff]  ;;  %14945 = vst [vmem:[#allocation98_spill] sm:$0xff] %v11963_v20 }
  0x5e   : > { %14933 = vst [vmem:[#allocation91_spill] sm:$0xff] %v11917_v22  ;;  %8439 = vmatmul.mubr.f32.gmra.mrb[22].mxu0 %v569_v43  ;;  %14937 = vst [vmem:[#allocation93_spill] sm:$0xff] %v11929_v31  ;;  %v209_v43 = vld [vmem:[%s11377_s11 + $0x118] sm:$0xff]  ;;  %v14258_v19 = vand.u32 4294901760, %v11917_v22  ;;  %v619_v21 = vand.u32 4294901760, %v618_v6  ;;  %v11960_v6 = vand.u32 4294901760, %v210_v18 }
  0x5f   : > { %14936 = vst [vmem:[#allocation92_spill] sm:$0xff] %v11926_v44  ;;  %8441 = vmatprep.mubr.f32.mxu0 %v579_v15  ;;  %v628_v32 = vsub.f32 %v11890_v9, %v14939_v0  ;;  %v11947_v25 = vand.u32 4294901760, %v209_v43  ;;  %v14941_v15 = vand.u32 4294901760, %v11926_v44  ;;  %v11965_v14 = vand.u32 4294901760, %v212_v35 }
  0x60   : > { %v1063_v12 = vsub.f32 %v11917_v22, %v14258_v19  ;;  %v638_v19 = vsub.f32 %v11897_v1, %v14942_v39  ;;  %14944 = vst [vmem:[#allocation97_spill] sm:$0xff] %v11960_v6  ;;  %v213_v1 = vld [vmem:[%s11377_s11 + $0x138] sm:$0xff] }
  0x61   : > { %14940 = vst [vmem:[#allocation95_spill] sm:$0xff] %v11947_v25  ;;  %v1070_v24 = vsub.f32 %v11926_v44, %v14941_v15  ;;  %14946 = vst [vmem:[#allocation99_spill] sm:$0xff] %v11965_v14  ;;  %v14947_v15 = vand.u32 4294901760, %v11906_v60 }
  0x62   : > { %8442 = vmatmul.mubr.f32.gmra.mrb[24].mxu0 %v589_v13  ;;  %v11958_v13 = vsub.f32 %v208_v28, %v11929_v31  ;;  %v1064_v0 = vand.u32 4294901760, %v1063_v12  ;;  %v11971_v28 = vsub.f32 %v209_v43, %v11947_v25  ;;  %v639_v12 = vand.u32 4294901760, %v638_v19 }
  0x63   : > { %8444 = vmatprep.mubr.f32.mxu0 %v599_v2  ;;  %v1071_v9 = vand.u32 4294901760, %v1070_v24  ;;  %v629_v2 = vand.u32 4294901760, %v628_v32  ;;  %v648_v39 = vsub.f32 %v11906_v60, %v14947_v15  ;;  %v14950_v24 = vand.u32 4294901760, %v11909_v30  ;;  %v214_v32 = vld [vmem:[%s11377_s11 + $0x140] sm:$0xff] }
  0x64   : > { %14943 = vst [vmem:[#allocation96_spill] sm:$0xff] %v11958_v13  ;;  %14948 = vst [vmem:[#allocation100_spill] sm:$0xff] %v11971_v28  ;;  %v14952_v43 = vand.u32 4294901760, %v11460_v48  ;;  %v11994_v19 = vsub.f32 %v211_v26, %v11963_v20  ;;  %v218_v20 = vld [vmem:[%s11377_s11 + $0x160] sm:$0xff] }
  0x65   : > { %v11974_v31 = vpack.c.bf16 %v1071_v9, %v1064_v0  ;;  %v658_v42 = vsub.f32 %v11909_v30, %v14950_v24  ;;  %v14953_v9 = vand.u32 4294901760, %v11939_v29  ;;  %v11999_v0 = vand.u32 4294901760, %v213_v1 }
  0x66   : > { %8445 = vmatmul.mubr.f32.gmra.mrb[26].mxu0 %v609_v17  ;;  %v11981_v17 = vsub.f32 %v210_v18, %v11960_v6  ;;  %v11988_v15 = vsub.f32 %v11460_v48, %v14952_v43  ;;  %14954 = vst [vmem:[#allocation103_spill] sm:$0xff] %v11994_v19  ;;  %v11997_v18 = vsub.f32 %v212_v35, %v11965_v14  ;;  %v649_v24 = vand.u32 4294901760, %v648_v39  ;;  %v215_v48 = vld [vmem:[%s11377_s11 + $0x148] sm:$0xff]  ;;  %v217_v14 = vld [vmem:[%s11377_s11 + $0x158] sm:$0xff] }
  0x67   : > { %14949 = vst [vmem:[#allocation101_spill] sm:$0xff] %v11974_v31  ;;  %8447 = vmatprep.mubr.f32.mxu0 %v619_v21  ;;  %9966 = vmatprep.subr.bf16.mxu0 %v11974_v31  ;;  %v668_v21 = vsub.f32 %v11939_v29, %v14953_v9  ;;  %14956 = vst [vmem:[#allocation105_spill] sm:$0xff] %v11999_v0  ;;  %v12007_v9 = vsub.f32 %v11465_v49, %v14957_v54  ;;  %v659_v26 = vand.u32 4294901760, %v658_v42 }
  0x68   : > { %14951 = vst [vmem:[#allocation102_spill] sm:$0xff] %v11981_v17  ;;  %14955 = vst [vmem:[#allocation104_spill] sm:$0xff] %v11997_v18  ;;  %9968 = vmatpush3.bf16.msra.mxu0 %v11974_v31  ;;  %v14287_v43 = vand.u32 4294901760, %v11988_v15  ;;  %v14958_v35 = vand.u32 4294901760, %v11958_v13  ;;  %v12013_v39 = vand.u32 4294901760, %v214_v32  ;;  %v216_v31 = vld [vmem:[%s11377_s11 + $0x150] sm:$0xff]  ;;  %v12024_v60 = vsub.f32 %v213_v1, %v11999_v0 }
  0x69   : > { %v14292_v49 = vand.u32 4294901760, %v12007_v9  ;;  %v669_v54 = vand.u32 4294901760, %v668_v21  ;;  %v12042_v0 = vand.u32 4294901760, %v216_v31 }
  0x6a   : > { %8448 = vmatmul.mubr.f32.gmra.mrb[28].mxu0 %v629_v2  ;;  %v678_v29 = vsub.f32 %v11958_v13, %v14958_v35  ;;  %14959 = vst [vmem:[#allocation106_spill] sm:$0xff] %v12013_v39  ;;  %v1077_v30 = vsub.f32 %v11988_v15, %v14287_v43  ;;  %14960 = vst [vmem:[#allocation107_spill] sm:$0xff] %v12024_v60  ;;  %v14961_v35 = vand.u32 4294901760, %v11971_v28  ;;  %v12029_v13 = vand.u32 4294901760, %v215_v48 }
  0x6b   : > { %8450 = vmatprep.mubr.f32.mxu0 %v639_v12  ;;  %v1084_v21 = vsub.f32 %v12007_v9, %v14292_v49  ;;  %v14963_v12 = vand.u32 4294901760, %v11981_v17  ;;  %14965 = vst [vmem:[#allocation110_spill] sm:$0xff] %v12042_v0 }
  0x6c   : > { %v688_v2 = vsub.f32 %v11971_v28, %v14961_v35  ;;  %14962 = vst [vmem:[#allocation108_spill] sm:$0xff] %v12029_v13  ;;  %v1078_v43 = vand.u32 4294901760, %v1077_v30  ;;  %v679_v42 = vand.u32 4294901760, %v678_v29  ;;  %v14966_v28 = vand.u32 4294901760, %v11994_v19 }
  0x6d   : > { %v698_v1 = vsub.f32 %v11981_v17, %v14963_v12  ;;  %v1085_v35 = vand.u32 4294901760, %v1084_v21  ;;  %v12050_v29 = vand.u32 4294901760, %v218_v20  ;;  %v12059_v21 = vpack.c.bf16 %v11432_v37, %v11416_v33  ;;  %v225_v33 = vld [vmem:[%s11377_s11 + $0x198] sm:$0xff] }
  0x6e   : > { %8451 = vmatmul.mubr.f32.gmra.mrb[30].mxu0 %v649_v24  ;;  %v12040_v24 = vsub.f32 %v214_v32, %v12013_v39  ;;  %v708_v30 = vsub.f32 %v11994_v19, %v14966_v28  ;;  %v689_v12 = vand.u32 4294901760, %v688_v2  ;;  %v12053_v32 = vsub.f32 %v215_v48, %v12029_v13  ;;  %v219_v2 = vld [vmem:[%s11377_s11 + $0x168] sm:$0xff]  ;;  %v220_v48 = vld [vmem:[%s11377_s11 + $0x170] sm:$0xff] }
  0x6f   : > { %8453 = vmatprep.mubr.f32.mxu0 %v659_v26  ;;  %v12048_v26 = vand.u32 4294901760, %v217_v14  ;;  %14968 = vst [vmem:[#allocation112_spill] sm:$0xff] %v12050_v29  ;;  %v12055_v17 = vpack.c.bf16 %v1085_v35, %v1078_v43  ;;  %14971 = vst [vmem:[#allocation115_spill] sm:$0xff] %v12059_v21  ;;  %v699_v39 = vand.u32 4294901760, %v698_v1  ;;  %v14972_v28 = vand.u32 4294901760, %v11997_v18 }
  0x70   : > { %14964 = vst [vmem:[#allocation109_spill] sm:$0xff] %v12040_v24  ;;  %14969 = vst [vmem:[#allocation113_spill] sm:$0xff] %v12053_v32  ;;  %v709_v43 = vand.u32 4294901760, %v708_v30  ;;  %v12080_v1 = vpack.c.bf16 %v11650_v34, %v11645_v62  ;;  %v12086_v19 = vand.u32 4294901760, %v219_v2  ;;  %v221_v30 = vld [vmem:[%s11377_s11 + $0x178] sm:$0xff]  ;;  %v222_v62 = vld [vmem:[%s11377_s11 + $0x180] sm:$0xff] }
  0x71   : > { %14967 = vst [vmem:[#allocation111_spill] sm:$0xff] %v12048_v26  ;;  %14970 = vst [vmem:[#allocation114_spill] sm:$0xff] %v12055_v17  ;;  %v718_v49 = vsub.f32 %v11997_v18, %v14972_v28  ;;  %9970 = vmatprep.subr.bf16.mxu0 %v12055_v17  ;;  %v12072_v35 = vsub.f32 %v217_v14, %v12048_v26  ;;  %v12091_v14 = vpack.c.bf16 %v11759_v61, %v11751_v4 }
  0x72   : > { %8454 = vmatmul.mubr.f32.gmra.mrb[32].mxu0 %v669_v54  ;;  %v12066_v54 = vsub.f32 %v216_v31, %v12042_v0  ;;  %14976 = vst [vmem:[#allocation119_spill] sm:$0xff] %v12080_v1  ;;  %v14977_v31 = vand.u32 4294901760, %v12024_v60  ;;  %14978 = vst [vmem:[#allocation120_spill] sm:$0xff] %v12086_v19  ;;  %v12109_v34 = vand.u32 4294901760, %v221_v30 }
  0x73   : > { %8456 = vmatprep.mubr.f32.mxu0 %v679_v42  ;;  %14974 = vst [vmem:[#allocation117_spill] sm:$0xff] %v12072_v35  ;;  %v12075_v42 = vsub.f32 %v218_v20, %v12050_v29  ;;  %9972 = vmatpush3.bf16.msra.mxu0 %v12055_v17  ;;  %14979 = vst [vmem:[#allocation121_spill] sm:$0xff] %v12091_v14  ;;  %v719_v20 = vand.u32 4294901760, %v718_v49  ;;  %v14980_v17 = vand.u32 4294901760, %v12040_v24 }
  0x74   : > { %14973 = vst [vmem:[#allocation116_spill] sm:$0xff] %v12066_v54  ;;  %v728_v28 = vsub.f32 %v12024_v60, %v14977_v31  ;;  %9974 = vmatprep.subr.bf16.mxu0 %v12059_v21  ;;  %v12097_v31 = vand.u32 4294901760, %v220_v48  ;;  %14984 = vst [vmem:[#allocation124_spill] sm:$0xff] %v12109_v34 }
  0x75   : > { %14975 = vst [vmem:[#allocation118_spill] sm:$0xff] %v12075_v42  ;;  %v14989_v37 = vand.u32 4294901760, %v12075_v42 }
  0x76   : > { %8457 = vmatmul.mubr.f32.gmra.mrb[34].mxu0 %v689_v12  ;;  %v738_v12 = vsub.f32 %v12040_v24, %v14980_v17  ;;  %14981 = vst [vmem:[#allocation122_spill] sm:$0xff] %v12097_v31  ;;  %v729_v61 = vand.u32 4294901760, %v728_v28  ;;  %v12107_v17 = vsub.f32 %v219_v2, %v12086_v19  ;;  %v14985_v24 = vand.u32 4294901760, %v12066_v54  ;;  %v223_v28 = vld [vmem:[%s11377_s11 + $0x188] sm:$0xff] }
  0x77   : > { %8459 = vmatprep.mubr.f32.mxu0 %v699_v39  ;;  %v14982_v39 = vand.u32 4294901760, %v12053_v32  ;;  %v12115_v18 = vsub.f32 %v220_v48, %v12097_v31  ;;  %v14988_v2 = vand.u32 4294901760, %v12072_v35  ;;  %v12129_v48 = vsub.f32 %v221_v30, %v12109_v34 }
  0x78   : > { %14983 = vst [vmem:[#allocation123_spill] sm:$0xff] %v12107_v17  ;;  %v739_v4 = vand.u32 4294901760, %v738_v12  ;;  %v758_v60 = vsub.f32 %v12066_v54, %v14985_v24  ;;  %v12131_v54 = vand.u32 4294901760, %v223_v28  ;;  %v12141_v24 = vand.u32 4294901760, %v225_v33 }
  0x79   : > { %v748_v49 = vsub.f32 %v12053_v32, %v14982_v39  ;;  %14986 = vst [vmem:[#allocation125_spill] sm:$0xff] %v12115_v18  ;;  %v224_v39 = vld [vmem:[%s11377_s11 + $0x190] sm:$0xff]  ;;  %v768_v32 = vsub.f32 %v12072_v35, %v14988_v2  ;;  %14990 = vst [vmem:[#allocation127_spill] sm:$0xff] %v12129_v48  ;;  %v14995_v30 = vand.u32 4294901760, %v12107_v17  ;;  %v12153_v19 = vpack.c.bf16 %v11850_v36, %v11836_v16 }
  0x7a   : > { %8460 = vmatmul.mubr.f32.gmra.mrb[36].mxu0 %v709_v43  ;;  %v12117_v43 = vand.u32 4294901760, %v222_v62  ;;  %14991 = vst [vmem:[#allocation128_spill] sm:$0xff] %v12131_v54  ;;  %v759_v31 = vand.u32 4294901760, %v758_v60  ;;  %v12138_v35 = vand.u32 4294901760, %v224_v39  ;;  %14994 = vst [vmem:[#allocation131_spill] sm:$0xff] %v12141_v24  ;;  %v12148_v60 = vsub.f32 %v223_v28, %v12131_v54  ;;  %v228_v28 = vld [vmem:[%s11377_s11 + $0x1b0] sm:$0xff] }
  0x7b   : > { %8462 = vmatprep.mubr.f32.mxu0 %v719_v20  ;;  %v778_v20 = vsub.f32 %v12075_v42, %v14989_v37  ;;  %v749_v12 = vand.u32 4294901760, %v748_v49  ;;  %v226_v37 = vld [vmem:[%s11377_s11 + $0x1a0] sm:$0xff]  ;;  %v788_v42 = vsub.f32 %v12107_v17, %v14995_v30  ;;  %14997 = vst [vmem:[#allocation133_spill] sm:$0xff] %v12153_v19  ;;  %v12166_v17 = vsub.f32 %v225_v33, %v12141_v24 }
  0x7c   : > { %14987 = vst [vmem:[#allocation126_spill] sm:$0xff] %v12117_v43  ;;  %v12136_v2 = vsub.f32 %v222_v62, %v12117_v43  ;;  %14993 = vst [vmem:[#allocation130_spill] sm:$0xff] %v12138_v35  ;;  %v227_v62 = vld [vmem:[%s11377_s11 + $0x1a8] sm:$0xff]  ;;  %v12160_v30 = vsub.f32 %v224_v39, %v12138_v35  ;;  %v15003_v36 = vand.u32 4294901760, %v12129_v48  ;;  %v12174_v16 = vand.u32 4294901760, %v228_v28  ;;  %v229_v39 = vld [vmem:[%s11377_s11 + $0x1b8] sm:$0xff] }
  0x7d   : > { %v779_v49 = vand.u32 4294901760, %v778_v20  ;;  %14996 = vst [vmem:[#allocation132_spill] sm:$0xff] %v12148_v60  ;;  %15001 = vst [vmem:[#allocation136_spill] sm:$0xff] %v12166_v17  ;;  %v12168_v54 = vand.u32 4294901760, %v227_v62 }
  0x7e   : > { %8463 = vmatmul.mubr.f32.gmra.mrb[38].mxu0 %v729_v61  ;;  %14992 = vst [vmem:[#allocation129_spill] sm:$0xff] %v12136_v2  ;;  %v769_v61 = vand.u32 4294901760, %v768_v32  ;;  %v14998_v32 = vand.u32 4294901760, %v12115_v18  ;;  %14999 = vst [vmem:[#allocation134_spill] sm:$0xff] %v12160_v30  ;;  %v15005_v35 = vand.u32 4294901760, %v12136_v2  ;;  %v12195_v24 = vsub.f32 %v228_v28, %v12174_v16 }
  0x7f   : > { %8465 = vmatprep.mubr.f32.mxu0 %v739_v4  ;;  %v12162_v4 = vand.u32 4294901760, %v226_v37  ;;  %15002 = vst [vmem:[#allocation137_spill] sm:$0xff] %v12168_v54  ;;  %15004 = vst [vmem:[#allocation138_spill] sm:$0xff] %v12174_v16 }
  0x80   : > { %v798_v20 = vsub.f32 %v12115_v18, %v14998_v32  ;;  %v808_v32 = vsub.f32 %v12129_v48, %v15003_v36  ;;  %v818_v33 = vsub.f32 %v12136_v2, %v15005_v35  ;;  %v12189_v48 = vand.u32 4294901760, %v229_v39  ;;  %15010 = vst [vmem:[#allocation142_spill] sm:$0xff] %v12195_v24 }
  0x81   : > { %15000 = vst [vmem:[#allocation135_spill] sm:$0xff] %v12162_v4  ;;  %v15011_v2 = vand.u32 4294901760, %v12160_v30 }
  0x82   : > { %8466 = vmatmul.mubr.f32.gmra.mrb[40].mxu0 %v749_v12  ;;  %v799_v18 = vand.u32 4294901760, %v798_v20  ;;  %v12187_v12 = vsub.f32 %v227_v62, %v12168_v54  ;;  %15008 = vst [vmem:[#allocation141_spill] sm:$0xff] %v12189_v48  ;;  %v15009_v20 = vand.u32 4294901760, %v12148_v60 }
  0x83   : > { %8468 = vmatprep.mubr.f32.mxu0 %v759_v31  ;;  %v789_v31 = vand.u32 4294901760, %v788_v42  ;;  %v12182_v42 = vsub.f32 %v226_v37, %v12162_v4  ;;  %v819_v37 = vand.u32 4294901760, %v818_v33  ;;  %v838_v36 = vsub.f32 %v12160_v30, %v15011_v2 }
  0x84   : > { %15007 = vst [vmem:[#allocation140_spill] sm:$0xff] %v12187_v12  ;;  %v828_v35 = vsub.f32 %v12148_v60, %v15009_v20  ;;  %v15013_v4 = vand.u32 4294901760, %v12166_v17  ;;  %v14357_v28 = vand.u32 4294901760, %v12187_v12 }
  0x85   : > { %15006 = vst [vmem:[#allocation139_spill] sm:$0xff] %v12182_v42  ;;  %v839_v30 = vand.u32 4294901760, %v838_v36  ;;  %v15016_v60 = vand.u32 4294901760, %v12182_v42 }
  0x86   : > { %8469 = vmatmul.mubr.f32.gmra.mrb[42].mxu0 %v769_v61  ;;  %v230_v61 = vld [vmem:[%s11377_s11 + $0x1c0] sm:$0xff]  ;;  %v848_v20 = vsub.f32 %v12166_v17, %v15013_v4  ;;  %v829_v33 = vand.u32 4294901760, %v828_v35  ;;  %v868_v2 = vsub.f32 %v12187_v12, %v14357_v28  ;;  %v12239_v17 = vpack.c.bf16 %v11926_v44, %v11917_v22 }
  0x87   : > { %8471 = vmatprep.mubr.f32.mxu0 %v779_v49  ;;  %v809_v49 = vand.u32 4294901760, %v808_v32  ;;  %v12201_v54 = vand.u32 4294901760, %v230_v61  ;;  %v232_v32 = vld [vmem:[%s11377_s11 + $0x1d0] sm:$0xff]  ;;  %v858_v16 = vsub.f32 %v12182_v42, %v15016_v60 }
  0x88   : > { %v12221_v4 = vand.u32 4294901760, %v232_v32  ;;  %v849_v35 = vand.u32 4294901760, %v848_v20  ;;  %15022 = vst [vmem:[#allocation150_spill] sm:$0xff] %v12239_v17 }
  0x89   : > { %15012 = vst [vmem:[#allocation143_spill] sm:$0xff] %v12201_v54  ;;  %v12219_v43 = vsub.f32 %v230_v61, %v12201_v54  ;;  %v859_v20 = vand.u32 4294901760, %v858_v16 }
  0x8a   : > { %8472 = vmatmul.mubr.f32.gmra.mrb[44].mxu0 %v789_v31  ;;  %v231_v31 = vld [vmem:[%s11377_s11 + $0x1c8] sm:$0xff]  ;;  %15018 = vst [vmem:[#allocation147_spill] sm:$0xff] %v12221_v4  ;;  %v12243_v36 = vsub.f32 %v232_v32, %v12221_v4 }
  0x8b   : > { %8474 = vmatprep.mubr.f32.mxu0 %v799_v18  ;;  %v12210_v18 = vsub.f32 %v229_v39, %v12189_v48  ;;  %v12213_v62 = vand.u32 4294901760, %v231_v31  ;;  %15017 = vst [vmem:[#allocation146_spill] sm:$0xff] %v12219_v43  ;;  %v233_v39 = vld [vmem:[%s11377_s11 + $0x1d8] sm:$0xff]  ;;  %v15027_v32 = vand.u32 4294901760, %v12219_v43 }
  0x8c   : > { %v12235_v42 = vand.u32 4294901760, %v233_v39  ;;  %15023 = vst [vmem:[#allocation151_spill] sm:$0xff] %v12243_v36 }
  0x8d   : > { %15014 = vst [vmem:[#allocation144_spill] sm:$0xff] %v12210_v18  ;;  %15015 = vst [vmem:[#allocation145_spill] sm:$0xff] %v12213_v62  ;;  %v12233_v61 = vsub.f32 %v231_v31, %v12213_v62  ;;  %v869_v31 = vand.u32 4294901760, %v868_v2  ;;  %v15025_v12 = vand.u32 4294901760, %v12210_v18  ;;  %v898_v22 = vsub.f32 %v12219_v43, %v15027_v32 }
  0x8e   : > { %8475 = vmatmul.mubr.f32.gmra.mrb[46].mxu0 %v809_v49  ;;  %v234_v49 = vld [vmem:[%s11377_s11 + $0x1e0] sm:$0xff]  ;;  %15021 = vst [vmem:[#allocation149_spill] sm:$0xff] %v12235_v42  ;;  %v12254_v16 = vsub.f32 %v233_v39, %v12235_v42 }
  0x8f   : > { %8477 = vmatprep.mubr.f32.mxu0 %v819_v37  ;;  %v15019_v37 = vand.u32 4294901760, %v12195_v24  ;;  %15020 = vst [vmem:[#allocation148_spill] sm:$0xff] %v12233_v61  ;;  %v888_v62 = vsub.f32 %v12210_v18, %v15025_v12  ;;  %v899_v2 = vand.u32 4294901760, %v898_v22 }
  0x91   : > { %v878_v60 = vsub.f32 %v12195_v24, %v15019_v37  ;;  %v235_v37 = vld [vmem:[%s11377_s11 + $0x1e8] sm:$0xff]  ;;  %v236_v24 = vld [vmem:[%s11377_s11 + $0x1f0] sm:$0xff] }
  0x92   : > { %8478 = vmatmul.mubr.f32.gmra.mrb[48].mxu0 %v829_v33  ;;  %v12245_v33 = vand.u32 4294901760, %v234_v49  ;;  %v12256_v28 = vand.u32 4294901760, %v235_v37  ;;  %v12265_v12 = vand.u32 4294901760, %v236_v24 }
  0x93   : > { %8480 = vmatprep.mubr.f32.mxu0 %v839_v30  ;;  %v879_v44 = vand.u32 4294901760, %v878_v60  ;;  %v14372_v30 = vand.u32 4294901760, %v12233_v61  ;;  %v889_v60 = vand.u32 4294901760, %v888_v62 }
  0x94   : > { %15024 = vst [vmem:[#allocation152_spill] sm:$0xff] %v12245_v33  ;;  %15026 = vst [vmem:[#allocation153_spill] sm:$0xff] %v12256_v28  ;;  %v12263_v4 = vsub.f32 %v234_v49, %v12245_v33  ;;  %v12273_v18 = vsub.f32 %v235_v37, %v12256_v28  ;;  %v15031_v49 = vand.u32 4294901760, %v12243_v36 }
  0x95   : > { %15028 = vst [vmem:[#allocation154_spill] sm:$0xff] %v12265_v12  ;;  %v908_v39 = vsub.f32 %v12233_v61, %v14372_v30 }
  0x96   : > { %8481 = vmatmul.mubr.f32.gmra.mrb[50].mxu0 %v849_v35  ;;  %v237_v35 = vld [vmem:[%s11377_s11 + $0x1f8] sm:$0xff]  ;;  %15029 = vst [vmem:[#allocation155_spill] sm:$0xff] %v12273_v18  ;;  %v918_v43 = vsub.f32 %v12243_v36, %v15031_v49  ;;  %v14376_v62 = vand.u32 4294901760, %v12263_v4  ;;  %v14377_v61 = vand.u32 4294901760, %v12273_v18 }
  0x97   : > { %8483 = vmatprep.mubr.f32.mxu0 %v859_v20  ;;  %v14375_v20 = vand.u32 4294901760, %v12254_v16  ;;  %v12275_v32 = vand.u32 4294901760, %v237_v35  ;;  %v909_v30 = vand.u32 4294901760, %v908_v39 }
  0x98   : > { %v919_v22 = vand.u32 4294901760, %v918_v43  ;;  %v938_v49 = vsub.f32 %v12263_v4, %v14376_v62  ;;  %v948_v39 = vsub.f32 %v12273_v18, %v14377_v61 }
  0x99   : > { %15030 = vst [vmem:[#allocation156_spill] sm:$0xff] %v12275_v32  ;;  %v928_v37 = vsub.f32 %v12254_v16, %v14375_v20 }
  0x9a   : > { %8484 = vmatmul.mubr.f32.gmra.mrb[52].mxu0 %v869_v31  ;;  %v12282_v31 = vsub.f32 %v236_v24, %v12265_v12  ;;  %v939_v43 = vand.u32 4294901760, %v938_v49  ;;  %v949_v62 = vand.u32 4294901760, %v948_v39  ;;  %v15037_v49 = vld [vmem:[#allocation57_spill] sm:$0xff]  ;;  %v15039_v39 = vld [vmem:[#allocation59_spill] sm:$0xff] }
  0x9b   : > { %8486 = vmatprep.mubr.f32.mxu0 %v879_v44  ;;  %v12289_v44 = vsub.f32 %v237_v35, %v12275_v32  ;;  %v12301_v35 = vpack.c.bf16 %v12007_v9, %v11988_v15 }
  0x9c   : > { %v14379_v24 = vand.u32 4294901760, %v12282_v31 }
  0x9d   : > { %15032 = vst [vmem:[#allocation157_spill] sm:$0xff] %v12289_v44  ;;  %v14378_v20 = vand.u32 4294901760, %v12289_v44  ;;  %15033 = vst [vmem:[#allocation158_spill] sm:$0xff] %v12301_v35 }
  0x9e   : > { %8487 = vmatmul.mubr.f32.gmra.mrb[54].mxu0 %v889_v60  ;;  %v929_v60 = vand.u32 4294901760, %v928_v37 }
  0x9f   : > { %8489 = vmatprep.mubr.f32.mxu0 %v899_v2  ;;  %v958_v2 = vsub.f32 %v12282_v31, %v14379_v24  ;;  %v15045_v24 = vld [vmem:[#allocation76_spill] sm:$0xff] }
  0xa1   : > { %v959_v37 = vand.u32 4294901760, %v958_v2  ;;  %v15041_v2 = vld [vmem:[#allocation67_spill] sm:$0xff] }
  0xa2   : > { %8490 = vmatmul.mubr.f32.gmra.mrb[56].mxu0 %v909_v30  ;;  %v968_v30 = vsub.f32 %v12289_v44, %v14378_v20  ;;  %v15044_v20 = vld [vmem:[#allocation73_spill] sm:$0xff] }
  0xa3   : > { %8492 = vmatprep.mubr.f32.mxu0 %v919_v22  ;;  %v12312_v22 = vpack.c.bf16 %v11476_v53, %v11471_v52 }
  0xa4   : > { %v969_v61 = vand.u32 4294901760, %v968_v30  ;;  %v15042_v30 = vld [vmem:[#allocation68_spill] sm:$0xff] }
  0xa5   : > { %15034 = vst [vmem:[#allocation159_spill] sm:$0xff] %v12312_v22 }
  0xa6   : > { %8493 = vmatmul.mubr.f32.gmra.mrb[58].mxu0 %v929_v60  ;;  %v15038_v60 = vld [vmem:[#allocation58_spill] sm:$0xff] }
  0xa7   : > { %8495 = vmatprep.mubr.f32.mxu0 %v939_v43  ;;  %v15040_v43 = vld [vmem:[#allocation66_spill] sm:$0xff] }
  0xaa   : > { %8496 = vmatmul.mubr.f32.gmra.mrb[60].mxu0 %v949_v62  ;;  %v12320_v62 = vpack.c.bf16 %v11555_v63, %v11517_v5 }
  0xab   : > { %8498 = vmatprep.mubr.f32.mxu0 %v959_v37  ;;  %v15043_v37 = vld [vmem:[#allocation72_spill] sm:$0xff] }
  0xac   : > { %15035 = vst [vmem:[#allocation160_spill] sm:$0xff] %v12320_v62 }
  0xae   : > { %8499 = vmatmul.mubr.f32.gmra.mrb[62].mxu0 %v969_v61  ;;  %v15036_v61 = vld [vmem:[#allocation55_spill] sm:$0xff] }
  0xaf   : > { %8533 = vmatprep.mubr.f32.mxu0 %v11401_v27  ;;  %v15128_v27 = vld [vmem:[#allocation132_spill] sm:$0xff] }
  0xb2   : > { %8534 = vmatmul.mubr.f32.vlgmr.msra.gmra.mrb[0].mxu0 %v11440_v41  ;;  %v15127_v41 = vld [vmem:[#allocation129_spill] sm:$0xff] }
  0xb3   : > { %9976 = vmatpush3.bf16.msra.mxu0 %v12059_v21  ;;  %8536 = vmatprep.mubr.f32.mxu0 %v11451_v45  ;;  %v15053_v21 = vld [vmem:[#allocation99_spill] sm:$0xff] }
  0xb4   : > { %9978 = vmatprep.subr.bf16.mxu0 %v12312_v22  ;;  %v15126_v45 = vld [vmem:[#allocation127_spill] sm:$0xff] }
  0xb6   : > { %8537 = vmatmul.mubr.f32.gmra.mrb[2].mxu0 %v11482_v55  ;;  %v15124_v55 = vld [vmem:[#allocation123_spill] sm:$0xff] }
  0xb7   : > { %8539 = vmatprep.mubr.f32.mxu0 %v11484_v56  ;;  %9980 = vmatpush3.bf16.msra.mxu0 %v12312_v22  ;;  %v15052_v22 = vld [vmem:[#allocation98_spill] sm:$0xff] }
  0xb8   : > { %9982 = vmatprep.subr.bf16.mxu0 %v12320_v62  ;;  %v15123_v56 = vld [vmem:[#allocation118_spill] sm:$0xff] }
  0xba   : > { %8540 = vmatmul.mubr.f32.gmra.mrb[4].mxu0 %v11511_v3  ;;  %v15121_v3 = vld [vmem:[#allocation116_spill] sm:$0xff] }
  0xbb   : > { %8542 = vmatprep.mubr.f32.mxu0 %v11534_v11  ;;  %9984 = vmatpush3.bf16.msra.mxu0 %v12320_v62  ;;  %v15051_v62 = vld [vmem:[#allocation93_spill] sm:$0xff] }
  0xbc   : > { %9986 = vmatprep.subr.bf16.mxu0 %v12080_v1  ;;  %v15120_v11 = vld [vmem:[#allocation113_spill] sm:$0xff] }
  0xbe   : > { %8543 = vmatmul.mubr.f32.gmra.mrb[6].mxu0 %v11538_v46  ;;  %v15118_v46 = vld [vmem:[#allocation107_spill] sm:$0xff] }
  0xbf   : > { %8545 = vmatprep.mubr.f32.mxu0 %v11570_v8  ;;  %9988 = vmatpush3.bf16.msra.mxu0 %v12080_v1  ;;  %v15050_v1 = vld [vmem:[#allocation90_spill] sm:$0xff]  ;;  %v15117_v8 = vld [vmem:[#allocation104_spill] sm:$0xff] }
  0xc0   : > { %9990 = vmatprep.subr.bf16.mxu0 %v12091_v14 }
  0xc2   : > { %8546 = vmatmul.mubr.f32.gmra.mrb[8].mxu0 %v11582_v7  ;;  %v15115_v7 = vld [vmem:[#allocation102_spill] sm:$0xff] }
  0xc3   : > { %8548 = vmatprep.mubr.f32.mxu0 %v11594_v50  ;;  %9992 = vmatpush3.bf16.msra.mxu0 %v12091_v14  ;;  %v15049_v14 = vld [vmem:[#allocation84_spill] sm:$0xff] }
  0xc4   : > { %9994 = vmatprep.subr.bf16.mxu0 %v12153_v19  ;;  %v15114_v50 = vld [vmem:[#allocation100_spill] sm:$0xff] }
  0xc6   : > { %8549 = vmatmul.mubr.f32.gmra.mrb[10].mxu0 %v11615_v51  ;;  %v15112_v51 = vld [vmem:[#allocation94_spill] sm:$0xff] }
  0xc7   : > { %8551 = vmatprep.mubr.f32.mxu0 %v11628_v38  ;;  %9996 = vmatpush3.bf16.msra.mxu0 %v12153_v19  ;;  %v15048_v19 = vld [vmem:[#allocation83_spill] sm:$0xff]  ;;  %v15111_v38 = vld [vmem:[#allocation89_spill] sm:$0xff] }
  0xc8   : > { %9998 = vmatprep.subr.bf16.mxu0 %v12239_v17 }
  0xca   : > { %8552 = vmatmul.mubr.f32.gmra.mrb[12].mxu0 %v11653_v57  ;;  %v15109_v57 = vld [vmem:[#allocation86_spill] sm:$0xff] }
  0xcb   : > { %8554 = vmatprep.mubr.f32.mxu0 %v11655_v23  ;;  %10000 = vmatpush3.bf16.msra.mxu0 %v12239_v17  ;;  %v15047_v17 = vld [vmem:[#allocation82_spill] sm:$0xff]  ;;  %v15108_v23 = vld [vmem:[#allocation85_spill] sm:$0xff] }
  0xcc   : > { %10002 = vmatprep.subr.bf16.mxu0 %v12301_v35 }
  0xce   : > { %8555 = vmatmul.mubr.f32.gmra.mrb[14].mxu0 %v11671_v59  ;;  %v15106_v59 = vld [vmem:[#allocation79_spill] sm:$0xff] }
  0xcf   : > { %8557 = vmatprep.mubr.f32.mxu0 %v11686_v58  ;;  %10004 = vmatpush3.bf16.msra.mxu0 %v12301_v35  ;;  %v15046_v35 = vld [vmem:[#allocation81_spill] sm:$0xff] }
  0xd0   : > { %10006 = vmatprep.subr.bf16.mxu0 %v11325_v10  ;;  %v15105_v58 = vld [vmem:[#allocation77_spill] sm:$0xff] }
  0xd2   : > { %8558 = vmatmul.mubr.f32.gmra.mrb[16].mxu0 %v11702_v47  ;;  %v15104_v47 = vld [vmem:[#allocation74_spill] sm:$0xff] }
  0xd3   : > { %8560 = vmatprep.mubr.f32.mxu0 %v11712_v40  ;;  %v15099_v40 = vld [vmem:[#allocation63_spill] sm:$0xff] }
  0xd6   : > { %8561 = vmatmul.mubr.f32.gmra.mrb[18].mxu0 %v15036_v61  ;;  %v15098_v61 = vld [vmem:[#allocation61_spill] sm:$0xff] }
  0xd7   : > { %8563 = vmatprep.mubr.f32.mxu0 %v15037_v49  ;;  %v15097_v49 = vld [vmem:[#allocation56_spill] sm:$0xff] }
  0xda   : > { %8564 = vmatmul.mubr.f32.gmra.mrb[20].mxu0 %v15038_v60  ;;  %v15096_v60 = vld [vmem:[#allocation54_spill] sm:$0xff] }
  0xdb   : > { %8566 = vmatprep.mubr.f32.mxu0 %v15039_v39  ;;  %v15095_v39 = vld [vmem:[#allocation51_spill] sm:$0xff] }
  0xde   : > { %8567 = vmatmul.mubr.f32.gmra.mrb[22].mxu0 %v15040_v43  ;;  %v15094_v43 = vld [vmem:[#allocation49_spill] sm:$0xff] }
  0xdf   : > { %8569 = vmatprep.mubr.f32.mxu0 %v15041_v2 }
  0xe2   : > { %8570 = vmatmul.mubr.f32.gmra.mrb[24].mxu0 %v15042_v30 }
  0xe3   : > { %8572 = vmatprep.mubr.f32.mxu0 %v15043_v37  ;;  %v15091_v37 = vld [vmem:[#allocation10_spill] sm:$0xff] }
  0xe4   : > { %v15092_v30 = vand.u32 4294901760, %v15091_v37  ;;  %v15103_v37 = vld [vmem:[#allocation70_spill] sm:$0xff] }
  0xe6   : > { %8573 = vmatmul.mubr.f32.gmra.mrb[26].mxu0 %v15044_v20 }
  0xe7   : > { %8575 = vmatprep.mubr.f32.mxu0 %v15045_v24  ;;  %v15054_v24 = vld [vmem:[#allocation105_spill] sm:$0xff] }
  0xea   : > { %8576 = vmatmul.mubr.f32.gmra.mrb[28].mxu0 %v15046_v35  ;;  %v15055_v35 = vld [vmem:[#allocation106_spill] sm:$0xff] }
  0xeb   : > { %8578 = vmatprep.mubr.f32.mxu0 %v15047_v17  ;;  %v15089_v17 = vld [vmem:[#allocation8_spill] sm:$0xff] }
  0xec   : > { %v15090_v20 = vand.u32 4294901760, %v15089_v17  ;;  %v15100_v17 = vld [vmem:[#allocation64_spill] sm:$0xff] }
  0xee   : > { %8579 = vmatmul.mubr.f32.gmra.mrb[30].mxu0 %v15048_v19  ;;  %v15088_v19 = vld [vmem:[#allocation22_spill] sm:$0xff]  ;;  %v12430_v2 = vpack.c.bf16 %v15092_v30, %v15090_v20  ;;  %v15101_v20 = vld [vmem:[#allocation65_spill] sm:$0xff] }
  0xef   : > { %8581 = vmatprep.mubr.f32.mxu0 %v15049_v14  ;;  %v15087_v14 = vld [vmem:[#allocation47_spill] sm:$0xff]  ;;  %v15102_v30 = vld [vmem:[#allocation69_spill] sm:$0xff] }
  0xf2   : > { %8582 = vmatmul.mubr.f32.gmra.mrb[32].mxu0 %v15050_v1  ;;  %v15086_v1 = vld [vmem:[#allocation46_spill] sm:$0xff] }
  0xf3   : > { %8584 = vmatprep.mubr.f32.mxu0 %v15051_v62  ;;  %v15056_v62 = vld [vmem:[#allocation120_spill] sm:$0xff] }
  0xf6   : > { %8585 = vmatmul.mubr.f32.gmra.mrb[34].mxu0 %v11947_v25  ;;  %v15057_v25 = vld [vmem:[#allocation122_spill] sm:$0xff] }
  0xf7   : > { %8587 = vmatprep.mubr.f32.mxu0 %v11960_v6  ;;  %v15085_v6 = vld [vmem:[#allocation18_spill] sm:$0xff] }
  0xfa   : > { %8588 = vmatmul.mubr.f32.gmra.mrb[36].mxu0 %v15052_v22  ;;  %v15058_v22 = vld [vmem:[#allocation126_spill] sm:$0xff] }
  0xfb   : > { %8590 = vmatprep.mubr.f32.mxu0 %v15053_v21  ;;  %v15059_v21 = vld [vmem:[#allocation128_spill] sm:$0xff] }
  0xfe   : > { %8591 = vmatmul.mubr.f32.gmra.mrb[38].mxu0 %v15054_v24  ;;  %v15060_v24 = vld [vmem:[#allocation130_spill] sm:$0xff] }
  0xff   : > { %8593 = vmatprep.mubr.f32.mxu0 %v15055_v35  ;;  %v15061_v35 = vld [vmem:[#allocation131_spill] sm:$0xff] }
 0x102   : > { %8594 = vmatmul.mubr.f32.gmra.mrb[40].mxu0 %v12029_v13  ;;  %v15062_v13 = vld [vmem:[#allocation135_spill] sm:$0xff] }
 0x103   : > { %8596 = vmatprep.mubr.f32.mxu0 %v12042_v0  ;;  %v15063_v0 = vld [vmem:[#allocation137_spill] sm:$0xff] }
 0x106   : > { %8597 = vmatmul.mubr.f32.gmra.mrb[42].mxu0 %v12048_v26  ;;  %v15064_v26 = vld [vmem:[#allocation138_spill] sm:$0xff] }
 0x107   : > { %8599 = vmatprep.mubr.f32.mxu0 %v12050_v29  ;;  %v15084_v29 = vld [vmem:[#allocation44_spill] sm:$0xff] }
 0x10a   : > { %8600 = vmatmul.mubr.f32.gmra.mrb[44].mxu0 %v15056_v62  ;;  %v15083_v62 = vld [vmem:[#allocation39_spill] sm:$0xff] }
 0x10b   : > { %8602 = vmatprep.mubr.f32.mxu0 %v15057_v25  ;;  %v15065_v25 = vld [vmem:[#allocation145_spill] sm:$0xff] }
 0x10e   : > { %8603 = vmatmul.mubr.f32.gmra.mrb[46].mxu0 %v12109_v34  ;;  %v15066_v34 = vld [vmem:[#allocation147_spill] sm:$0xff] }
 0x10f   : > { %8605 = vmatprep.mubr.f32.mxu0 %v15058_v22  ;;  %v15082_v22 = vld [vmem:[#allocation12_spill] sm:$0xff] }
 0x112   : > { %8606 = vmatmul.mubr.f32.gmra.mrb[48].mxu0 %v15059_v21  ;;  %v15081_v21 = vld [vmem:[#allocation36_spill] sm:$0xff] }
 0x113   : > { %8608 = vmatprep.mubr.f32.mxu0 %v15060_v24  ;;  %v15080_v24 = vld [vmem:[#allocation34_spill] sm:$0xff] }
 0x116   : > { %8609 = vmatmul.mubr.f32.gmra.mrb[50].mxu0 %v15061_v35  ;;  %v15079_v35 = vld [vmem:[#allocation9_spill] sm:$0xff] }
 0x117   : > { %8611 = vmatprep.mubr.f32.mxu0 %v15062_v13  ;;  %v15078_v13 = vld [vmem:[#allocation32_spill] sm:$0xff] }
 0x11a   : > { %8612 = vmatmul.mubr.f32.gmra.mrb[52].mxu0 %v15063_v0  ;;  %v15067_v0 = vld [vmem:[#allocation7_spill] sm:$0xff] }
 0x11b   : > { %8614 = vmatprep.mubr.f32.mxu0 %v15064_v26  ;;  %v15068_v26 = vld [vmem:[#allocation14_spill] sm:$0xff]  ;;  %15093 = vst [vmem:[#allocation7_spill] sm:$0xff] %v12430_v2 }
 0x11e   : > { %8615 = vmatmul.mubr.f32.gmra.mrb[54].mxu0 %v12189_v48  ;;  %v15077_v48 = vld [vmem:[#allocation29_spill] sm:$0xff] }
 0x11f   : > { %8617 = vmatprep.mubr.f32.mxu0 %v12201_v54  ;;  %v15069_v54 = vld [vmem:[#allocation17_spill] sm:$0xff] }
 0x122   : > { %8618 = vmatmul.mubr.f32.gmra.mrb[56].mxu0 %v15065_v25  ;;  %v15070_v25 = vld [vmem:[#allocation3_spill] sm:$0xff] }
 0x123   : > { %8620 = vmatprep.mubr.f32.mxu0 %v15066_v34  ;;  %v15071_v34 = vld [vmem:[#allocation20_spill] sm:$0xff] }
 0x126   : > { %8621 = vmatmul.mubr.f32.gmra.mrb[58].mxu0 %v12235_v42  ;;  %v15072_v42 = vld [vmem:[#allocation21_spill] sm:$0xff] }
 0x127   : > { %8623 = vmatprep.mubr.f32.mxu0 %v12245_v33  ;;  %v15076_v33 = vld [vmem:[#allocation5_spill] sm:$0xff] }
 0x12a   : > { %8624 = vmatmul.mubr.f32.gmra.mrb[60].mxu0 %v12256_v28  ;;  %v15073_v28 = vld [vmem:[#allocation4_spill] sm:$0xff] }
 0x12b   : > { %8626 = vmatprep.mubr.f32.mxu0 %v12265_v12  ;;  %v15074_v12 = vld [vmem:[#allocation25_spill] sm:$0xff] }
 0x12e   : > { %8627 = vmatmul.mubr.f32.gmra.mrb[62].mxu0 %v12275_v32  ;;  %v15075_v32 = vld [vmem:[#allocation26_spill] sm:$0xff] }
 0x12f   : > { %8661 = vmatprep.mubr.f32.mxu0 %v15067_v0 }
 0x132   : > { %8662 = vmatmul.mubr.f32.vlgmr.msra.gmra.mrb[0].mxu0 %v15068_v26 }
 0x133   : > { %10008 = vmatpush3.bf16.msra.mxu0 %v11325_v10  ;;  %8664 = vmatprep.mubr.f32.mxu0 %v15069_v54 }
 0x134   : > { %10010 = vmatprep.subr.bf16.mxu0 %v15070_v25 }
 0x136   : > { %8665 = vmatmul.mubr.f32.gmra.mrb[2].mxu0 %v15071_v34 }
 0x137   : > { %8667 = vmatprep.mubr.f32.mxu0 %v15072_v42  ;;  %10012 = vmatpush3.bf16.msra.mxu0 %v15070_v25  ;;  %v15125_v25 = vld [vmem:[#allocation125_spill] sm:$0xff] }
 0x138   : > { %10014 = vmatprep.subr.bf16.mxu0 %v15073_v28 }
 0x13a   : > { %8668 = vmatmul.mubr.f32.gmra.mrb[4].mxu0 %v15074_v12 }
 0x13b   : > { %8670 = vmatprep.mubr.f32.mxu0 %v15075_v32  ;;  %10016 = vmatpush3.bf16.msra.mxu0 %v15073_v28  ;;  %v15122_v28 = vld [vmem:[#allocation117_spill] sm:$0xff] }
 0x13c   : > { %10018 = vmatprep.subr.bf16.mxu0 %v15076_v33 }
 0x13e   : > { %8671 = vmatmul.mubr.f32.gmra.mrb[6].mxu0 %v15077_v48 }
 0x13f   : > { %8673 = vmatprep.mubr.f32.mxu0 %v15078_v13  ;;  %10020 = vmatpush3.bf16.msra.mxu0 %v15076_v33  ;;  %v15119_v33 = vld [vmem:[#allocation109_spill] sm:$0xff] }
 0x140   : > { %10022 = vmatprep.subr.bf16.mxu0 %v15079_v35 }
 0x142   : > { %8674 = vmatmul.mubr.f32.gmra.mrb[8].mxu0 %v15080_v24 }
 0x143   : > { %8676 = vmatprep.mubr.f32.mxu0 %v15081_v21  ;;  %10024 = vmatpush3.bf16.msra.mxu0 %v15079_v35  ;;  %v15116_v35 = vld [vmem:[#allocation103_spill] sm:$0xff] }
 0x144   : > { %10026 = vmatprep.subr.bf16.mxu0 %v15082_v22 }
 0x146   : > { %8677 = vmatmul.mubr.f32.gmra.mrb[10].mxu0 %v15083_v62 }
 0x147   : > { %8679 = vmatprep.mubr.f32.mxu0 %v15084_v29  ;;  %10028 = vmatpush3.bf16.msra.mxu0 %v15082_v22  ;;  %v15113_v22 = vld [vmem:[#allocation96_spill] sm:$0xff] }
 0x148   : > { %10030 = vmatprep.subr.bf16.mxu0 %v15085_v6 }
 0x14a   : > { %8680 = vmatmul.mubr.f32.gmra.mrb[12].mxu0 %v15086_v1 }
 0x14b   : > { %8682 = vmatprep.mubr.f32.mxu0 %v15087_v14  ;;  %10032 = vmatpush3.bf16.msra.mxu0 %v15085_v6  ;;  %v15110_v6 = vld [vmem:[#allocation88_spill] sm:$0xff] }
 0x14c   : > { %10034 = vmatprep.subr.bf16.mxu0 %v15088_v19 }
 0x14e   : > { %8683 = vmatmul.mubr.f32.gmra.mrb[14].mxu0 %v15094_v43 }
 0x14f   : > { %8685 = vmatprep.mubr.f32.mxu0 %v15095_v39  ;;  %10036 = vmatpush3.bf16.msra.mxu0 %v15088_v19  ;;  %v15107_v19 = vld [vmem:[#allocation80_spill] sm:$0xff] }
 0x150   : > { %10038 = vmatprep.subr.bf16.mxu0 %v12430_v2 }
 0x152   : > { %8686 = vmatmul.mubr.f32.gmra.mrb[16].mxu0 %v15096_v60 }
 0x153   : > { %8688 = vmatprep.mubr.f32.mxu0 %v15097_v49 }
 0x156   : > { %8689 = vmatmul.mubr.f32.gmra.mrb[18].mxu0 %v15098_v61 }
 0x157   : > { %8691 = vmatprep.mubr.f32.mxu0 %v15099_v40 }
 0x15a   : > { %8692 = vmatmul.mubr.f32.gmra.mrb[20].mxu0 %v15100_v17 }
 0x15b   : > { %8694 = vmatprep.mubr.f32.mxu0 %v15101_v20 }
 0x15e   : > { %8695 = vmatmul.mubr.f32.gmra.mrb[22].mxu0 %v15102_v30 }
 0x15f   : > { %8697 = vmatprep.mubr.f32.mxu0 %v15103_v37 }
 0x162   : > { %8698 = vmatmul.mubr.f32.gmra.mrb[24].mxu0 %v15104_v47 }
 0x163   : > { %8700 = vmatprep.mubr.f32.mxu0 %v15105_v58 }
 0x166   : > { %8701 = vmatmul.mubr.f32.gmra.mrb[26].mxu0 %v15106_v59 }
 0x167   : > { %8703 = vmatprep.mubr.f32.mxu0 %v15107_v19 }
 0x16a   : > { %8704 = vmatmul.mubr.f32.gmra.mrb[28].mxu0 %v15108_v23 }
 0x16b   : > { %8706 = vmatprep.mubr.f32.mxu0 %v15109_v57 }
 0x16e   : > { %8707 = vmatmul.mubr.f32.gmra.mrb[30].mxu0 %v15110_v6 }
 0x16f   : > { %8709 = vmatprep.mubr.f32.mxu0 %v15111_v38 }
 0x172   : > { %8710 = vmatmul.mubr.f32.gmra.mrb[32].mxu0 %v15112_v51 }
 0x173   : > { %8712 = vmatprep.mubr.f32.mxu0 %v15113_v22 }
 0x176   : > { %8713 = vmatmul.mubr.f32.gmra.mrb[34].mxu0 %v15114_v50 }
 0x177   : > { %8715 = vmatprep.mubr.f32.mxu0 %v15115_v7 }
 0x17a   : > { %8716 = vmatmul.mubr.f32.gmra.mrb[36].mxu0 %v15116_v35 }
 0x17b   : > { %8718 = vmatprep.mubr.f32.mxu0 %v15117_v8 }
 0x17e   : > { %8719 = vmatmul.mubr.f32.gmra.mrb[38].mxu0 %v15118_v46  ;;  %v15129_v46 = vld [vmem:[#allocation134_spill] sm:$0xff] }
 0x17f   : > { %8721 = vmatprep.mubr.f32.mxu0 %v15119_v33  ;;  %v15130_v33 = vld [vmem:[#allocation136_spill] sm:$0xff] }
 0x182   : > { %8722 = vmatmul.mubr.f32.gmra.mrb[40].mxu0 %v15120_v11  ;;  %v15131_v11 = vld [vmem:[#allocation139_spill] sm:$0xff] }
 0x183   : > { %8724 = vmatprep.mubr.f32.mxu0 %v15121_v3  ;;  %v15132_v3 = vld [vmem:[#allocation140_spill] sm:$0xff] }
 0x186   : > { %8725 = vmatmul.mubr.f32.gmra.mrb[42].mxu0 %v15122_v28  ;;  %v15133_v28 = vld [vmem:[#allocation142_spill] sm:$0xff] }
 0x187   : > { %8727 = vmatprep.mubr.f32.mxu0 %v15123_v56  ;;  %v15134_v56 = vld [vmem:[#allocation144_spill] sm:$0xff] }
 0x18a   : > { %8728 = vmatmul.mubr.f32.gmra.mrb[44].mxu0 %v15124_v55  ;;  %v15135_v55 = vld [vmem:[#allocation146_spill] sm:$0xff] }
 0x18b   : > { %8730 = vmatprep.mubr.f32.mxu0 %v15125_v25  ;;  %v15136_v25 = vld [vmem:[#allocation148_spill] sm:$0xff] }
 0x18e   : > { %8731 = vmatmul.mubr.f32.gmra.mrb[46].mxu0 %v15126_v45 }
 0x18f   : > { %8733 = vmatprep.mubr.f32.mxu0 %v15127_v41 }
 0x192   : > { %8734 = vmatmul.mubr.f32.gmra.mrb[48].mxu0 %v15128_v27 }
 0x193   : > { %8736 = vmatprep.mubr.f32.mxu0 %v15129_v46 }
 0x196   : > { %8737 = vmatmul.mubr.f32.gmra.mrb[50].mxu0 %v15130_v33 }
 0x197   : > { %8739 = vmatprep.mubr.f32.mxu0 %v15131_v11 }
 0x19a   : > { %8740 = vmatmul.mubr.f32.gmra.mrb[52].mxu0 %v15132_v3 }
 0x19b   : > { %8742 = vmatprep.mubr.f32.mxu0 %v15133_v28  ;;  %v15137_v28 = vand.u32 4294901760, %v15067_v0  ;;  %v15144_v0 = vand.u32 4294901760, %v11555_v63  ;;  %v15154_v63 = vand.u32 4294901760, %v15075_v32 }
 0x19e   : > { %8743 = vmatmul.mubr.f32.gmra.mrb[54].mxu0 %v15134_v56  ;;  %v15138_v56 = vand.u32 4294901760, %v11471_v52  ;;  %v15146_v52 = vand.u32 4294901760, %v15071_v34  ;;  %v15155_v34 = vld [vmem:[#allocation60_spill] sm:$0xff] }
 0x19f   : > { %8745 = vmatprep.mubr.f32.mxu0 %v15135_v55  ;;  %v15139_v55 = vand.u32 4294901760, %v11476_v53  ;;  %v15147_v53 = vand.u32 4294901760, %v15072_v42  ;;  %v15156_v42 = vand.u32 4294901760, %v15155_v34 }
 0x1a2   : > { %8746 = vmatmul.mubr.f32.gmra.mrb[56].mxu0 %v15136_v25  ;;  %v12489_v25 = vpack.c.bf16 %v15139_v55, %v15138_v56  ;;  %v15148_v55 = vld [vmem:[#allocation40_spill] sm:$0xff] }
 0x1a3   : > { %8748 = vmatprep.mubr.f32.mxu0 %v12243_v36  ;;  %v15141_v36 = vand.u32 4294901760, %v15068_v26  ;;  %v15149_v56 = vand.u32 4294901760, %v15148_v55  ;;  %v15150_v26 = vld [vmem:[#allocation41_spill] sm:$0xff]  ;;  %v15164_v55 = vld [vmem:[#allocation78_spill] sm:$0xff] }
 0x1a4   : > { %15140 = vst [vmem:[#allocation14_spill] sm:$0xff] %v12489_v25 }
 0x1a6   : > { %8749 = vmatmul.mubr.f32.gmra.mrb[58].mxu0 %v12254_v16 }
 0x1a7   : > { %8751 = vmatprep.mubr.f32.mxu0 %v12263_v4 }
 0x1aa   : > { %8752 = vmatmul.mubr.f32.gmra.mrb[60].mxu0 %v12273_v18  ;;  %v15142_v18 = vand.u32 4294901760, %v15069_v54  ;;  %v15151_v54 = vand.u32 4294901760, %v15150_v26 }
 0x1ab   : > { %8754 = vmatprep.mubr.f32.mxu0 %v12282_v31 }
 0x1ae   : > { %8755 = vmatmul.mubr.f32.gmra.mrb[62].mxu0 %v12289_v44  ;;  %v15143_v44 = vand.u32 4294901760, %v11517_v5  ;;  %v15153_v5 = vand.u32 4294901760, %v15074_v12  ;;  %v15162_v12 = vld [vmem:[#allocation75_spill] sm:$0xff] }
 0x1af   : > { %8789 = vmatprep.mubr.f32.mxu0 %v15137_v28  ;;  %v15163_v32 = vand.u32 4294901760, %v15162_v12  ;;  %v15180_v12 = vand.u32 4294901760, %v15087_v14  ;;  %v15186_v14 = vand.u32 4294901760, %v15099_v40  ;;  %v15193_v40 = vand.u32 4294901760, %v15106_v59 }
 0x1b0   : > { %v12501_v28 = vpack.c.bf16 %v15144_v0, %v15143_v44  ;;  %v15200_v59 = vand.u32 4294901760, %v15113_v22  ;;  %v15209_v22 = vld [vmem:[#allocation113_spill] sm:$0xff] }
 0x1b2   : > { %8790 = vmatmul.mubr.f32.vlgmr.msra.gmra.mrb[0].mxu0 %v15141_v36  ;;  %15145 = vst [vmem:[#allocation17_spill] sm:$0xff] %v12501_v28  ;;  %v15157_v36 = vld [vmem:[#allocation62_spill] sm:$0xff] }
 0x1b3   : > { %10040 = vmatpush3.bf16.msra.mxu0 %v12430_v2  ;;  %8792 = vmatprep.mubr.f32.mxu0 %v15142_v18  ;;  %v12513_v18 = vpack.c.bf16 %v15151_v54, %v15149_v56  ;;  %v15158_v44 = vand.u32 4294901760, %v15157_v36  ;;  %v15165_v56 = vand.u32 4294901760, %v15164_v55  ;;  %v15167_v54 = vand.u32 4294901760, %v15080_v24  ;;  %v15307_v2 = vld [vmem:[#allocation141_spill] sm:$0xff] }
 0x1b4   : > { %10042 = vmatprep.subr.bf16.mxu0 %v12489_v25  ;;  %v15174_v36 = vand.u32 4294901760, %v15083_v62  ;;  %v15177_v24 = vand.u32 4294901760, %v12007_v9  ;;  %v15182_v62 = vand.u32 4294901760, %v15095_v39  ;;  %v15184_v9 = vand.u32 4294901760, %v15097_v49 }
 0x1b5   : > { %15152 = vst [vmem:[#allocation20_spill] sm:$0xff] %v12513_v18  ;;  %v12525_v0 = vpack.c.bf16 %v15158_v44, %v15156_v42  ;;  %v12537_v26 = vpack.c.bf16 %v15165_v56, %v15163_v32  ;;  %v15175_v44 = vand.u32 4294901760, %v15084_v29  ;;  %v15181_v29 = vand.u32 4294901760, %v15094_v43 }
 0x1b6   : > { %8793 = vmatmul.mubr.f32.gmra.mrb[2].mxu0 %v15146_v52  ;;  %v15160_v52 = vand.u32 4294901760, %v15077_v48  ;;  %v15187_v43 = vand.u32 4294901760, %v15100_v17  ;;  %v15188_v39 = vand.u32 4294901760, %v15101_v20  ;;  %v15189_v32 = vand.u32 4294901760, %v15102_v30 }
 0x1b7   : > { %8795 = vmatprep.mubr.f32.mxu0 %v15147_v53  ;;  %10044 = vmatpush3.bf16.msra.mxu0 %v12489_v25  ;;  %15159 = vst [vmem:[#allocation21_spill] sm:$0xff] %v12525_v0  ;;  %v15161_v53 = vand.u32 4294901760, %v15078_v13  ;;  %15166 = vst [vmem:[#allocation25_spill] sm:$0xff] %v12537_v26  ;;  %v15169_v13 = vld [vmem:[#allocation91_spill] sm:$0xff]  ;;  %v15191_v49 = vand.u32 4294901760, %v15104_v47  ;;  %v15194_v17 = vand.u32 4294901760, %v15107_v19 }
 0x1b8   : > { %10046 = vmatprep.subr.bf16.mxu0 %v12501_v28  ;;  %v15170_v48 = vand.u32 4294901760, %v15169_v13  ;;  %v15195_v20 = vand.u32 4294901760, %v15108_v23  ;;  %v15196_v30 = vand.u32 4294901760, %v15109_v57  ;;  %v15198_v47 = vand.u32 4294901760, %v15111_v38  ;;  %v15205_v38 = vld [vmem:[#allocation107_spill] sm:$0xff]  ;;  %v15306_v25 = vld [vmem:[#allocation138_spill] sm:$0xff] }
 0x1b9   : > { %v15201_v19 = vand.u32 4294901760, %v15114_v50  ;;  %v15202_v23 = vand.u32 4294901760, %v15115_v7  ;;  %v15203_v57 = vand.u32 4294901760, %v15116_v35  ;;  %v15206_v55 = vand.u32 4294901760, %v15205_v38  ;;  %v15211_v50 = vld [vmem:[#allocation116_spill] sm:$0xff]  ;;  %v15213_v7 = vld [vmem:[#allocation117_spill] sm:$0xff] }
 0x1ba   : > { %8796 = vmatmul.mubr.f32.gmra.mrb[4].mxu0 %v15153_v5  ;;  %v15168_v5 = vand.u32 4294901760, %v15081_v21  ;;  %v15176_v21 = vand.u32 4294901760, %v11988_v15  ;;  %v15183_v15 = vand.u32 4294901760, %v15096_v60  ;;  %v15190_v60 = vand.u32 4294901760, %v15103_v37  ;;  %v15215_v35 = vld [vmem:[#allocation118_spill] sm:$0xff]  ;;  %v15260_v38 = vld [vmem:[#allocation12_spill] sm:$0xff] }
 0x1bb   : > { %8798 = vmatprep.mubr.f32.mxu0 %v15154_v63  ;;  %10048 = vmatpush3.bf16.msra.mxu0 %v12501_v28  ;;  %v15171_v63 = vld [vmem:[#allocation92_spill] sm:$0xff]  ;;  %v15197_v37 = vand.u32 4294901760, %v15110_v6  ;;  %v15204_v6 = vand.u32 4294901760, %v15117_v8  ;;  %v15214_v13 = vand.u32 4294901760, %v15213_v7  ;;  %v15217_v8 = vld [vmem:[#allocation123_spill] sm:$0xff]  ;;  %v15305_v28 = vld [vmem:[#allocation137_spill] sm:$0xff] }
 0x1bc   : > { %10050 = vmatprep.subr.bf16.mxu0 %v12513_v18  ;;  %v15172_v34 = vand.u32 4294901760, %v15171_v63  ;;  %v15218_v63 = vand.u32 4294901760, %v15217_v8  ;;  %v15268_v7 = vld [vmem:[#allocation48_spill] sm:$0xff]  ;;  %v15272_v8 = vld [vmem:[#allocation57_spill] sm:$0xff] }
 0x1be   : > { %8799 = vmatmul.mubr.f32.gmra.mrb[6].mxu0 %v15160_v52  ;;  %v12549_v42 = vpack.c.bf16 %v15172_v34, %v15170_v48  ;;  %v12561_v52 = vpack.c.bf16 %v15177_v24, %v15176_v21  ;;  %v15216_v48 = vand.u32 4294901760, %v15215_v35  ;;  %v15219_v34 = vld [vmem:[#allocation125_spill] sm:$0xff]  ;;  %v15222_v21 = vand.u32 4294901760, %v15127_v41  ;;  %v15230_v41 = vld [vmem:[#allocation144_spill] sm:$0xff] }
 0x1bf   : > { %8801 = vmatprep.mubr.f32.mxu0 %v15161_v53  ;;  %10052 = vmatpush3.bf16.msra.mxu0 %v12513_v18  ;;  %v15179_v53 = vand.u32 4294901760, %v15086_v1  ;;  %v15185_v1 = vand.u32 4294901760, %v15098_v61  ;;  %v15192_v61 = vand.u32 4294901760, %v15105_v58  ;;  %v15199_v58 = vand.u32 4294901760, %v15112_v51  ;;  %v15207_v51 = vld [vmem:[#allocation109_spill] sm:$0xff]  ;;  %v15270_v35 = vld [vmem:[#allocation52_spill] sm:$0xff] }
 0x1c0   : > { %10054 = vmatprep.subr.bf16.mxu0 %v12525_v0  ;;  %15173 = vst [vmem:[#allocation26_spill] sm:$0xff] %v12549_v42  ;;  %15178 = vst [vmem:[#allocation29_spill] sm:$0xff] %v12561_v52  ;;  %v15208_v56 = vand.u32 4294901760, %v15207_v51  ;;  %v15223_v24 = vand.u32 4294901760, %v15128_v27  ;;  %v15232_v27 = vld [vmem:[#allocation146_spill] sm:$0xff]  ;;  %v15262_v51 = vld [vmem:[#allocation37_spill] sm:$0xff] }
 0x1c1   : > { %v15304_v18 = vld [vmem:[#allocation135_spill] sm:$0xff] }
 0x1c2   : > { %8802 = vmatmul.mubr.f32.gmra.mrb[8].mxu0 %v15167_v54  ;;  %v15210_v54 = vand.u32 4294901760, %v15209_v22  ;;  %v15264_v22 = vld [vmem:[#allocation42_spill] sm:$0xff] }
 0x1c3   : > { %8804 = vmatprep.mubr.f32.mxu0 %v15168_v5  ;;  %10056 = vmatpush3.bf16.msra.mxu0 %v12525_v0  ;;  %v15212_v5 = vand.u32 4294901760, %v15211_v50  ;;  %v15266_v50 = vld [vmem:[#allocation22_spill] sm:$0xff]  ;;  %v15303_v0 = vld [vmem:[#allocation131_spill] sm:$0xff] }
 0x1c4   : > { %10058 = vmatprep.subr.bf16.mxu0 %v12537_v26 }
 0x1c6   : > { %8805 = vmatmul.mubr.f32.gmra.mrb[10].mxu0 %v15174_v36  ;;  %v15220_v36 = vand.u32 4294901760, %v15219_v34  ;;  %v15274_v34 = vld [vmem:[#allocation59_spill] sm:$0xff] }
 0x1c7   : > { %8807 = vmatprep.mubr.f32.mxu0 %v15175_v44  ;;  %10060 = vmatpush3.bf16.msra.mxu0 %v12537_v26  ;;  %v15221_v44 = vand.u32 4294901760, %v15126_v45  ;;  %v15228_v45 = vld [vmem:[#allocation142_spill] sm:$0xff] }
 0x1c8   : > { %10062 = vmatprep.subr.bf16.mxu0 %v12549_v42  ;;  %v15302_v26 = vld [vmem:[#allocation130_spill] sm:$0xff] }
 0x1ca   : > { %8808 = vmatmul.mubr.f32.gmra.mrb[12].mxu0 %v15179_v53  ;;  %v15224_v53 = vand.u32 4294901760, %v15129_v46  ;;  %v15234_v46 = vld [vmem:[#allocation148_spill] sm:$0xff] }
 0x1cb   : > { %8810 = vmatprep.mubr.f32.mxu0 %v15180_v12  ;;  %10064 = vmatpush3.bf16.msra.mxu0 %v12549_v42  ;;  %v15225_v12 = vand.u32 4294901760, %v15130_v33  ;;  %v15236_v33 = vld [vmem:[#allocation151_spill] sm:$0xff]  ;;  %v15301_v42 = vld [vmem:[#allocation128_spill] sm:$0xff] }
 0x1cc   : > { %10066 = vmatprep.subr.bf16.mxu0 %v12561_v52 }
 0x1ce   : > { %8811 = vmatmul.mubr.f32.gmra.mrb[14].mxu0 %v15181_v29  ;;  %v15226_v29 = vand.u32 4294901760, %v15131_v11  ;;  %v15238_v11 = vand.u32 4294901760, %v12254_v16  ;;  %v15247_v16 = vld [vmem:[#allocation13_spill] sm:$0xff] }
 0x1cf   : > { %8813 = vmatprep.mubr.f32.mxu0 %v15182_v62  ;;  %10068 = vmatpush3.bf16.msra.mxu0 %v12561_v52  ;;  %v15227_v62 = vand.u32 4294901760, %v15132_v3  ;;  %v15239_v3 = vand.u32 4294901760, %v12263_v4  ;;  %v15249_v4 = vld [vmem:[#allocation15_spill] sm:$0xff]  ;;  %v15300_v52 = vld [vmem:[#allocation126_spill] sm:$0xff] }
 0x1d0   : > { %10070 = vmatprep.subr.bf16.mxu0 %v11325_v10 }
 0x1d2   : > { %8814 = vmatmul.mubr.f32.gmra.mrb[16].mxu0 %v15183_v15  ;;  %v15229_v15 = vand.u32 4294901760, %v15228_v45  ;;  %v15283_v45 = vld [vmem:[#allocation83_spill] sm:$0xff] }
 0x1d3   : > { %8816 = vmatprep.mubr.f32.mxu0 %v15184_v9  ;;  %v15231_v9 = vand.u32 4294901760, %v15230_v41  ;;  %v15285_v41 = vld [vmem:[#allocation90_spill] sm:$0xff] }
 0x1d6   : > { %8817 = vmatmul.mubr.f32.gmra.mrb[18].mxu0 %v15185_v1  ;;  %v15233_v1 = vand.u32 4294901760, %v15232_v27  ;;  %v15287_v27 = vld [vmem:[#allocation95_spill] sm:$0xff] }
 0x1d7   : > { %8819 = vmatprep.mubr.f32.mxu0 %v15186_v14  ;;  %v15235_v14 = vand.u32 4294901760, %v15234_v46  ;;  %v15289_v46 = vld [vmem:[#allocation98_spill] sm:$0xff] }
 0x1da   : > { %8820 = vmatmul.mubr.f32.gmra.mrb[20].mxu0 %v15187_v43  ;;  %v15237_v43 = vand.u32 4294901760, %v15236_v33  ;;  %v15291_v33 = vld [vmem:[#allocation105_spill] sm:$0xff] }
 0x1db   : > { %8822 = vmatprep.mubr.f32.mxu0 %v15188_v39  ;;  %v15240_v39 = vld [vmem:[#allocation155_spill] sm:$0xff] }
 0x1de   : > { %8823 = vmatmul.mubr.f32.gmra.mrb[22].mxu0 %v15189_v32  ;;  %v15241_v32 = vand.u32 4294901760, %v15240_v39  ;;  %v15295_v39 = vld [vmem:[#allocation111_spill] sm:$0xff] }
 0x1df   : > { %8825 = vmatprep.mubr.f32.mxu0 %v15190_v60  ;;  %v15242_v60 = vand.u32 4294901760, %v12282_v31  ;;  %v15251_v31 = vld [vmem:[#allocation4_spill] sm:$0xff] }
 0x1e2   : > { %8826 = vmatmul.mubr.f32.gmra.mrb[24].mxu0 %v15191_v49  ;;  %v15243_v49 = vld [vmem:[#allocation157_spill] sm:$0xff] }
 0x1e3   : > { %8828 = vmatprep.mubr.f32.mxu0 %v15192_v61  ;;  %v15244_v61 = vand.u32 4294901760, %v15243_v49  ;;  %v15298_v49 = vld [vmem:[#allocation122_spill] sm:$0xff] }
 0x1e6   : > { %8829 = vmatmul.mubr.f32.gmra.mrb[26].mxu0 %v15193_v40  ;;  %v15245_v40 = vld [vmem:[#allocation6_spill] sm:$0xff] }
 0x1e7   : > { %8831 = vmatprep.mubr.f32.mxu0 %v15194_v17  ;;  %v15246_v17 = vld [vmem:[#allocation11_spill] sm:$0xff] }
 0x1ea   : > { %8832 = vmatmul.mubr.f32.gmra.mrb[28].mxu0 %v15195_v20  ;;  %v15248_v20 = vld [vmem:[#allocation3_spill] sm:$0xff] }
 0x1eb   : > { %8834 = vmatprep.mubr.f32.mxu0 %v15196_v30  ;;  %v15250_v30 = vld [vmem:[#allocation16_spill] sm:$0xff] }
 0x1ee   : > { %8835 = vmatmul.mubr.f32.gmra.mrb[30].mxu0 %v15197_v37  ;;  %v15252_v37 = vld [vmem:[#allocation19_spill] sm:$0xff] }
 0x1ef   : > { %8837 = vmatprep.mubr.f32.mxu0 %v15198_v47  ;;  %v15253_v47 = vld [vmem:[#allocation23_spill] sm:$0xff] }
 0x1f2   : > { %8838 = vmatmul.mubr.f32.gmra.mrb[32].mxu0 %v15199_v58  ;;  %v15254_v58 = vld [vmem:[#allocation5_spill] sm:$0xff] }
 0x1f3   : > { %8840 = vmatprep.mubr.f32.mxu0 %v15200_v59  ;;  %v15255_v59 = vld [vmem:[#allocation24_spill] sm:$0xff] }
 0x1f6   : > { %8841 = vmatmul.mubr.f32.gmra.mrb[34].mxu0 %v15201_v19  ;;  %v15256_v19 = vld [vmem:[#allocation27_spill] sm:$0xff] }
 0x1f7   : > { %8843 = vmatprep.mubr.f32.mxu0 %v15202_v23  ;;  %v15257_v23 = vld [vmem:[#allocation9_spill] sm:$0xff] }
 0x1fa   : > { %8844 = vmatmul.mubr.f32.gmra.mrb[36].mxu0 %v15203_v57  ;;  %v15258_v57 = vld [vmem:[#allocation30_spill] sm:$0xff] }
 0x1fb   : > { %8846 = vmatprep.mubr.f32.mxu0 %v15204_v6  ;;  %v15259_v6 = vld [vmem:[#allocation31_spill] sm:$0xff] }
 0x1fe   : > { %8847 = vmatmul.mubr.f32.gmra.mrb[38].mxu0 %v15206_v55  ;;  %v15261_v55 = vld [vmem:[#allocation35_spill] sm:$0xff] }
 0x1ff   : > { %8849 = vmatprep.mubr.f32.mxu0 %v15208_v56  ;;  %v15263_v56 = vld [vmem:[#allocation18_spill] sm:$0xff] }
 0x202   : > { %8850 = vmatmul.mubr.f32.gmra.mrb[40].mxu0 %v15210_v54  ;;  %v15265_v54 = vld [vmem:[#allocation43_spill] sm:$0xff] }
 0x203   : > { %8852 = vmatprep.mubr.f32.mxu0 %v15212_v5  ;;  %v15267_v5 = vld [vmem:[#allocation45_spill] sm:$0xff] }
 0x206   : > { %8853 = vmatmul.mubr.f32.gmra.mrb[42].mxu0 %v15214_v13  ;;  %v15269_v13 = vld [vmem:[#allocation50_spill] sm:$0xff] }
 0x207   : > { %8855 = vmatprep.mubr.f32.mxu0 %v15216_v48  ;;  %v15271_v48 = vld [vmem:[#allocation55_spill] sm:$0xff] }
 0x20a   : > { %8856 = vmatmul.mubr.f32.gmra.mrb[44].mxu0 %v15218_v63  ;;  %v15273_v63 = vld [vmem:[#allocation58_spill] sm:$0xff] }
 0x20b   : > { %8858 = vmatprep.mubr.f32.mxu0 %v15220_v36  ;;  %v15275_v36 = vld [vmem:[#allocation66_spill] sm:$0xff] }
 0x20e   : > { %8859 = vmatmul.mubr.f32.gmra.mrb[46].mxu0 %v15221_v44  ;;  %v15276_v44 = vld [vmem:[#allocation67_spill] sm:$0xff] }
 0x20f   : > { %8861 = vmatprep.mubr.f32.mxu0 %v15222_v21  ;;  %v15277_v21 = vld [vmem:[#allocation68_spill] sm:$0xff] }
 0x212   : > { %8862 = vmatmul.mubr.f32.gmra.mrb[48].mxu0 %v15223_v24  ;;  %v15278_v24 = vld [vmem:[#allocation72_spill] sm:$0xff] }
 0x213   : > { %8864 = vmatprep.mubr.f32.mxu0 %v15224_v53  ;;  %v15279_v53 = vld [vmem:[#allocation73_spill] sm:$0xff] }
 0x216   : > { %8865 = vmatmul.mubr.f32.gmra.mrb[50].mxu0 %v15225_v12  ;;  %v15280_v12 = vld [vmem:[#allocation76_spill] sm:$0xff] }
 0x217   : > { %8867 = vmatprep.mubr.f32.mxu0 %v15226_v29  ;;  %v15281_v29 = vld [vmem:[#allocation81_spill] sm:$0xff] }
 0x21a   : > { %8868 = vmatmul.mubr.f32.gmra.mrb[52].mxu0 %v15227_v62  ;;  %v15282_v62 = vld [vmem:[#allocation82_spill] sm:$0xff] }
 0x21b   : > { %8870 = vmatprep.mubr.f32.mxu0 %v15229_v15  ;;  %v15284_v15 = vld [vmem:[#allocation84_spill] sm:$0xff] }
 0x21e   : > { %8871 = vmatmul.mubr.f32.gmra.mrb[54].mxu0 %v15231_v9  ;;  %v15286_v9 = vld [vmem:[#allocation93_spill] sm:$0xff] }
 0x21f   : > { %8873 = vmatprep.mubr.f32.mxu0 %v15233_v1  ;;  %v15288_v1 = vld [vmem:[#allocation97_spill] sm:$0xff] }
 0x222   : > { %8874 = vmatmul.mubr.f32.gmra.mrb[56].mxu0 %v15235_v14  ;;  %v15290_v14 = vld [vmem:[#allocation99_spill] sm:$0xff] }
 0x223   : > { %8876 = vmatprep.mubr.f32.mxu0 %v15237_v43  ;;  %v15292_v43 = vld [vmem:[#allocation106_spill] sm:$0xff] }
 0x226   : > { %8877 = vmatmul.mubr.f32.gmra.mrb[58].mxu0 %v15238_v11  ;;  %v15293_v11 = vld [vmem:[#allocation108_spill] sm:$0xff] }
 0x227   : > { %8879 = vmatprep.mubr.f32.mxu0 %v15239_v3  ;;  %v15294_v3 = vld [vmem:[#allocation110_spill] sm:$0xff] }
 0x22a   : > { %8880 = vmatmul.mubr.f32.gmra.mrb[60].mxu0 %v15241_v32  ;;  %v15296_v32 = vld [vmem:[#allocation112_spill] sm:$0xff] }
 0x22b   : > { %8882 = vmatprep.mubr.f32.mxu0 %v15242_v60  ;;  %v15297_v60 = vld [vmem:[#allocation120_spill] sm:$0xff] }
 0x22e   : > { %8883 = vmatmul.mubr.f32.gmra.mrb[62].mxu0 %v15244_v61  ;;  %v15299_v61 = vld [vmem:[#allocation124_spill] sm:$0xff] }
 0x22f   : > { %8917 = vmatprep.mubr.f32.mxu0 %v15245_v40 }
 0x232   : > { %8918 = vmatmul.mubr.f32.vlgmr.msra.gmra.mrb[0].mxu0 %v15246_v17 }
 0x233   : > { %10072 = vmatpush3.bf16.msra.mxu0 %v11325_v10  ;;  %8920 = vmatprep.mubr.f32.mxu0 %v15247_v16  ;;  %v15315_v10 = vld [vmem:[#allocation156_spill] sm:$0xff] }
 0x234   : > { %10074 = vmatprep.subr.bf16.mxu0 %v15248_v20 }
 0x236   : > { %8921 = vmatmul.mubr.f32.gmra.mrb[2].mxu0 %v15249_v4 }
 0x237   : > { %8923 = vmatprep.mubr.f32.mxu0 %v15250_v30  ;;  %10076 = vmatpush3.bf16.msra.mxu0 %v15248_v20  ;;  %v15314_v20 = vld [vmem:[#allocation154_spill] sm:$0xff] }
 0x238   : > { %10078 = vmatprep.subr.bf16.mxu0 %v15251_v31 }
 0x23a   : > { %8924 = vmatmul.mubr.f32.gmra.mrb[4].mxu0 %v15252_v37 }
 0x23b   : > { %8926 = vmatprep.mubr.f32.mxu0 %v15253_v47  ;;  %10080 = vmatpush3.bf16.msra.mxu0 %v15251_v31  ;;  %v15313_v31 = vld [vmem:[#allocation153_spill] sm:$0xff] }
 0x23c   : > { %10082 = vmatprep.subr.bf16.mxu0 %v15254_v58 }
 0x23e   : > { %8927 = vmatmul.mubr.f32.gmra.mrb[6].mxu0 %v15255_v59 }
 0x23f   : > { %8929 = vmatprep.mubr.f32.mxu0 %v15256_v19  ;;  %10084 = vmatpush3.bf16.msra.mxu0 %v15254_v58  ;;  %v15312_v58 = vld [vmem:[#allocation152_spill] sm:$0xff] }
 0x240   : > { %10086 = vmatprep.subr.bf16.mxu0 %v15257_v23 }
 0x242   : > { %8930 = vmatmul.mubr.f32.gmra.mrb[8].mxu0 %v15258_v57 }
 0x243   : > { %8932 = vmatprep.mubr.f32.mxu0 %v15259_v6  ;;  %10088 = vmatpush3.bf16.msra.mxu0 %v15257_v23  ;;  %v15311_v23 = vld [vmem:[#allocation149_spill] sm:$0xff] }
 0x244   : > { %10090 = vmatprep.subr.bf16.mxu0 %v15260_v38 }
 0x246   : > { %8933 = vmatmul.mubr.f32.gmra.mrb[10].mxu0 %v15261_v55 }
 0x247   : > { %8935 = vmatprep.mubr.f32.mxu0 %v15262_v51  ;;  %10092 = vmatpush3.bf16.msra.mxu0 %v15260_v38  ;;  %v15310_v38 = vld [vmem:[#allocation147_spill] sm:$0xff] }
 0x248   : > { %10094 = vmatprep.subr.bf16.mxu0 %v15263_v56 }
 0x24a   : > { %8936 = vmatmul.mubr.f32.gmra.mrb[12].mxu0 %v15264_v22 }
 0x24b   : > { %8938 = vmatprep.mubr.f32.mxu0 %v15265_v54  ;;  %10096 = vmatpush3.bf16.msra.mxu0 %v15263_v56  ;;  %v15309_v56 = vld [vmem:[#allocation145_spill] sm:$0xff] }
 0x24c   : > { %10098 = vmatprep.subr.bf16.mxu0 %v15266_v50 }
 0x24e   : > { %8939 = vmatmul.mubr.f32.gmra.mrb[14].mxu0 %v15267_v5 }
 0x24f   : > { %8941 = vmatprep.mubr.f32.mxu0 %v15268_v7  ;;  %10100 = vmatpush3.bf16.msra.mxu0 %v15266_v50  ;;  %v15308_v50 = vld [vmem:[#allocation143_spill] sm:$0xff] }
 0x252   : > { %8942 = vmatmul.mubr.f32.gmra.mrb[16].mxu0 %v15269_v13 }
 0x253   : > { %8944 = vmatprep.mubr.f32.mxu0 %v15270_v35 }
 0x256   : > { %8945 = vmatmul.mubr.f32.gmra.mrb[18].mxu0 %v15271_v48 }
 0x257   : > { %8947 = vmatprep.mubr.f32.mxu0 %v15272_v8 }
 0x25a   : > { %8948 = vmatmul.mubr.f32.gmra.mrb[20].mxu0 %v15273_v63 }
 0x25b   : > { %8950 = vmatprep.mubr.f32.mxu0 %v15274_v34 }
 0x25e   : > { %8951 = vmatmul.mubr.f32.gmra.mrb[22].mxu0 %v15275_v36 }
 0x25f   : > { %8953 = vmatprep.mubr.f32.mxu0 %v15276_v44 }
 0x262   : > { %8954 = vmatmul.mubr.f32.gmra.mrb[24].mxu0 %v15277_v21 }
 0x263   : > { %8956 = vmatprep.mubr.f32.mxu0 %v15278_v24 }
 0x266   : > { %8957 = vmatmul.mubr.f32.gmra.mrb[26].mxu0 %v15279_v53 }
 0x267   : > { %8959 = vmatprep.mubr.f32.mxu0 %v15280_v12 }
 0x26a   : > { %8960 = vmatmul.mubr.f32.gmra.mrb[28].mxu0 %v15281_v29 }
 0x26b   : > { %8962 = vmatprep.mubr.f32.mxu0 %v15282_v62 }
 0x26e   : > { %8963 = vmatmul.mubr.f32.gmra.mrb[30].mxu0 %v15283_v45 }
 0x26f   : > { %8965 = vmatprep.mubr.f32.mxu0 %v15284_v15 }
 0x272   : > { %8966 = vmatmul.mubr.f32.gmra.mrb[32].mxu0 %v15285_v41 }
 0x273   : > { %8968 = vmatprep.mubr.f32.mxu0 %v15286_v9 }
 0x276   : > { %8969 = vmatmul.mubr.f32.gmra.mrb[34].mxu0 %v15287_v27 }
 0x277   : > { %8971 = vmatprep.mubr.f32.mxu0 %v15288_v1 }
 0x27a   : > { %8972 = vmatmul.mubr.f32.gmra.mrb[36].mxu0 %v15289_v46 }
 0x27b   : > { %8974 = vmatprep.mubr.f32.mxu0 %v15290_v14 }
 0x27e   : > { %8975 = vmatmul.mubr.f32.gmra.mrb[38].mxu0 %v15291_v33 }
 0x27f   : > { %8977 = vmatprep.mubr.f32.mxu0 %v15292_v43 }
 0x282   : > { %8978 = vmatmul.mubr.f32.gmra.mrb[40].mxu0 %v15293_v11 }
 0x283   : > { %8980 = vmatprep.mubr.f32.mxu0 %v15294_v3 }
 0x286   : > { %8981 = vmatmul.mubr.f32.gmra.mrb[42].mxu0 %v15295_v39 }
 0x287   : > { %8983 = vmatprep.mubr.f32.mxu0 %v15296_v32 }
 0x28a   : > { %8984 = vmatmul.mubr.f32.gmra.mrb[44].mxu0 %v15297_v60 }
 0x28b   : > { %8986 = vmatprep.mubr.f32.mxu0 %v15298_v49 }
 0x28e   : > { %8987 = vmatmul.mubr.f32.gmra.mrb[46].mxu0 %v15299_v61 }
 0x28f   : > { %8989 = vmatprep.mubr.f32.mxu0 %v15300_v52 }
 0x292   : > { %8990 = vmatmul.mubr.f32.gmra.mrb[48].mxu0 %v15301_v42 }
 0x293   : > { %8992 = vmatprep.mubr.f32.mxu0 %v15302_v26 }
 0x296   : > { %8993 = vmatmul.mubr.f32.gmra.mrb[50].mxu0 %v15303_v0 }
 0x297   : > { %8995 = vmatprep.mubr.f32.mxu0 %v15304_v18 }
 0x29a   : > { %8996 = vmatmul.mubr.f32.gmra.mrb[52].mxu0 %v15305_v28 }
 0x29b   : > { %8998 = vmatprep.mubr.f32.mxu0 %v15306_v25 }
 0x29e   : > { %8999 = vmatmul.mubr.f32.gmra.mrb[54].mxu0 %v15307_v2 }
 0x29f   : > { %9001 = vmatprep.mubr.f32.mxu0 %v15308_v50 }
 0x2a2   : > { %9002 = vmatmul.mubr.f32.gmra.mrb[56].mxu0 %v15309_v56 }
 0x2a3   : > { %9004 = vmatprep.mubr.f32.mxu0 %v15310_v38 }
 0x2a6   : > { %9005 = vmatmul.mubr.f32.gmra.mrb[58].mxu0 %v15311_v23 }
 0x2a7   : > { %9007 = vmatprep.mubr.f32.mxu0 %v15312_v58 }
 0x2aa   : > { %9008 = vmatmul.mubr.f32.gmra.mrb[60].mxu0 %v15313_v31 }
 0x2ab   : > { %9010 = vmatprep.mubr.f32.mxu0 %v15314_v20 }
 0x2ae   : > { %9011 = vmatmul.mubr.f32.gmra.mrb[62].mxu0 %v15315_v10 }
 0x2af   : > { %9045 = vmatprep.mubr.f32.mxu0 %v15245_v40 }
 0x2b2   : > { %9046 = vmatmul.mubr.f32.vlgmr.msra.gmra.mrb[0].mxu0 %v15246_v17 }
 0x2b3   : > { %9048 = vmatprep.mubr.f32.mxu0 %v15247_v16  ;;  %v11135_v16 = vld [vmem:[%s11377_s11 + $0x18] sm:$0xff] }
 0x2b6   : > { %9049 = vmatmul.mubr.f32.gmra.mrb[2].mxu0 %v15249_v4 }
 0x2b7   : > { %9051 = vmatprep.mubr.f32.mxu0 %v15250_v30 }
 0x2ba   : > { %9052 = vmatmul.mubr.f32.gmra.mrb[4].mxu0 %v15252_v37 }
 0x2bb   : > { %9054 = vmatprep.mubr.f32.mxu0 %v15253_v47 }
 0x2be   : > { %9055 = vmatmul.mubr.f32.gmra.mrb[6].mxu0 %v15255_v59 }
 0x2bf   : > { %9057 = vmatprep.mubr.f32.mxu0 %v15256_v19 }
 0x2c2   : > { %9058 = vmatmul.mubr.f32.gmra.mrb[8].mxu0 %v15258_v57  ;;  %v11137_v57 = vld [vmem:[%s11377_s11 + $0x28] sm:$0xff] }
 0x2c3   : > { %9060 = vmatprep.mubr.f32.mxu0 %v15259_v6 }
 0x2c6   : > { %9061 = vmatmul.mubr.f32.gmra.mrb[10].mxu0 %v15261_v55 }
 0x2c7   : > { %9063 = vmatprep.mubr.f32.mxu0 %v15262_v51 }
 0x2ca   : > { %9064 = vmatmul.mubr.f32.gmra.mrb[12].mxu0 %v15264_v22 }
 0x2cb   : > { %9066 = vmatprep.mubr.f32.mxu0 %v15265_v54 }
 0x2ce   : > { %9067 = vmatmul.mubr.f32.gmra.mrb[14].mxu0 %v15267_v5 }
 0x2cf   : > { %9069 = vmatprep.mubr.f32.mxu0 %v15268_v7 }
 0x2d2   : > { %9070 = vmatmul.mubr.f32.gmra.mrb[16].mxu0 %v15269_v13 }
 0x2d3   : > { %9072 = vmatprep.mubr.f32.mxu0 %v15270_v35 }
 0x2d6   : > { %9073 = vmatmul.mubr.f32.gmra.mrb[18].mxu0 %v15271_v48 }
 0x2d7   : > { %9075 = vmatprep.mubr.f32.mxu0 %v15272_v8 }
 0x2da   : > { %9076 = vmatmul.mubr.f32.gmra.mrb[20].mxu0 %v15273_v63 }
 0x2db   : > { %9078 = vmatprep.mubr.f32.mxu0 %v15274_v34  ;;  %v11139_v34 = vld [vmem:[%s11377_s11 + $0x38] sm:$0xff] }
 0x2de   : > { %9079 = vmatmul.mubr.f32.gmra.mrb[22].mxu0 %v15275_v36 }
 0x2df   : > { %9081 = vmatprep.mubr.f32.mxu0 %v15276_v44 }
 0x2e2   : > { %9082 = vmatmul.mubr.f32.gmra.mrb[24].mxu0 %v15277_v21 }
 0x2e3   : > { %9084 = vmatprep.mubr.f32.mxu0 %v15278_v24 }
 0x2e6   : > { %9085 = vmatmul.mubr.f32.gmra.mrb[26].mxu0 %v15279_v53  ;;  %v11140_v53 = vld [vmem:[%s11377_s11 + $0x30] sm:$0xff] }
 0x2e7   : > { %9087 = vmatprep.mubr.f32.mxu0 %v15280_v12 }
 0x2ea   : > { %9088 = vmatmul.mubr.f32.gmra.mrb[28].mxu0 %v15281_v29 }
 0x2eb   : > { %9090 = vmatprep.mubr.f32.mxu0 %v15282_v62 }
 0x2ee   : > { %9091 = vmatmul.mubr.f32.gmra.mrb[30].mxu0 %v15283_v45 }
 0x2ef   : > { %9093 = vmatprep.mubr.f32.mxu0 %v15284_v15 }
 0x2f2   : > { %9094 = vmatmul.mubr.f32.gmra.mrb[32].mxu0 %v15285_v41 }
 0x2f3   : > { %9096 = vmatprep.mubr.f32.mxu0 %v15286_v9 }
 0x2f6   : > { %9097 = vmatmul.mubr.f32.gmra.mrb[34].mxu0 %v15287_v27 }
 0x2f7   : > { %9099 = vmatprep.mubr.f32.mxu0 %v15288_v1 }
 0x2fa   : > { %9100 = vmatmul.mubr.f32.gmra.mrb[36].mxu0 %v15289_v46 }
 0x2fb   : > { %9102 = vmatprep.mubr.f32.mxu0 %v15290_v14 }
 0x2fe   : > { %9103 = vmatmul.mubr.f32.gmra.mrb[38].mxu0 %v15291_v33 }
 0x2ff   : > { %9105 = vmatprep.mubr.f32.mxu0 %v15292_v43  ;;  %v11141_v43 = vld [vmem:[%s11377_s11 + $0x48] sm:$0xff] }
 0x302   : > { %9106 = vmatmul.mubr.f32.gmra.mrb[40].mxu0 %v15293_v11 }
 0x303   : > { %9108 = vmatprep.mubr.f32.mxu0 %v15294_v3 }
 0x306   : > { %9109 = vmatmul.mubr.f32.gmra.mrb[42].mxu0 %v15295_v39 }
 0x307   : > { %9111 = vmatprep.mubr.f32.mxu0 %v15296_v32 }
 0x30a   : > { %9112 = vmatmul.mubr.f32.gmra.mrb[44].mxu0 %v15297_v60  ;;  %v11142_v60 = vld [vmem:[%s11377_s11 + $0x40] sm:$0xff] }
 0x30b   : > { %9114 = vmatprep.mubr.f32.mxu0 %v15298_v49 }
 0x30e   : > { %9115 = vmatmul.mubr.f32.gmra.mrb[46].mxu0 %v15299_v61  ;;  %v15330_v61 = vld [vmem:[#allocation28_spill] sm:$0xff] }
 0x30f   : > { %9117 = vmatprep.mubr.f32.mxu0 %v15300_v52 }
 0x312   : > { %9118 = vmatmul.mubr.f32.gmra.mrb[48].mxu0 %v15301_v42 }
 0x313   : > { %9120 = vmatprep.mubr.f32.mxu0 %v15302_v26 }
 0x316   : > { %9121 = vmatmul.mubr.f32.gmra.mrb[50].mxu0 %v15303_v0  ;;  %v11134_v0 = vld [vmem:[%s11377_s11] sm:$0xff] }
 0x317   : > { %9123 = vmatprep.mubr.f32.mxu0 %v15304_v18 }
 0x31a   : > { %9124 = vmatmul.mubr.f32.gmra.mrb[52].mxu0 %v15305_v28 }
 0x31b   : > { %9126 = vmatprep.mubr.f32.mxu0 %v15306_v25 }
 0x31e   : > { %9127 = vmatmul.mubr.f32.gmra.mrb[54].mxu0 %v15307_v2  ;;  %v11133_v2 = vld [vmem:[%s11377_s11 + $0x8] sm:$0xff] }
 0x31f   : > { %9129 = vmatprep.mubr.f32.mxu0 %v15308_v50 }
 0x322   : > { %9130 = vmatmul.mubr.f32.gmra.mrb[56].mxu0 %v15309_v56  ;;  %v11138_v56 = vld [vmem:[%s11377_s11 + $0x20] sm:$0xff] }
 0x323   : > { %9132 = vmatprep.mubr.f32.mxu0 %v15310_v38 }
 0x326   : > { %9133 = vmatmul.mubr.f32.gmra.mrb[58].mxu0 %v15311_v23 }
 0x327   : > { %9135 = vmatprep.mubr.f32.mxu0 %v15312_v58 }
 0x32a   : > { %9136 = vmatmul.mubr.f32.gmra.mrb[60].mxu0 %v15313_v31  ;;  %v11136_v31 = vld [vmem:[%s11377_s11 + $0x10] sm:$0xff] }
 0x32b   : > { %9138 = vmatprep.mubr.f32.mxu0 %v15314_v20 }
 0x32e   : > { %9139 = vmatmul.mubr.f32.gmra.mrb[62].mxu0 %v15315_v10 }
 0x385   : > { %v9047_v25 = vpop.f32.mrb[0].mxu0 }
 0x386   : > { %v3605_v28 = vsub.f32 %v11133_v2, %v9047_v25  ;;  %v3222_v18 = vpop.f32.mrb[1].mxu0 }
 0x387   : > { %v3604_v26 = vsub.f32 %v11134_v0, %v3222_v18 }
 0x388   : > { %v3669_v42 = vmul.f32 %v3605_v28, %v3605_v28 }
 0x389   : > { %v3668_v52 = vmul.f32 %v3604_v26, %v3604_v26  ;;  %v9050_v40 = vpop.f32.mrb[2].mxu0 }
 0x38a   : > { %v12814_v17 = vand.u32 4294901760, %v3669_v42  ;;  %v3607_v4 = vsub.f32 %v11135_v16, %v9050_v40  ;;  %v3234_v30 = vpop.f32.mrb[3].mxu0 }
 0x38b   : > { %v12817_v20 = vand.u32 4294901760, %v3668_v52  ;;  %v3606_v10 = vsub.f32 %v11136_v31, %v3234_v30  ;;  %v11143_v31 = vld [vmem:[%s11377_s11 + $0x58] sm:$0xff] }
 0x38c   : > { %15316 = vst [vmem:[#allocation32_spill] sm:$0xff] %v12814_v17  ;;  %v12821_v37 = vsub.f32 %v3669_v42, %v12814_v17  ;;  %v3671_v47 = vmul.f32 %v3607_v4, %v3607_v4  ;;  %v15332_v42 = vld [vmem:[#allocation33_spill] sm:$0xff] }
 0x38d   : > { %15317 = vst [vmem:[#allocation34_spill] sm:$0xff] %v12817_v20  ;;  %v12824_v58 = vsub.f32 %v3668_v52, %v12817_v20  ;;  %v3670_v59 = vmul.f32 %v3606_v10, %v3606_v10  ;;  %v9053_v19 = vpop.f32.mrb[4].mxu0 }
 0x38e   : > { %15318 = vst [vmem:[#allocation36_spill] sm:$0xff] %v12821_v37  ;;  %v12826_v23 = vand.u32 4294901760, %v3671_v47  ;;  %v3609_v6 = vsub.f32 %v11137_v57, %v9053_v19  ;;  %v3246_v38 = vpop.f32.mrb[5].mxu0  ;;  %v14514_v55 = vand.u32 4294901760, %v12821_v37  ;;  %v11144_v57 = vld [vmem:[%s11377_s11 + $0x50] sm:$0xff] }
 0x38f   : > { %15319 = vst [vmem:[#allocation39_spill] sm:$0xff] %v12824_v58  ;;  %v12830_v51 = vand.u32 4294901760, %v3670_v59  ;;  %v3608_v22 = vsub.f32 %v11138_v56, %v3246_v38  ;;  %v14516_v54 = vand.u32 4294901760, %v12824_v58 }
 0x390   : > { %15320 = vst [vmem:[#allocation44_spill] sm:$0xff] %v12826_v23  ;;  %v12835_v50 = vsub.f32 %v3671_v47, %v12826_v23  ;;  %v3673_v5 = vmul.f32 %v3609_v6, %v3609_v6  ;;  %v3826_v7 = vsub.f32 %v12821_v37, %v14514_v55 }
 0x391   : > { %15321 = vst [vmem:[#allocation46_spill] sm:$0xff] %v12830_v51  ;;  %v12841_v13 = vsub.f32 %v3670_v59, %v12830_v51  ;;  %v3672_v35 = vmul.f32 %v3608_v22, %v3608_v22  ;;  %v9056_v48 = vpop.f32.mrb[6].mxu0  ;;  %v3816_v8 = vsub.f32 %v12824_v58, %v14516_v54 }
 0x392   : > { %15322 = vst [vmem:[#allocation47_spill] sm:$0xff] %v12835_v50  ;;  %v12846_v63 = vand.u32 4294901760, %v3673_v5  ;;  %v3611_v36 = vsub.f32 %v11139_v34, %v9056_v48  ;;  %v3258_v44 = vpop.f32.mrb[7].mxu0  ;;  %v14512_v21 = vand.u32 4294901760, %v12835_v50  ;;  %v3827_v41 = vand.u32 4294901760, %v3826_v7  ;;  %v15337_v48 = vld [vmem:[#allocation38_spill] sm:$0xff] }
 0x393   : > { %15323 = vst [vmem:[#allocation8_spill] sm:$0xff] %v12841_v13  ;;  %v12850_v24 = vand.u32 4294901760, %v3672_v35  ;;  %v3610_v12 = vsub.f32 %v11140_v53, %v3258_v44  ;;  %v3817_v29 = vand.u32 4294901760, %v3816_v8  ;;  %v14513_v62 = vand.u32 4294901760, %v12841_v13 }
 0x394   : > { %15324 = vst [vmem:[#allocation10_spill] sm:$0xff] %v12846_v63  ;;  %v12855_v45 = vsub.f32 %v3673_v5, %v12846_v63  ;;  %v3675_v15 = vmul.f32 %v3611_v36, %v3611_v36  ;;  %v3846_v9 = vsub.f32 %v12835_v50, %v14512_v21 }
 0x395   : > { %15325 = vst [vmem:[#allocation49_spill] sm:$0xff] %v12850_v24  ;;  %v12861_v27 = vsub.f32 %v3672_v35, %v12850_v24  ;;  %v3674_v1 = vmul.f32 %v3610_v12, %v3610_v12  ;;  %v9059_v46 = vpop.f32.mrb[8].mxu0  ;;  %9173 = vmatprep.mubr.f32.mxu1 %v3817_v29  ;;  %v3836_v14 = vsub.f32 %v12841_v13, %v14513_v62  ;;  %v11145_v12 = vld [vmem:[%s11377_s11 + $0x68] sm:$0xff] }
 0x396   : > { %15326 = vst [vmem:[#allocation51_spill] sm:$0xff] %v12855_v45  ;;  %v12866_v33 = vand.u32 4294901760, %v3675_v15  ;;  %v3613_v11 = vsub.f32 %v11141_v43, %v9059_v46  ;;  %v3270_v3 = vpop.f32.mrb[9].mxu0  ;;  %9174 = vmatmul.mubr.f32.vlgmr.msra.gmra.mrb[0].mxu1 %v3827_v41  ;;  %v14509_v39 = vand.u32 4294901760, %v12855_v45  ;;  %v3847_v0 = vand.u32 4294901760, %v3846_v9 }
 0x397   : > { %15327 = vst [vmem:[#allocation54_spill] sm:$0xff] %v12861_v27  ;;  %v12870_v32 = vand.u32 4294901760, %v3674_v1  ;;  %v3612_v49 = vsub.f32 %v11142_v60, %v3270_v3  ;;  %10136 = vmatpush3.bf16.msra.mxu1 %v15330_v61  ;;  %v3837_v25 = vand.u32 4294901760, %v3836_v14  ;;  %v14510_v2 = vand.u32 4294901760, %v12861_v27  ;;  %v15342_v61 = vld [vmem:[#allocation53_spill] sm:$0xff] }
 0x398   : > { %15328 = vst [vmem:[#allocation56_spill] sm:$0xff] %v12866_v33  ;;  %v12876_v28 = vsub.f32 %v3675_v15, %v12866_v33  ;;  %v3677_v18 = vmul.f32 %v3613_v11, %v3613_v11  ;;  %v3866_v26 = vsub.f32 %v12855_v45, %v14509_v39  ;;  %10138 = vmatprep.subr.bf16.mxu1 %v15332_v42 }
 0x399   : > { %15329 = vst [vmem:[#allocation61_spill] sm:$0xff] %v12870_v32  ;;  %v12883_v52 = vsub.f32 %v3674_v1, %v12870_v32  ;;  %v3676_v40 = vmul.f32 %v3612_v49, %v3612_v49  ;;  %v9062_v16 = vpop.f32.mrb[10].mxu0  ;;  %9176 = vmatprep.mubr.f32.mxu1 %v3837_v25  ;;  %v3856_v4 = vsub.f32 %v12861_v27, %v14510_v2  ;;  %v11146_v1 = vld [vmem:[%s11377_s11 + $0x60] sm:$0xff] }
 0x39a   : > { %15331 = vst [vmem:[#allocation63_spill] sm:$0xff] %v12876_v28  ;;  %v12888_v30 = vand.u32 4294901760, %v3677_v18  ;;  %v3615_v10 = vsub.f32 %v11143_v31, %v9062_v16  ;;  %v3282_v47 = vpop.f32.mrb[11].mxu0  ;;  %9177 = vmatmul.mubr.f32.gmra.mrb[2].mxu1 %v3847_v0  ;;  %v14506_v59 = vand.u32 4294901760, %v12876_v28  ;;  %v3867_v7 = vand.u32 4294901760, %v3866_v26 }
 0x39b   : > { %15333 = vst [vmem:[#allocation64_spill] sm:$0xff] %v12883_v52  ;;  %v12892_v19 = vand.u32 4294901760, %v3676_v40  ;;  %v3614_v6 = vsub.f32 %v11144_v57, %v3282_v47  ;;  %v3857_v38 = vand.u32 4294901760, %v3856_v4  ;;  %v14507_v56 = vand.u32 4294901760, %v12883_v52  ;;  %10140 = vmatpush3.bf16.msra.mxu1 %v15332_v42  ;;  %v11148_v47 = vld [vmem:[%s11377_s11 + $0x70] sm:$0xff] }
 0x39c   : > { %15334 = vst [vmem:[#allocation65_spill] sm:$0xff] %v12888_v30  ;;  %v12898_v22 = vsub.f32 %v3677_v18, %v12888_v30  ;;  %v3679_v5 = vmul.f32 %v3615_v10, %v3615_v10  ;;  %v3886_v35 = vsub.f32 %v12876_v28, %v14506_v59  ;;  %10142 = vmatprep.subr.bf16.mxu1 %v15337_v48 }
 0x39d   : > { %15335 = vst [vmem:[#allocation69_spill] sm:$0xff] %v12892_v19  ;;  %v12905_v8 = vsub.f32 %v3676_v40, %v12892_v19  ;;  %v3678_v34 = vmul.f32 %v3614_v6, %v3614_v6  ;;  %v9065_v36 = vpop.f32.mrb[12].mxu0  ;;  %9179 = vmatprep.mubr.f32.mxu1 %v3857_v38  ;;  %v3876_v44 = vsub.f32 %v12883_v52, %v14507_v56  ;;  %v11147_v40 = vld [vmem:[%s11377_s11 + $0x78] sm:$0xff]  ;;  %v11156_v56 = vld [vmem:[%s11377_s11 + $0xb0] sm:$0xff] }
 0x39e   : > { %15336 = vst [vmem:[#allocation70_spill] sm:$0xff] %v12898_v22  ;;  %v12910_v53 = vand.u32 4294901760, %v3679_v5  ;;  %v3617_v29 = vsub.f32 %v11145_v12, %v9065_v36  ;;  %v3294_v15 = vpop.f32.mrb[13].mxu0  ;;  %9180 = vmatmul.mubr.f32.gmra.mrb[4].mxu1 %v3867_v7  ;;  %v14503_v41 = vand.u32 4294901760, %v12898_v22  ;;  %v3887_v60 = vand.u32 4294901760, %v3886_v35 }
 0x39f   : > { %15338 = vst [vmem:[#allocation74_spill] sm:$0xff] %v12905_v8  ;;  %v12914_v9 = vand.u32 4294901760, %v3678_v34  ;;  %v3616_v46 = vsub.f32 %v11146_v1, %v3294_v15  ;;  %v3877_v14 = vand.u32 4294901760, %v3876_v44  ;;  %v14504_v43 = vand.u32 4294901760, %v12905_v8  ;;  %10144 = vmatpush3.bf16.msra.mxu1 %v15337_v48  ;;  %v11149_v1 = vld [vmem:[%s11377_s11 + $0x88] sm:$0xff] }
 0x3a0   : > { %15339 = vst [vmem:[#allocation77_spill] sm:$0xff] %v12910_v53  ;;  %v12920_v11 = vsub.f32 %v3679_v5, %v12910_v53  ;;  %v3681_v3 = vmul.f32 %v3617_v29, %v3617_v29  ;;  %v3906_v49 = vsub.f32 %v12898_v22, %v14503_v41  ;;  %10146 = vmatprep.subr.bf16.mxu1 %v15342_v61 }
 0x3a1   : > { %15340 = vst [vmem:[#allocation79_spill] sm:$0xff] %v12914_v9  ;;  %v12927_v25 = vsub.f32 %v3678_v34, %v12914_v9  ;;  %v3680_v18 = vmul.f32 %v3616_v46, %v3616_v46  ;;  %v9068_v0 = vpop.f32.mrb[14].mxu0  ;;  %9182 = vmatprep.mubr.f32.mxu1 %v3877_v14  ;;  %v3896_v26 = vsub.f32 %v12905_v8, %v14504_v43  ;;  %v15347_v34 = vld [vmem:[#allocation71_spill] sm:$0xff] }
 0x3a2   : > { %15341 = vst [vmem:[#allocation80_spill] sm:$0xff] %v12920_v11  ;;  %v12932_v42 = vand.u32 4294901760, %v3681_v3  ;;  %v3619_v16 = vsub.f32 %v11147_v40, %v9068_v0  ;;  %v3306_v4 = vpop.f32.mrb[15].mxu0  ;;  %9183 = vmatmul.mubr.f32.gmra.mrb[6].mxu1 %v3887_v60  ;;  %v14500_v31 = vand.u32 4294901760, %v12920_v11  ;;  %v3907_v35 = vand.u32 4294901760, %v3906_v49  ;;  %v11150_v49 = vld [vmem:[%s11377_s11 + $0x80] sm:$0xff] }
 0x3a3   : > { %15343 = vst [vmem:[#allocation85_spill] sm:$0xff] %v12927_v25  ;;  %v12936_v10 = vand.u32 4294901760, %v3680_v18  ;;  %v3618_v57 = vsub.f32 %v11148_v47, %v3306_v4  ;;  %v3897_v6 = vand.u32 4294901760, %v3896_v26  ;;  %v14501_v38 = vand.u32 4294901760, %v12927_v25  ;;  %10148 = vmatpush3.bf16.msra.mxu1 %v15342_v61  ;;  %v15352_v47 = vld [vmem:[#allocation87_spill] sm:$0xff] }
 0x3a4   : > { %15344 = vst [vmem:[#allocation86_spill] sm:$0xff] %v12932_v42  ;;  %v12942_v5 = vsub.f32 %v3681_v3, %v12932_v42  ;;  %v3683_v7 = vmul.f32 %v3619_v16, %v3619_v16  ;;  %v3926_v48 = vsub.f32 %v12920_v11, %v14500_v31  ;;  %10150 = vmatprep.subr.bf16.mxu1 %v15347_v34 }
 0x3a5   : > { %15345 = vst [vmem:[#allocation88_spill] sm:$0xff] %v12936_v10  ;;  %v12949_v36 = vsub.f32 %v3680_v18, %v12936_v10  ;;  %v3682_v44 = vmul.f32 %v3618_v57, %v3618_v57  ;;  %v9071_v12 = vpop.f32.mrb[16].mxu0  ;;  %9185 = vmatprep.mubr.f32.mxu1 %v3897_v6  ;;  %v3916_v29 = vsub.f32 %v12927_v25, %v14501_v38  ;;  %v11154_v38 = vld [vmem:[%s11377_s11 + $0xa0] sm:$0xff] }
 0x3a6   : > { %15346 = vst [vmem:[#allocation89_spill] sm:$0xff] %v12942_v5  ;;  %v12954_v15 = vand.u32 4294901760, %v3683_v7  ;;  %v3621_v46 = vsub.f32 %v11149_v1, %v9071_v12  ;;  %v3318_v14 = vpop.f32.mrb[17].mxu0  ;;  %9186 = vmatmul.mubr.f32.gmra.mrb[8].mxu1 %v3907_v35  ;;  %v14497_v3 = vand.u32 4294901760, %v12942_v5  ;;  %v3927_v16 = vand.u32 4294901760, %v3926_v48  ;;  %v11151_v12 = vld [vmem:[%s11377_s11 + $0x98] sm:$0xff] }
 0x3a7   : > { %15348 = vst [vmem:[#allocation94_spill] sm:$0xff] %v12949_v36  ;;  %v12958_v60 = vand.u32 4294901760, %v3682_v44  ;;  %v3620_v61 = vsub.f32 %v11150_v49, %v3318_v14  ;;  %v3917_v18 = vand.u32 4294901760, %v3916_v29  ;;  %v14498_v0 = vand.u32 4294901760, %v12949_v36  ;;  %10152 = vmatpush3.bf16.msra.mxu1 %v15347_v34  ;;  %v11152_v14 = vld [vmem:[%s11377_s11 + $0x90] sm:$0xff] }
 0x3a8   : > { %15349 = vst [vmem:[#allocation96_spill] sm:$0xff] %v12954_v15  ;;  %v12964_v26 = vsub.f32 %v3683_v7, %v12954_v15  ;;  %v3685_v40 = vmul.f32 %v3621_v46, %v3621_v46  ;;  %v3946_v4 = vsub.f32 %v12942_v5, %v14497_v3  ;;  %10154 = vmatprep.subr.bf16.mxu1 %v15352_v47 }
 0x3a9   : > { %15350 = vst [vmem:[#allocation100_spill] sm:$0xff] %v12958_v60  ;;  %v12971_v57 = vsub.f32 %v3682_v44, %v12958_v60  ;;  %v3684_v6 = vmul.f32 %v3620_v61, %v3620_v61  ;;  %v9074_v35 = vpop.f32.mrb[18].mxu0  ;;  %9188 = vmatprep.mubr.f32.mxu1 %v3917_v18  ;;  %v3936_v7 = vsub.f32 %v12949_v36, %v14498_v0 }
 0x3aa   : > { %15351 = vst [vmem:[#allocation102_spill] sm:$0xff] %v12964_v26  ;;  %v12976_v34 = vand.u32 4294901760, %v3685_v40  ;;  %v3623_v48 = vsub.f32 %v11151_v12, %v9074_v35  ;;  %v3330_v29 = vpop.f32.mrb[19].mxu0  ;;  %9189 = vmatmul.mubr.f32.gmra.mrb[10].mxu1 %v3927_v16  ;;  %v14499_v1 = vand.u32 4294901760, %v12964_v26  ;;  %v3947_v35 = vand.u32 4294901760, %v3946_v4  ;;  %v15357_v12 = vld [vmem:[#allocation101_spill] sm:$0xff] }
 0x3ab   : > { %15353 = vst [vmem:[#allocation103_spill] sm:$0xff] %v12971_v57  ;;  %v12980_v46 = vand.u32 4294901760, %v3684_v6  ;;  %v3622_v44 = vsub.f32 %v11152_v14, %v3330_v29  ;;  %v3937_v49 = vand.u32 4294901760, %v3936_v7  ;;  %v14502_v61 = vand.u32 4294901760, %v12971_v57  ;;  %10156 = vmatpush3.bf16.msra.mxu1 %v15352_v47 }
 0x3ac   : > { %15354 = vst [vmem:[#allocation104_spill] sm:$0xff] %v12976_v34  ;;  %v12986_v18 = vsub.f32 %v3685_v40, %v12976_v34  ;;  %v3687_v3 = vmul.f32 %v3623_v48, %v3623_v48  ;;  %v3966_v16 = vsub.f32 %v12964_v26, %v14499_v1  ;;  %10158 = vmatprep.subr.bf16.mxu1 %v15357_v12  ;;  %v11153_v48 = vld [vmem:[%s11377_s11 + $0xa8] sm:$0xff] }
 0x3ad   : > { %15355 = vst [vmem:[#allocation127_spill] sm:$0xff] %v12980_v46  ;;  %v12993_v0 = vsub.f32 %v3684_v6, %v12980_v46  ;;  %v3686_v7 = vmul.f32 %v3622_v44, %v3622_v44  ;;  %v9077_v29 = vpop.f32.mrb[20].mxu0  ;;  %9191 = vmatprep.mubr.f32.mxu1 %v3937_v49  ;;  %v3956_v40 = vsub.f32 %v12971_v57, %v14502_v61 }
 0x3ae   : > { %15356 = vst [vmem:[#allocation129_spill] sm:$0xff] %v12986_v18  ;;  %v12998_v47 = vand.u32 4294901760, %v3687_v3  ;;  %v3625_v4 = vsub.f32 %v11153_v48, %v9077_v29  ;;  %v3342_v14 = vpop.f32.mrb[21].mxu0  ;;  %9192 = vmatmul.mubr.f32.gmra.mrb[12].mxu1 %v3947_v35  ;;  %v14505_v1 = vand.u32 4294901760, %v12986_v18  ;;  %v3967_v29 = vand.u32 4294901760, %v3966_v16  ;;  %v15362_v48 = vld [vmem:[#allocation114_spill] sm:$0xff] }
 0x3af   : > { %15358 = vst [vmem:[#allocation132_spill] sm:$0xff] %v12993_v0  ;;  %v13002_v31 = vand.u32 4294901760, %v3686_v7  ;;  %v3624_v6 = vsub.f32 %v11154_v38, %v3342_v14  ;;  %v3957_v44 = vand.u32 4294901760, %v3956_v40  ;;  %v14508_v49 = vand.u32 4294901760, %v12993_v0  ;;  %10160 = vmatpush3.bf16.msra.mxu1 %v15357_v12 }
 0x3b0   : > { %15359 = vst [vmem:[#allocation134_spill] sm:$0xff] %v12998_v47  ;;  %v13008_v61 = vsub.f32 %v3687_v3, %v12998_v47  ;;  %v3689_v41 = vmul.f32 %v3625_v4, %v3625_v4  ;;  %v3986_v35 = vsub.f32 %v12986_v18, %v14505_v1  ;;  %10162 = vmatprep.subr.bf16.mxu1 %v15362_v48  ;;  %v11155_v4 = vld [vmem:[%s11377_s11 + $0xb8] sm:$0xff] }
 0x3b1   : > { %15360 = vst [vmem:[#allocation136_spill] sm:$0xff] %v13002_v31  ;;  %v13015_v43 = vsub.f32 %v3686_v7, %v13002_v31  ;;  %v3688_v38 = vmul.f32 %v3624_v6, %v3624_v6  ;;  %v9080_v40 = vpop.f32.mrb[22].mxu0  ;;  %9194 = vmatprep.mubr.f32.mxu1 %v3957_v44  ;;  %v3976_v3 = vsub.f32 %v12993_v0, %v14508_v49 }
 0x3b2   : > { %15361 = vst [vmem:[#allocation139_spill] sm:$0xff] %v13008_v61  ;;  %v13020_v12 = vand.u32 4294901760, %v3689_v41  ;;  %v3627_v16 = vsub.f32 %v11155_v4, %v9080_v40  ;;  %v3354_v14 = vpop.f32.mrb[23].mxu0  ;;  %9195 = vmatmul.mubr.f32.gmra.mrb[14].mxu1 %v3967_v29  ;;  %v14511_v1 = vand.u32 4294901760, %v13008_v61  ;;  %v3987_v40 = vand.u32 4294901760, %v3986_v35  ;;  %v15367_v4 = vld [vmem:[#allocation115_spill] sm:$0xff] }
 0x3b3   : > { %15363 = vst [vmem:[#allocation140_spill] sm:$0xff] %v13015_v43  ;;  %v13024_v59 = vand.u32 4294901760, %v3688_v38  ;;  %v3626_v7 = vsub.f32 %v11156_v56, %v3354_v14  ;;  %v3977_v6 = vand.u32 4294901760, %v3976_v3  ;;  %v14515_v44 = vand.u32 4294901760, %v13015_v43  ;;  %10164 = vmatpush3.bf16.msra.mxu1 %v15362_v48 }
 0x3b4   : > { %15364 = vst [vmem:[#allocation40_spill] sm:$0xff] %v13020_v12  ;;  %v13030_v49 = vsub.f32 %v3689_v41, %v13020_v12  ;;  %v3691_v39 = vmul.f32 %v3627_v16, %v3627_v16  ;;  %v4006_v29 = vsub.f32 %v13008_v61, %v14511_v1  ;;  %10166 = vmatprep.subr.bf16.mxu1 %v15367_v4  ;;  %v11157_v16 = vld [vmem:[%s11377_s11 + $0xc8] sm:$0xff] }
 0x3b5   : > { %15365 = vst [vmem:[#allocation41_spill] sm:$0xff] %v13024_v59  ;;  %v13037_v2 = vsub.f32 %v3688_v38, %v13024_v59  ;;  %v3690_v56 = vmul.f32 %v3626_v7, %v3626_v7  ;;  %v9083_v3 = vpop.f32.mrb[24].mxu0  ;;  %9197 = vmatprep.mubr.f32.mxu1 %v3977_v6  ;;  %v3996_v41 = vsub.f32 %v13015_v43, %v14515_v44  ;;  %v11158_v38 = vld [vmem:[%s11377_s11 + $0xc0] sm:$0xff] }
 0x3b6   : > { %15366 = vst [vmem:[#allocation60_spill] sm:$0xff] %v13030_v49  ;;  %v13042_v48 = vand.u32 4294901760, %v3691_v39  ;;  %v3629_v35 = vsub.f32 %v11157_v16, %v9083_v3  ;;  %v3366_v14 = vpop.f32.mrb[25].mxu0  ;;  %9198 = vmatmul.mubr.f32.gmra.mrb[16].mxu1 %v3987_v40  ;;  %v14519_v1 = vand.u32 4294901760, %v13030_v49  ;;  %v4007_v54 = vand.u32 4294901760, %v4006_v29 }
 0x3b7   : > { %15368 = vst [vmem:[#allocation62_spill] sm:$0xff] %v13037_v2  ;;  %v13046_v21 = vand.u32 4294901760, %v3690_v56  ;;  %v3628_v62 = vsub.f32 %v11158_v38, %v3366_v14  ;;  %v3997_v7 = vand.u32 4294901760, %v3996_v41  ;;  %v14524_v6 = vand.u32 4294901760, %v13037_v2 }
 0x3b8   : > { %15369 = vst [vmem:[#allocation75_spill] sm:$0xff] %v13042_v48  ;;  %v13051_v55 = vsub.f32 %v3691_v39, %v13042_v48  ;;  %v3693_v44 = vmul.f32 %v3629_v35, %v3629_v35  ;;  %v4026_v40 = vsub.f32 %v13030_v49, %v14519_v1  ;;  %v11159_v39 = vld [vmem:[%s11377_s11 + $0xd8] sm:$0xff] }
 0x3b9   : > { %15370 = vst [vmem:[#allocation78_spill] sm:$0xff] %v13046_v21  ;;  %v13057_v3 = vsub.f32 %v3690_v56, %v13046_v21  ;;  %v3692_v16 = vmul.f32 %v3628_v62, %v3628_v62  ;;  %v9086_v61 = vpop.f32.mrb[26].mxu0  ;;  %9200 = vmatprep.mubr.f32.mxu1 %v3997_v7  ;;  %v4016_v41 = vsub.f32 %v13037_v2, %v14524_v6  ;;  %v11160_v56 = vld [vmem:[%s11377_s11 + $0xd0] sm:$0xff] }
 0x3ba   : > { %15371 = vst [vmem:[#allocation91_spill] sm:$0xff] %v13051_v55  ;;  %v13062_v14 = vand.u32 4294901760, %v3693_v44  ;;  %v3631_v38 = vsub.f32 %v11159_v39, %v9086_v61  ;;  %v3378_v35 = vpop.f32.mrb[27].mxu0  ;;  %9201 = vmatmul.mubr.f32.gmra.mrb[18].mxu1 %v4007_v54  ;;  %v14529_v29 = vand.u32 4294901760, %v13051_v55  ;;  %v4027_v2 = vand.u32 4294901760, %v4026_v40 }
 0x3bb   : > { %15372 = vst [vmem:[#allocation92_spill] sm:$0xff] %v13057_v3  ;;  %v13066_v1 = vand.u32 4294901760, %v3692_v16  ;;  %v3630_v49 = vsub.f32 %v11160_v56, %v3378_v35  ;;  %v4017_v62 = vand.u32 4294901760, %v4016_v41  ;;  %v14534_v7 = vand.u32 4294901760, %v13057_v3 }
 0x3bc   : > { %15373 = vst [vmem:[#allocation107_spill] sm:$0xff] %v13062_v14  ;;  %v13071_v43 = vsub.f32 %v3693_v44, %v13062_v14  ;;  %v3695_v6 = vmul.f32 %v3631_v38, %v3631_v38  ;;  %v4046_v54 = vsub.f32 %v13051_v55, %v14529_v29  ;;  %v11161_v44 = vld [vmem:[%s11377_s11 + $0xe8] sm:$0xff] }
 0x3bd   : > { %15374 = vst [vmem:[#allocation109_spill] sm:$0xff] %v13066_v1  ;;  %v13077_v61 = vsub.f32 %v3692_v16, %v13066_v1  ;;  %v3694_v39 = vmul.f32 %v3630_v49, %v3630_v49  ;;  %v9089_v18 = vpop.f32.mrb[28].mxu0  ;;  %9203 = vmatprep.mubr.f32.mxu1 %v4017_v62  ;;  %v4036_v41 = vsub.f32 %v13057_v3, %v14534_v7  ;;  %v11162_v16 = vld [vmem:[%s11377_s11 + $0xe0] sm:$0xff] }
 0x3be   : > { %15375 = vst [vmem:[#allocation113_spill] sm:$0xff] %v13071_v43  ;;  %v13082_v35 = vand.u32 4294901760, %v3695_v6  ;;  %v3633_v56 = vsub.f32 %v11161_v44, %v9089_v18  ;;  %v3390_v38 = vpop.f32.mrb[29].mxu0  ;;  %9204 = vmatmul.mubr.f32.gmra.mrb[20].mxu1 %v4027_v2  ;;  %v14539_v40 = vand.u32 4294901760, %v13071_v43  ;;  %v4047_v3 = vand.u32 4294901760, %v4046_v54 }
 0x3bf   : > { %15376 = vst [vmem:[#allocation116_spill] sm:$0xff] %v13077_v61  ;;  %v13086_v29 = vand.u32 4294901760, %v3694_v39  ;;  %v3632_v55 = vsub.f32 %v11162_v16, %v3390_v38  ;;  %v4037_v49 = vand.u32 4294901760, %v4036_v41  ;;  %v14544_v62 = vand.u32 4294901760, %v13077_v61 }
 0x3c0   : > { %15377 = vst [vmem:[#allocation117_spill] sm:$0xff] %v13082_v35  ;;  %v13091_v0 = vsub.f32 %v3695_v6, %v13082_v35  ;;  %v3697_v7 = vmul.f32 %v3633_v56, %v3633_v56  ;;  %v4066_v2 = vsub.f32 %v13071_v43, %v14539_v40  ;;  %v11163_v6 = vld [vmem:[%s11377_s11 + $0xf8] sm:$0xff] }
 0x3c1   : > { %15378 = vst [vmem:[#allocation118_spill] sm:$0xff] %v13086_v29  ;;  %v13097_v18 = vsub.f32 %v3694_v39, %v13086_v29  ;;  %v3696_v44 = vmul.f32 %v3632_v55, %v3632_v55  ;;  %v9092_v26 = vpop.f32.mrb[30].mxu0  ;;  %9206 = vmatprep.mubr.f32.mxu1 %v4037_v49  ;;  %v4056_v41 = vsub.f32 %v13077_v61, %v14544_v62  ;;  %v11164_v39 = vld [vmem:[%s11377_s11 + $0xf0] sm:$0xff] }
 0x3c2   : > { %15379 = vst [vmem:[#allocation123_spill] sm:$0xff] %v13091_v0  ;;  %v13102_v38 = vand.u32 4294901760, %v3697_v7  ;;  %v3635_v16 = vsub.f32 %v11163_v6, %v9092_v26  ;;  %v3402_v56 = vpop.f32.mrb[31].mxu0  ;;  %9207 = vmatmul.mubr.f32.gmra.mrb[22].mxu1 %v4047_v3  ;;  %v14549_v54 = vand.u32 4294901760, %v13091_v0  ;;  %v4067_v61 = vand.u32 4294901760, %v4066_v2 }
 0x3c3   : > { %15380 = vst [vmem:[#allocation125_spill] sm:$0xff] %v13097_v18  ;;  %v13106_v40 = vand.u32 4294901760, %v3696_v44  ;;  %v3634_v43 = vsub.f32 %v11164_v39, %v3402_v56  ;;  %v4057_v55 = vand.u32 4294901760, %v4056_v41  ;;  %v14554_v49 = vand.u32 4294901760, %v13097_v18 }
 0x3c4   : > { %15381 = vst [vmem:[#allocation142_spill] sm:$0xff] %v13102_v38  ;;  %v13111_v57 = vsub.f32 %v3697_v7, %v13102_v38  ;;  %v3699_v62 = vmul.f32 %v3635_v16, %v3635_v16  ;;  %v4086_v26 = vsub.f32 %v13091_v0, %v14549_v54  ;;  %v11165_v7 = vld [vmem:[%s11377_s11 + $0x108] sm:$0xff] }
 0x3c5   : > { %15382 = vst [vmem:[#allocation144_spill] sm:$0xff] %v13106_v40  ;;  %v13117_v3 = vsub.f32 %v3696_v44, %v13106_v40  ;;  %v3698_v6 = vmul.f32 %v3634_v43, %v3634_v43  ;;  %v9095_v5 = vpop.f32.mrb[32].mxu0  ;;  %9209 = vmatprep.mubr.f32.mxu1 %v4057_v55  ;;  %v4076_v41 = vsub.f32 %v13097_v18, %v14554_v49  ;;  %v11166_v44 = vld [vmem:[%s11377_s11 + $0x100] sm:$0xff] }
 0x3c6   : > { %15383 = vst [vmem:[#allocation146_spill] sm:$0xff] %v13111_v57  ;;  %v13122_v56 = vand.u32 4294901760, %v3699_v62  ;;  %v3637_v39 = vsub.f32 %v11165_v7, %v9095_v5  ;;  %v3414_v16 = vpop.f32.mrb[33].mxu0  ;;  %9210 = vmatmul.mubr.f32.gmra.mrb[24].mxu1 %v4067_v61  ;;  %v14559_v2 = vand.u32 4294901760, %v13111_v57  ;;  %v4087_v18 = vand.u32 4294901760, %v4086_v26 }
 0x3c7   : > { %15384 = vst [vmem:[#allocation148_spill] sm:$0xff] %v13117_v3  ;;  %v13126_v54 = vand.u32 4294901760, %v3698_v6  ;;  %v3636_v0 = vsub.f32 %v11166_v44, %v3414_v16  ;;  %v4077_v43 = vand.u32 4294901760, %v4076_v41  ;;  %v14564_v55 = vand.u32 4294901760, %v13117_v3 }
 0x3c8   : > { %15385 = vst [vmem:[#allocation151_spill] sm:$0xff] %v13122_v56  ;;  %v13131_v36 = vsub.f32 %v3699_v62, %v13122_v56  ;;  %v3701_v49 = vmul.f32 %v3637_v39, %v3637_v39  ;;  %v4106_v5 = vsub.f32 %v13111_v57, %v14559_v2  ;;  %v11167_v62 = vld [vmem:[%s11377_s11 + $0x118] sm:$0xff] }
 0x3c9   : > { %15386 = vst [vmem:[#allocation155_spill] sm:$0xff] %v13126_v54  ;;  %v13137_v61 = vsub.f32 %v3698_v6, %v13126_v54  ;;  %v3700_v7 = vmul.f32 %v3636_v0, %v3636_v0  ;;  %v9098_v11 = vpop.f32.mrb[34].mxu0  ;;  %9212 = vmatprep.mubr.f32.mxu1 %v4077_v43  ;;  %v4096_v41 = vsub.f32 %v13117_v3, %v14564_v55  ;;  %v11168_v6 = vld [vmem:[%s11377_s11 + $0x110] sm:$0xff] }
 0x3ca   : > { %15387 = vst [vmem:[#allocation157_spill] sm:$0xff] %v13131_v36  ;;  %v13142_v16 = vand.u32 4294901760, %v3701_v49  ;;  %v3639_v44 = vsub.f32 %v11167_v62, %v9098_v11  ;;  %v3426_v39 = vpop.f32.mrb[35].mxu0  ;;  %9213 = vmatmul.mubr.f32.gmra.mrb[26].mxu1 %v4087_v18  ;;  %v14569_v26 = vand.u32 4294901760, %v13131_v36  ;;  %v4107_v3 = vand.u32 4294901760, %v4106_v5 }
 0x3cb   : > { %15388 = vst [vmem:[#allocation6_spill] sm:$0xff] %v13137_v61  ;;  %v13146_v2 = vand.u32 4294901760, %v3700_v7  ;;  %v3638_v57 = vsub.f32 %v11168_v6, %v3426_v39  ;;  %v4097_v0 = vand.u32 4294901760, %v4096_v41  ;;  %v14574_v43 = vand.u32 4294901760, %v13137_v61 }
 0x3cc   : > { %15389 = vst [vmem:[#allocation11_spill] sm:$0xff] %v13142_v16  ;;  %v13151_v25 = vsub.f32 %v3701_v49, %v13142_v16  ;;  %v3703_v55 = vmul.f32 %v3639_v44, %v3639_v44  ;;  %v4126_v11 = vsub.f32 %v13131_v36, %v14569_v26  ;;  %v11169_v49 = vld [vmem:[%s11377_s11 + $0x128] sm:$0xff] }
 0x3cd   : > { %15390 = vst [vmem:[#allocation13_spill] sm:$0xff] %v13146_v2  ;;  %v13157_v18 = vsub.f32 %v3700_v7, %v13146_v2  ;;  %v3702_v62 = vmul.f32 %v3638_v57, %v3638_v57  ;;  %v9101_v22 = vpop.f32.mrb[36].mxu0  ;;  %9215 = vmatprep.mubr.f32.mxu1 %v4097_v0  ;;  %v4116_v41 = vsub.f32 %v13137_v61, %v14574_v43  ;;  %v11170_v7 = vld [vmem:[%s11377_s11 + $0x120] sm:$0xff] }
 0x3ce   : > { %15391 = vst [vmem:[#allocation15_spill] sm:$0xff] %v13151_v25  ;;  %v13162_v39 = vand.u32 4294901760, %v3703_v55  ;;  %v3641_v6 = vsub.f32 %v11169_v49, %v9101_v22  ;;  %v3438_v44 = vpop.f32.mrb[37].mxu0  ;;  %9216 = vmatmul.mubr.f32.gmra.mrb[28].mxu1 %v4107_v3  ;;  %v14579_v5 = vand.u32 4294901760, %v13151_v25  ;;  %v4127_v61 = vand.u32 4294901760, %v4126_v11 }
 0x3cf   : > { %15392 = vst [vmem:[#allocation16_spill] sm:$0xff] %v13157_v18  ;;  %v13166_v26 = vand.u32 4294901760, %v3702_v62  ;;  %v3640_v36 = vsub.f32 %v11170_v7, %v3438_v44  ;;  %v4117_v57 = vand.u32 4294901760, %v4116_v41  ;;  %v14584_v0 = vand.u32 4294901760, %v13157_v18 }
 0x3d0   : > { %15393 = vst [vmem:[#allocation19_spill] sm:$0xff] %v13162_v39  ;;  %v13171_v8 = vsub.f32 %v3703_v55, %v13162_v39  ;;  %v3705_v43 = vmul.f32 %v3641_v6, %v3641_v6  ;;  %v4146_v22 = vsub.f32 %v13151_v25, %v14579_v5  ;;  %v11171_v55 = vld [vmem:[%s11377_s11 + $0x138] sm:$0xff] }
 0x3d1   : > { %15394 = vst [vmem:[#allocation23_spill] sm:$0xff] %v13166_v26  ;;  %v13177_v3 = vsub.f32 %v3702_v62, %v13166_v26  ;;  %v3704_v49 = vmul.f32 %v3640_v36, %v3640_v36  ;;  %v9104_v28 = vpop.f32.mrb[38].mxu0  ;;  %9218 = vmatprep.mubr.f32.mxu1 %v4117_v57  ;;  %v4136_v41 = vsub.f32 %v13157_v18, %v14584_v0  ;;  %v11172_v62 = vld [vmem:[%s11377_s11 + $0x130] sm:$0xff] }
 0x3d2   : > { %15395 = vst [vmem:[#allocation24_spill] sm:$0xff] %v13171_v8  ;;  %v13182_v44 = vand.u32 4294901760, %v3705_v43  ;;  %v3643_v7 = vsub.f32 %v11171_v55, %v9104_v28  ;;  %v3450_v6 = vpop.f32.mrb[39].mxu0  ;;  %9219 = vmatmul.mubr.f32.gmra.mrb[30].mxu1 %v4127_v61  ;;  %v14589_v11 = vand.u32 4294901760, %v13171_v8  ;;  %v4147_v18 = vand.u32 4294901760, %v4146_v22 }
 0x3d3   : > { %15396 = vst [vmem:[#allocation27_spill] sm:$0xff] %v13177_v3  ;;  %v13186_v5 = vand.u32 4294901760, %v3704_v49  ;;  %v3642_v25 = vsub.f32 %v11172_v62, %v3450_v6  ;;  %v4137_v36 = vand.u32 4294901760, %v4136_v41  ;;  %v14594_v57 = vand.u32 4294901760, %v13177_v3 }
 0x3d4   : > { %15397 = vst [vmem:[#allocation30_spill] sm:$0xff] %v13182_v44  ;;  %v13191_v52 = vsub.f32 %v3705_v43, %v13182_v44  ;;  %v3707_v0 = vmul.f32 %v3643_v7, %v3643_v7  ;;  %v4166_v28 = vsub.f32 %v13171_v8, %v14589_v11  ;;  %v11173_v43 = vld [vmem:[%s11377_s11 + $0x148] sm:$0xff] }
 0x3d5   : > { %15398 = vst [vmem:[#allocation31_spill] sm:$0xff] %v13186_v5  ;;  %v13197_v61 = vsub.f32 %v3704_v49, %v13186_v5  ;;  %v3706_v55 = vmul.f32 %v3642_v25, %v3642_v25  ;;  %v9107_v45 = vpop.f32.mrb[40].mxu0  ;;  %9221 = vmatprep.mubr.f32.mxu1 %v4137_v36  ;;  %v4156_v41 = vsub.f32 %v13177_v3, %v14594_v57  ;;  %v11174_v49 = vld [vmem:[%s11377_s11 + $0x140] sm:$0xff] }
 0x3d6   : > { %15399 = vst [vmem:[#allocation35_spill] sm:$0xff] %v13191_v52  ;;  %v13202_v6 = vand.u32 4294901760, %v3707_v0  ;;  %v3645_v62 = vsub.f32 %v11173_v43, %v9107_v45  ;;  %v3462_v7 = vpop.f32.mrb[41].mxu0  ;;  %9222 = vmatmul.mubr.f32.gmra.mrb[32].mxu1 %v4147_v18  ;;  %v14599_v22 = vand.u32 4294901760, %v13191_v52  ;;  %v4167_v3 = vand.u32 4294901760, %v4166_v28 }
 0x3d7   : > { %15400 = vst [vmem:[#allocation37_spill] sm:$0xff] %v13197_v61  ;;  %v13206_v11 = vand.u32 4294901760, %v3706_v55  ;;  %v3644_v8 = vsub.f32 %v11174_v49, %v3462_v7  ;;  %v4157_v25 = vand.u32 4294901760, %v4156_v41  ;;  %v14604_v36 = vand.u32 4294901760, %v13197_v61 }
 0x3d8   : > { %15401 = vst [vmem:[#allocation42_spill] sm:$0xff] %v13202_v6  ;;  %v13211_v27 = vsub.f32 %v3707_v0, %v13202_v6  ;;  %v3709_v57 = vmul.f32 %v3645_v62, %v3645_v62  ;;  %v4186_v45 = vsub.f32 %v13191_v52, %v14599_v22  ;;  %v11175_v0 = vld [vmem:[%s11377_s11 + $0x158] sm:$0xff] }
 0x3d9   : > { %15402 = vst [vmem:[#allocation43_spill] sm:$0xff] %v13206_v11  ;;  %v13217_v18 = vsub.f32 %v3706_v55, %v13206_v11  ;;  %v3708_v43 = vmul.f32 %v3644_v8, %v3644_v8  ;;  %v9110_v50 = vpop.f32.mrb[42].mxu0  ;;  %9224 = vmatprep.mubr.f32.mxu1 %v4157_v25  ;;  %v4176_v41 = vsub.f32 %v13197_v61, %v14604_v36  ;;  %v11176_v55 = vld [vmem:[%s11377_s11 + $0x150] sm:$0xff] }
 0x3da   : > { %15403 = vst [vmem:[#allocation45_spill] sm:$0xff] %v13211_v27  ;;  %v13222_v7 = vand.u32 4294901760, %v3709_v57  ;;  %v3647_v49 = vsub.f32 %v11175_v0, %v9110_v50  ;;  %v3474_v62 = vpop.f32.mrb[43].mxu0  ;;  %9225 = vmatmul.mubr.f32.gmra.mrb[34].mxu1 %v4167_v3  ;;  %v14609_v28 = vand.u32 4294901760, %v13211_v27  ;;  %v4187_v61 = vand.u32 4294901760, %v4186_v45 }
 0x3db   : > { %15404 = vst [vmem:[#allocation48_spill] sm:$0xff] %v13217_v18  ;;  %v13226_v22 = vand.u32 4294901760, %v3708_v43  ;;  %v3646_v52 = vsub.f32 %v11176_v55, %v3474_v62  ;;  %v4177_v8 = vand.u32 4294901760, %v4176_v41  ;;  %v14614_v25 = vand.u32 4294901760, %v13217_v18 }
 0x3dc   : > { %15405 = vst [vmem:[#allocation50_spill] sm:$0xff] %v13222_v7  ;;  %v13231_v13 = vsub.f32 %v3709_v57, %v13222_v7  ;;  %v3711_v36 = vmul.f32 %v3647_v49, %v3647_v49  ;;  %v4206_v50 = vsub.f32 %v13211_v27, %v14609_v28  ;;  %v11177_v57 = vld [vmem:[%s11377_s11 + $0x168] sm:$0xff] }
 0x3dd   : > { %15406 = vst [vmem:[#allocation52_spill] sm:$0xff] %v13226_v22  ;;  %v13237_v3 = vsub.f32 %v3708_v43, %v13226_v22  ;;  %v3710_v0 = vmul.f32 %v3646_v52, %v3646_v52  ;;  %v9113_v37 = vpop.f32.mrb[44].mxu0  ;;  %9227 = vmatprep.mubr.f32.mxu1 %v4177_v8  ;;  %v4196_v41 = vsub.f32 %v13217_v18, %v14614_v25  ;;  %v11178_v43 = vld [vmem:[%s11377_s11 + $0x160] sm:$0xff] }
 0x3de   : > { %15407 = vst [vmem:[#allocation55_spill] sm:$0xff] %v13231_v13  ;;  %v13242_v62 = vand.u32 4294901760, %v3711_v36  ;;  %v3649_v55 = vsub.f32 %v11177_v57, %v9113_v37  ;;  %v3486_v49 = vpop.f32.mrb[45].mxu0  ;;  %9228 = vmatmul.mubr.f32.gmra.mrb[36].mxu1 %v4187_v61  ;;  %v14619_v45 = vand.u32 4294901760, %v13231_v13  ;;  %v4207_v18 = vand.u32 4294901760, %v4206_v50 }
 0x3df   : > { %15408 = vst [vmem:[#allocation57_spill] sm:$0xff] %v13237_v3  ;;  %v13246_v28 = vand.u32 4294901760, %v3710_v0  ;;  %v3648_v27 = vsub.f32 %v11178_v43, %v3486_v49  ;;  %v4197_v52 = vand.u32 4294901760, %v4196_v41  ;;  %v14624_v8 = vand.u32 4294901760, %v13237_v3 }
 0x3e0   : > { %15409 = vst [vmem:[#allocation58_spill] sm:$0xff] %v13242_v62  ;;  %v13251_v58 = vsub.f32 %v3711_v36, %v13242_v62  ;;  %v3713_v25 = vmul.f32 %v3649_v55, %v3649_v55  ;;  %v4226_v37 = vsub.f32 %v13231_v13, %v14619_v45  ;;  %v11179_v36 = vld [vmem:[%s11377_s11 + $0x178] sm:$0xff] }
 0x3e1   : > { %15410 = vst [vmem:[#allocation59_spill] sm:$0xff] %v13246_v28  ;;  %v13257_v61 = vsub.f32 %v3710_v0, %v13246_v28  ;;  %v3712_v57 = vmul.f32 %v3648_v27, %v3648_v27  ;;  %v9116_v7 = vpop.f32.mrb[46].mxu0  ;;  %9230 = vmatprep.mubr.f32.mxu1 %v4197_v52  ;;  %v4216_v41 = vsub.f32 %v13237_v3, %v14624_v8  ;;  %v11180_v0 = vld [vmem:[%s11377_s11 + $0x170] sm:$0xff] }
 0x3e2   : > { %15411 = vst [vmem:[#allocation66_spill] sm:$0xff] %v13251_v58  ;;  %v13262_v49 = vand.u32 4294901760, %v3713_v25  ;;  %v3651_v43 = vsub.f32 %v11179_v36, %v9116_v7  ;;  %v3498_v55 = vpop.f32.mrb[47].mxu0  ;;  %9231 = vmatmul.mubr.f32.gmra.mrb[38].mxu1 %v4207_v18  ;;  %v14629_v50 = vand.u32 4294901760, %v13251_v58  ;;  %v4227_v3 = vand.u32 4294901760, %v4226_v37 }
 0x3e3   : > { %15412 = vst [vmem:[#allocation67_spill] sm:$0xff] %v13257_v61  ;;  %v13266_v45 = vand.u32 4294901760, %v3712_v57  ;;  %v3650_v13 = vsub.f32 %v11180_v0, %v3498_v55  ;;  %v4217_v27 = vand.u32 4294901760, %v4216_v41  ;;  %v14634_v52 = vand.u32 4294901760, %v13257_v61 }
 0x3e4   : > { %15413 = vst [vmem:[#allocation68_spill] sm:$0xff] %v13262_v49  ;;  %v13271_v62 = vsub.f32 %v3713_v25, %v13262_v49  ;;  %v3715_v8 = vmul.f32 %v3651_v43, %v3651_v43  ;;  %v4246_v18 = vsub.f32 %v13251_v58, %v14629_v50  ;;  %v11181_v25 = vld [vmem:[%s11377_s11 + $0x188] sm:$0xff] }
 0x3e5   : > { %15414 = vst [vmem:[#allocation72_spill] sm:$0xff] %v13266_v45  ;;  %v13277_v7 = vsub.f32 %v3712_v57, %v13266_v45  ;;  %v3714_v36 = vmul.f32 %v3650_v13, %v3650_v13  ;;  %v9119_v28 = vpop.f32.mrb[48].mxu0  ;;  %9233 = vmatprep.mubr.f32.mxu1 %v4217_v27  ;;  %v4236_v41 = vsub.f32 %v13257_v61, %v14634_v52  ;;  %v11182_v57 = vld [vmem:[%s11377_s11 + $0x180] sm:$0xff] }
 0x3e6   : > { %15415 = vst [vmem:[#allocation73_spill] sm:$0xff] %v13271_v62  ;;  %v13282_v55 = vand.u32 4294901760, %v3715_v8  ;;  %v3653_v0 = vsub.f32 %v11181_v25, %v9119_v28  ;;  %v3510_v43 = vpop.f32.mrb[49].mxu0  ;;  %9234 = vmatmul.mubr.f32.gmra.mrb[40].mxu1 %v4227_v3  ;;  %v14639_v37 = vand.u32 4294901760, %v13271_v62  ;;  %v4247_v61 = vand.u32 4294901760, %v4246_v18 }
 0x3e7   : > { %15416 = vst [vmem:[#allocation76_spill] sm:$0xff] %v13277_v7  ;;  %v13286_v50 = vand.u32 4294901760, %v3714_v36  ;;  %v3652_v58 = vsub.f32 %v11182_v57, %v3510_v43  ;;  %v4237_v13 = vand.u32 4294901760, %v4236_v41  ;;  %v14644_v27 = vand.u32 4294901760, %v13277_v7 }
 0x3e8   : > { %15417 = vst [vmem:[#allocation81_spill] sm:$0xff] %v13282_v55  ;;  %v13291_v49 = vsub.f32 %v3715_v8, %v13282_v55  ;;  %v3717_v52 = vmul.f32 %v3653_v0, %v3653_v0  ;;  %v4266_v28 = vsub.f32 %v13271_v62, %v14639_v37  ;;  %v11183_v8 = vld [vmem:[%s11377_s11 + $0x198] sm:$0xff] }
 0x3e9   : > { %15418 = vst [vmem:[#allocation82_spill] sm:$0xff] %v13286_v50  ;;  %v13297_v3 = vsub.f32 %v3714_v36, %v13286_v50  ;;  %v3716_v25 = vmul.f32 %v3652_v58, %v3652_v58  ;;  %v9122_v45 = vpop.f32.mrb[50].mxu0  ;;  %9236 = vmatprep.mubr.f32.mxu1 %v4237_v13  ;;  %v4256_v41 = vsub.f32 %v13277_v7, %v14644_v27  ;;  %v11184_v36 = vld [vmem:[%s11377_s11 + $0x190] sm:$0xff] }
 0x3ea   : > { %15419 = vst [vmem:[#allocation83_spill] sm:$0xff] %v13291_v49  ;;  %v13302_v43 = vand.u32 4294901760, %v3717_v52  ;;  %v3655_v57 = vsub.f32 %v11183_v8, %v9122_v45  ;;  %v3522_v0 = vpop.f32.mrb[51].mxu0  ;;  %9237 = vmatmul.mubr.f32.gmra.mrb[42].mxu1 %v4247_v61  ;;  %v14649_v18 = vand.u32 4294901760, %v13291_v49  ;;  %v4267_v7 = vand.u32 4294901760, %v4266_v28 }
 0x3eb   : > { %15420 = vst [vmem:[#allocation84_spill] sm:$0xff] %v13297_v3  ;;  %v13306_v37 = vand.u32 4294901760, %v3716_v25  ;;  %v3654_v62 = vsub.f32 %v11184_v36, %v3522_v0  ;;  %v4257_v58 = vand.u32 4294901760, %v4256_v41  ;;  %v14654_v13 = vand.u32 4294901760, %v13297_v3 }
 0x3ec   : > { %15421 = vst [vmem:[#allocation90_spill] sm:$0xff] %v13302_v43  ;;  %v13311_v55 = vsub.f32 %v3717_v52, %v13302_v43  ;;  %v3719_v27 = vmul.f32 %v3655_v57, %v3655_v57  ;;  %v4286_v45 = vsub.f32 %v13291_v49, %v14649_v18  ;;  %v11185_v52 = vld [vmem:[%s11377_s11 + $0x1a8] sm:$0xff] }
 0x3ed   : > { %15422 = vst [vmem:[#allocation93_spill] sm:$0xff] %v13306_v37  ;;  %v13317_v61 = vsub.f32 %v3716_v25, %v13306_v37  ;;  %v3718_v8 = vmul.f32 %v3654_v62, %v3654_v62  ;;  %v9125_v50 = vpop.f32.mrb[52].mxu0  ;;  %9239 = vmatprep.mubr.f32.mxu1 %v4257_v58  ;;  %v4276_v41 = vsub.f32 %v13297_v3, %v14654_v13  ;;  %v11186_v25 = vld [vmem:[%s11377_s11 + $0x1a0] sm:$0xff] }
 0x3ee   : > { %15423 = vst [vmem:[#allocation95_spill] sm:$0xff] %v13311_v55  ;;  %v13322_v0 = vand.u32 4294901760, %v3719_v27  ;;  %v3657_v36 = vsub.f32 %v11185_v52, %v9125_v50  ;;  %v3534_v57 = vpop.f32.mrb[53].mxu0  ;;  %9240 = vmatmul.mubr.f32.gmra.mrb[44].mxu1 %v4267_v7  ;;  %v14659_v28 = vand.u32 4294901760, %v13311_v55  ;;  %v4287_v3 = vand.u32 4294901760, %v4286_v45 }
 0x3ef   : > { %15424 = vst [vmem:[#allocation97_spill] sm:$0xff] %v13317_v61  ;;  %v13326_v18 = vand.u32 4294901760, %v3718_v8  ;;  %v3656_v49 = vsub.f32 %v11186_v25, %v3534_v57  ;;  %v4277_v62 = vand.u32 4294901760, %v4276_v41  ;;  %v14664_v58 = vand.u32 4294901760, %v13317_v61 }
 0x3f0   : > { %15425 = vst [vmem:[#allocation98_spill] sm:$0xff] %v13322_v0  ;;  %v13331_v43 = vsub.f32 %v3719_v27, %v13322_v0  ;;  %v3721_v13 = vmul.f32 %v3657_v36, %v3657_v36  ;;  %v4306_v50 = vsub.f32 %v13311_v55, %v14659_v28  ;;  %v11187_v27 = vld [vmem:[%s11377_s11 + $0x1b8] sm:$0xff] }
 0x3f1   : > { %15426 = vst [vmem:[#allocation99_spill] sm:$0xff] %v13326_v18  ;;  %v13337_v7 = vsub.f32 %v3718_v8, %v13326_v18  ;;  %v3720_v52 = vmul.f32 %v3656_v49, %v3656_v49  ;;  %v9128_v37 = vpop.f32.mrb[54].mxu0  ;;  %9242 = vmatprep.mubr.f32.mxu1 %v4277_v62  ;;  %v4296_v41 = vsub.f32 %v13317_v61, %v14664_v58  ;;  %v11188_v8 = vld [vmem:[%s11377_s11 + $0x1b0] sm:$0xff] }
 0x3f2   : > { %15427 = vst [vmem:[#allocation105_spill] sm:$0xff] %v13331_v43  ;;  %v13342_v57 = vand.u32 4294901760, %v3721_v13  ;;  %v3659_v25 = vsub.f32 %v11187_v27, %v9128_v37  ;;  %v3546_v36 = vpop.f32.mrb[55].mxu0  ;;  %9243 = vmatmul.mubr.f32.gmra.mrb[46].mxu1 %v4287_v3  ;;  %v14669_v45 = vand.u32 4294901760, %v13331_v43  ;;  %v4307_v61 = vand.u32 4294901760, %v4306_v50 }
 0x3f3   : > { %15428 = vst [vmem:[#allocation106_spill] sm:$0xff] %v13337_v7  ;;  %v13346_v28 = vand.u32 4294901760, %v3720_v52  ;;  %v3658_v55 = vsub.f32 %v11188_v8, %v3546_v36  ;;  %v4297_v49 = vand.u32 4294901760, %v4296_v41  ;;  %v14674_v62 = vand.u32 4294901760, %v13337_v7 }
 0x3f4   : > { %15429 = vst [vmem:[#allocation108_spill] sm:$0xff] %v13342_v57  ;;  %v13351_v0 = vsub.f32 %v3721_v13, %v13342_v57  ;;  %v3723_v58 = vmul.f32 %v3659_v25, %v3659_v25  ;;  %v4326_v37 = vsub.f32 %v13331_v43, %v14669_v45  ;;  %v11189_v13 = vld [vmem:[%s11377_s11 + $0x1c8] sm:$0xff] }
 0x3f5   : > { %15430 = vst [vmem:[#allocation110_spill] sm:$0xff] %v13346_v28  ;;  %v13357_v3 = vsub.f32 %v3720_v52, %v13346_v28  ;;  %v3722_v27 = vmul.f32 %v3658_v55, %v3658_v55  ;;  %v9131_v18 = vpop.f32.mrb[56].mxu0  ;;  %9245 = vmatprep.mubr.f32.mxu1 %v4297_v49  ;;  %v4316_v41 = vsub.f32 %v13337_v7, %v14674_v62  ;;  %v11190_v52 = vld [vmem:[%s11377_s11 + $0x1c0] sm:$0xff] }
 0x3f6   : > { %15431 = vst [vmem:[#allocation111_spill] sm:$0xff] %v13351_v0  ;;  %v13362_v36 = vand.u32 4294901760, %v3723_v58  ;;  %v3661_v8 = vsub.f32 %v11189_v13, %v9131_v18  ;;  %v3558_v25 = vpop.f32.mrb[57].mxu0  ;;  %9246 = vmatmul.mubr.f32.gmra.mrb[48].mxu1 %v4307_v61  ;;  %v14679_v50 = vand.u32 4294901760, %v13351_v0  ;;  %v4327_v7 = vand.u32 4294901760, %v4326_v37 }
 0x3f7   : > { %15432 = vst [vmem:[#allocation112_spill] sm:$0xff] %v13357_v3  ;;  %v13366_v45 = vand.u32 4294901760, %v3722_v27  ;;  %v3660_v43 = vsub.f32 %v11190_v52, %v3558_v25  ;;  %v4317_v55 = vand.u32 4294901760, %v4316_v41  ;;  %v14684_v49 = vand.u32 4294901760, %v13357_v3 }
 0x3f8   : > { %15433 = vst [vmem:[#allocation120_spill] sm:$0xff] %v13362_v36  ;;  %v13371_v57 = vsub.f32 %v3723_v58, %v13362_v36  ;;  %v3725_v62 = vmul.f32 %v3661_v8, %v3661_v8  ;;  %v4346_v18 = vsub.f32 %v13351_v0, %v14679_v50  ;;  %v11191_v58 = vld [vmem:[%s11377_s11 + $0x1d8] sm:$0xff] }
 0x3f9   : > { %15434 = vst [vmem:[#allocation122_spill] sm:$0xff] %v13366_v45  ;;  %v13377_v61 = vsub.f32 %v3722_v27, %v13366_v45  ;;  %v3724_v13 = vmul.f32 %v3660_v43, %v3660_v43  ;;  %v9134_v28 = vpop.f32.mrb[58].mxu0  ;;  %9248 = vmatprep.mubr.f32.mxu1 %v4317_v55  ;;  %v4336_v41 = vsub.f32 %v13357_v3, %v14684_v49  ;;  %v11192_v27 = vld [vmem:[%s11377_s11 + $0x1d0] sm:$0xff] }
 0x3fa   : > { %15435 = vst [vmem:[#allocation124_spill] sm:$0xff] %v13371_v57  ;;  %v13382_v25 = vand.u32 4294901760, %v3725_v62  ;;  %v3663_v52 = vsub.f32 %v11191_v58, %v9134_v28  ;;  %v3570_v8 = vpop.f32.mrb[59].mxu0  ;;  %9249 = vmatmul.mubr.f32.gmra.mrb[50].mxu1 %v4327_v7  ;;  %v14689_v37 = vand.u32 4294901760, %v13371_v57  ;;  %v4347_v3 = vand.u32 4294901760, %v4346_v18 }
 0x3fb   : > { %15436 = vst [vmem:[#allocation126_spill] sm:$0xff] %v13377_v61  ;;  %v13386_v50 = vand.u32 4294901760, %v3724_v13  ;;  %v3662_v0 = vsub.f32 %v11192_v27, %v3570_v8  ;;  %v4337_v43 = vand.u32 4294901760, %v4336_v41  ;;  %v14694_v55 = vand.u32 4294901760, %v13377_v61 }
 0x3fc   : > { %15437 = vst [vmem:[#allocation128_spill] sm:$0xff] %v13382_v25  ;;  %v13391_v36 = vsub.f32 %v3725_v62, %v13382_v25  ;;  %v3727_v49 = vmul.f32 %v3663_v52, %v3663_v52  ;;  %v4366_v28 = vsub.f32 %v13371_v57, %v14689_v37  ;;  %v11193_v62 = vld [vmem:[%s11377_s11 + $0x1e8] sm:$0xff] }
 0x3fd   : > { %15438 = vst [vmem:[#allocation130_spill] sm:$0xff] %v13386_v50  ;;  %v13397_v7 = vsub.f32 %v3724_v13, %v13386_v50  ;;  %v3726_v58 = vmul.f32 %v3662_v0, %v3662_v0  ;;  %v9137_v45 = vpop.f32.mrb[60].mxu0  ;;  %9251 = vmatprep.mubr.f32.mxu1 %v4337_v43  ;;  %v4356_v41 = vsub.f32 %v13377_v61, %v14694_v55  ;;  %v11194_v13 = vld [vmem:[%s11377_s11 + $0x1e0] sm:$0xff] }
 0x3fe   : > { %15439 = vst [vmem:[#allocation131_spill] sm:$0xff] %v13391_v36  ;;  %v13402_v8 = vand.u32 4294901760, %v3727_v49  ;;  %v3665_v27 = vsub.f32 %v11193_v62, %v9137_v45  ;;  %v3582_v52 = vpop.f32.mrb[61].mxu0  ;;  %9252 = vmatmul.mubr.f32.gmra.mrb[52].mxu1 %v4347_v3  ;;  %v14701_v18 = vand.u32 4294901760, %v13391_v36  ;;  %v4367_v61 = vand.u32 4294901760, %v4366_v28 }
 0x3ff   : > { %v13406_v37 = vand.u32 4294901760, %v3726_v58  ;;  %v3664_v57 = vsub.f32 %v11194_v13, %v3582_v52  ;;  %v4357_v0 = vand.u32 4294901760, %v4356_v41  ;;  %v14706_v43 = vand.u32 4294901760, %v13397_v7 }
 0x400   : > { %15440 = vst [vmem:[#allocation135_spill] sm:$0xff] %v13402_v8  ;;  %v13411_v25 = vsub.f32 %v3727_v49, %v13402_v8  ;;  %v3729_v55 = vmul.f32 %v3665_v27, %v3665_v27  ;;  %v4386_v45 = vsub.f32 %v13391_v36, %v14701_v18  ;;  %v11195_v49 = vld [vmem:[%s11377_s11 + $0x1f8] sm:$0xff]  ;;  %v11196_v18 = vld [vmem:[%s11377_s11 + $0x1f0] sm:$0xff] }
 0x401   : > { %15441 = vst [vmem:[#allocation137_spill] sm:$0xff] %v13406_v37  ;;  %v13417_v3 = vsub.f32 %v3726_v58, %v13406_v37  ;;  %v3728_v62 = vmul.f32 %v3664_v57, %v3664_v57  ;;  %v9140_v50 = vpop.f32.mrb[62].mxu0  ;;  %9254 = vmatprep.mubr.f32.mxu1 %v4357_v0  ;;  %v4376_v41 = vsub.f32 %v13397_v7, %v14706_v43 }
 0x402   : > { %15442 = vst [vmem:[#allocation138_spill] sm:$0xff] %v13411_v25  ;;  %v13422_v52 = vand.u32 4294901760, %v3729_v55  ;;  %v3667_v13 = vsub.f32 %v11195_v49, %v9140_v50  ;;  %v3594_v27 = vpop.f32.mrb[63].mxu0  ;;  %9255 = vmatmul.mubr.f32.gmra.mrb[54].mxu1 %v4367_v61  ;;  %v14707_v28 = vand.u32 4294901760, %v13411_v25  ;;  %v4387_v43 = vand.u32 4294901760, %v4386_v45 }
 0x403   : > { %v13426_v8 = vand.u32 4294901760, %v3728_v62  ;;  %v3666_v58 = vsub.f32 %v11196_v18, %v3594_v27  ;;  %v4377_v36 = vand.u32 4294901760, %v4376_v41  ;;  %v14708_v57 = vand.u32 4294901760, %v13417_v3 }
 0x404   : > { %15443 = vst [vmem:[#allocation141_spill] sm:$0xff] %v13422_v52  ;;  %v13431_v0 = vsub.f32 %v3729_v55, %v13422_v52  ;;  %v3731_v37 = vmul.f32 %v3667_v13, %v3667_v13  ;;  %v4406_v50 = vsub.f32 %v13411_v25, %v14707_v28 }
 0x405   : > { %15444 = vst [vmem:[#allocation143_spill] sm:$0xff] %v13426_v8  ;;  %v13437_v61 = vsub.f32 %v3728_v62, %v13426_v8  ;;  %v3730_v49 = vmul.f32 %v3666_v58, %v3666_v58  ;;  %9257 = vmatprep.mubr.f32.mxu1 %v4377_v36  ;;  %v4396_v18 = vsub.f32 %v13417_v3, %v14708_v57 }
 0x406   : > { %v13442_v41 = vand.u32 4294901760, %v3731_v37  ;;  %9258 = vmatmul.mubr.f32.gmra.mrb[56].mxu1 %v4387_v43  ;;  %v14711_v55 = vand.u32 4294901760, %v13431_v0  ;;  %v4407_v62 = vand.u32 4294901760, %v4406_v50 }
 0x407   : > { %15445 = vst [vmem:[#allocation145_spill] sm:$0xff] %v13437_v61  ;;  %v13445_v13 = vand.u32 4294901760, %v3730_v49  ;;  %v4397_v45 = vand.u32 4294901760, %v4396_v18  ;;  %v14714_v27 = vand.u32 4294901760, %v13437_v61 }
 0x408   : > { %15446 = vst [vmem:[#allocation147_spill] sm:$0xff] %v13442_v41  ;;  %v13449_v28 = vsub.f32 %v3731_v37, %v13442_v41  ;;  %v4426_v36 = vsub.f32 %v13431_v0, %v14711_v55 }
 0x409   : > { %15447 = vst [vmem:[#allocation149_spill] sm:$0xff] %v13445_v13  ;;  %v13455_v58 = vsub.f32 %v3730_v49, %v13445_v13  ;;  %9260 = vmatprep.mubr.f32.mxu1 %v4397_v45  ;;  %v4416_v43 = vsub.f32 %v13437_v61, %v14714_v27  ;;  %v15468_v27 = vld [vmem:[#allocation110_spill] sm:$0xff] }
 0x40a   : > { %9261 = vmatmul.mubr.f32.gmra.mrb[58].mxu1 %v4407_v62  ;;  %v14712_v18 = vand.u32 4294901760, %v13449_v28  ;;  %v4427_v25 = vand.u32 4294901760, %v4426_v36  ;;  %v15449_v62 = vld [vmem:[#allocation159_spill] sm:$0xff]  ;;  %v15454_v36 = vld [vmem:[#allocation150_spill] sm:$0xff] }
 0x40b   : > { %15448 = vst [vmem:[#allocation152_spill] sm:$0xff] %v13455_v58  ;;  %v4417_v57 = vand.u32 4294901760, %v4416_v43  ;;  %v14713_v37 = vand.u32 4294901760, %v13455_v58  ;;  %v15455_v43 = vld [vmem:[#allocation158_spill] sm:$0xff] }
 0x40c   : > { %v4446_v50 = vsub.f32 %v13449_v28, %v14712_v18  ;;  %v15466_v18 = vld [vmem:[#allocation99_spill] sm:$0xff] }
 0x40d   : > { %9263 = vmatprep.mubr.f32.mxu1 %v4417_v57  ;;  %v4436_v49 = vsub.f32 %v13455_v58, %v14713_v37  ;;  %v15451_v57 = vld [vmem:[#allocation119_spill] sm:$0xff]  ;;  %v15467_v37 = vld [vmem:[#allocation98_spill] sm:$0xff] }
 0x40e   : > { %9264 = vmatmul.mubr.f32.gmra.mrb[60].mxu1 %v4427_v25  ;;  %v4447_v55 = vand.u32 4294901760, %v4446_v50  ;;  %v15450_v25 = vld [vmem:[#allocation160_spill] sm:$0xff]  ;;  %v15456_v50 = vld [vmem:[#allocation2_spill] sm:$0xff] }
 0x40f   : > { %v4437_v45 = vand.u32 4294901760, %v4436_v49  ;;  %v15457_v49 = vld [vmem:[#allocation50_spill] sm:$0xff] }
 0x411   : > { %9266 = vmatprep.mubr.f32.mxu1 %v4437_v45  ;;  %v15458_v45 = vld [vmem:[#allocation59_spill] sm:$0xff] }
 0x412   : > { %9267 = vmatmul.mubr.f32.gmra.mrb[62].mxu1 %v4447_v55  ;;  %v15453_v55 = vld [vmem:[#allocation133_spill] sm:$0xff] }
 0x413   : > { %9301 = vmatprep.mubr.f32.mxu1 %v12817_v20  ;;  %v15539_v20 = vld [vmem:[#allocation124_spill] sm:$0xff] }
 0x416   : > { %9302 = vmatmul.mubr.f32.vlgmr.msra.gmra.mrb[0].mxu1 %v12814_v17  ;;  %v15538_v17 = vld [vmem:[#allocation126_spill] sm:$0xff] }
 0x417   : > { %9304 = vmatprep.mubr.f32.mxu1 %v12830_v51  ;;  %10168 = vmatpush3.bf16.msra.mxu1 %v15367_v4  ;;  %v15452_v4 = vld [vmem:[#allocation121_spill] sm:$0xff]  ;;  %v15537_v51 = vld [vmem:[#allocation111_spill] sm:$0xff] }
 0x418   : > { %10170 = vmatprep.subr.bf16.mxu1 %v15449_v62 }
 0x41a   : > { %9305 = vmatmul.mubr.f32.gmra.mrb[2].mxu1 %v12826_v23  ;;  %v15535_v23 = vld [vmem:[#allocation105_spill] sm:$0xff] }
 0x41b   : > { %9307 = vmatprep.mubr.f32.mxu1 %v12850_v24  ;;  %10172 = vmatpush3.bf16.msra.mxu1 %v15449_v62  ;;  %v15459_v62 = vld [vmem:[#allocation58_spill] sm:$0xff] }
 0x41c   : > { %10174 = vmatprep.subr.bf16.mxu1 %v15450_v25  ;;  %v15534_v24 = vld [vmem:[#allocation106_spill] sm:$0xff] }
 0x41e   : > { %9308 = vmatmul.mubr.f32.gmra.mrb[4].mxu1 %v12846_v63  ;;  %v15532_v63 = vld [vmem:[#allocation97_spill] sm:$0xff] }
 0x41f   : > { %9310 = vmatprep.mubr.f32.mxu1 %v12870_v32  ;;  %10176 = vmatpush3.bf16.msra.mxu1 %v15450_v25  ;;  %v15460_v25 = vld [vmem:[#allocation72_spill] sm:$0xff]  ;;  %v15531_v32 = vld [vmem:[#allocation83_spill] sm:$0xff] }
 0x420   : > { %10178 = vmatprep.subr.bf16.mxu1 %v15451_v57 }
 0x422   : > { %9311 = vmatmul.mubr.f32.gmra.mrb[6].mxu1 %v12866_v33  ;;  %v15529_v33 = vld [vmem:[#allocation73_spill] sm:$0xff] }
 0x423   : > { %9313 = vmatprep.mubr.f32.mxu1 %v12892_v19  ;;  %10180 = vmatpush3.bf16.msra.mxu1 %v15451_v57  ;;  %v15461_v57 = vld [vmem:[#allocation68_spill] sm:$0xff] }
 0x424   : > { %10182 = vmatprep.subr.bf16.mxu1 %v15452_v4  ;;  %v15528_v19 = vld [vmem:[#allocation76_spill] sm:$0xff] }
 0x426   : > { %9314 = vmatmul.mubr.f32.gmra.mrb[8].mxu1 %v12888_v30  ;;  %v15526_v30 = vld [vmem:[#allocation67_spill] sm:$0xff] }
 0x427   : > { %9316 = vmatprep.mubr.f32.mxu1 %v12914_v9  ;;  %10184 = vmatpush3.bf16.msra.mxu1 %v15452_v4  ;;  %v15462_v4 = vld [vmem:[#allocation82_spill] sm:$0xff]  ;;  %v15525_v9 = vld [vmem:[#allocation55_spill] sm:$0xff] }
 0x428   : > { %10186 = vmatprep.subr.bf16.mxu1 %v15453_v55 }
 0x42a   : > { %9317 = vmatmul.mubr.f32.gmra.mrb[10].mxu1 %v12910_v53  ;;  %v15523_v53 = vld [vmem:[#allocation45_spill] sm:$0xff] }
 0x42b   : > { %9319 = vmatprep.mubr.f32.mxu1 %v12936_v10  ;;  %10188 = vmatpush3.bf16.msra.mxu1 %v15453_v55  ;;  %v15463_v55 = vld [vmem:[#allocation81_spill] sm:$0xff]  ;;  %v15522_v10 = vld [vmem:[#allocation48_spill] sm:$0xff] }
 0x42c   : > { %10190 = vmatprep.subr.bf16.mxu1 %v15454_v36 }
 0x42e   : > { %9320 = vmatmul.mubr.f32.gmra.mrb[12].mxu1 %v12932_v42  ;;  %v15520_v42 = vld [vmem:[#allocation37_spill] sm:$0xff] }
 0x42f   : > { %9322 = vmatprep.mubr.f32.mxu1 %v12958_v60  ;;  %10192 = vmatpush3.bf16.msra.mxu1 %v15454_v36  ;;  %v15464_v36 = vld [vmem:[#allocation93_spill] sm:$0xff]  ;;  %v15519_v60 = vld [vmem:[#allocation24_spill] sm:$0xff] }
 0x430   : > { %10194 = vmatprep.subr.bf16.mxu1 %v15455_v43 }
 0x432   : > { %9323 = vmatmul.mubr.f32.gmra.mrb[14].mxu1 %v12954_v15  ;;  %v15517_v15 = vld [vmem:[#allocation15_spill] sm:$0xff] }
 0x433   : > { %9325 = vmatprep.mubr.f32.mxu1 %v12980_v46  ;;  %10196 = vmatpush3.bf16.msra.mxu1 %v15455_v43  ;;  %v15465_v43 = vld [vmem:[#allocation90_spill] sm:$0xff]  ;;  %v15516_v46 = vld [vmem:[#allocation16_spill] sm:$0xff] }
 0x434   : > { %10198 = vmatprep.subr.bf16.mxu1 %v15456_v50 }
 0x436   : > { %9326 = vmatmul.mubr.f32.gmra.mrb[16].mxu1 %v12976_v34  ;;  %v15515_v34 = vld [vmem:[#allocation157_spill] sm:$0xff] }
 0x437   : > { %9328 = vmatprep.mubr.f32.mxu1 %v13002_v31  ;;  %v15514_v31 = vld [vmem:[#allocation6_spill] sm:$0xff] }
 0x43a   : > { %9329 = vmatmul.mubr.f32.gmra.mrb[18].mxu1 %v12998_v47  ;;  %v15513_v47 = vld [vmem:[#allocation146_spill] sm:$0xff] }
 0x43b   : > { %9331 = vmatprep.mubr.f32.mxu1 %v13024_v59  ;;  %v15512_v59 = vld [vmem:[#allocation148_spill] sm:$0xff] }
 0x43e   : > { %9332 = vmatmul.mubr.f32.gmra.mrb[20].mxu1 %v13020_v12  ;;  %v15511_v12 = vld [vmem:[#allocation123_spill] sm:$0xff] }
 0x43f   : > { %9334 = vmatprep.mubr.f32.mxu1 %v13046_v21  ;;  %v15510_v21 = vld [vmem:[#allocation125_spill] sm:$0xff] }
 0x442   : > { %9335 = vmatmul.mubr.f32.gmra.mrb[22].mxu1 %v13042_v48  ;;  %v15509_v48 = vld [vmem:[#allocation113_spill] sm:$0xff] }
 0x443   : > { %9337 = vmatprep.mubr.f32.mxu1 %v13066_v1  ;;  %v15508_v1 = vld [vmem:[#allocation116_spill] sm:$0xff] }
 0x446   : > { %9338 = vmatmul.mubr.f32.gmra.mrb[24].mxu1 %v13062_v14  ;;  %v15507_v14 = vld [vmem:[#allocation91_spill] sm:$0xff] }
 0x447   : > { %9340 = vmatprep.mubr.f32.mxu1 %v13086_v29  ;;  %v15506_v29 = vld [vmem:[#allocation92_spill] sm:$0xff] }
 0x44a   : > { %9341 = vmatmul.mubr.f32.gmra.mrb[26].mxu1 %v13082_v35  ;;  %v15505_v35 = vld [vmem:[#allocation60_spill] sm:$0xff] }
 0x44b   : > { %9343 = vmatprep.mubr.f32.mxu1 %v13106_v40  ;;  %v15504_v40 = vld [vmem:[#allocation62_spill] sm:$0xff] }
 0x44e   : > { %9344 = vmatmul.mubr.f32.gmra.mrb[28].mxu1 %v13102_v38  ;;  %v15503_v38 = vld [vmem:[#allocation139_spill] sm:$0xff] }
 0x44f   : > { %9346 = vmatprep.mubr.f32.mxu1 %v13126_v54  ;;  %v15502_v54 = vld [vmem:[#allocation140_spill] sm:$0xff] }
 0x452   : > { %9347 = vmatmul.mubr.f32.gmra.mrb[30].mxu1 %v13122_v56  ;;  %v15501_v56 = vld [vmem:[#allocation129_spill] sm:$0xff] }
 0x453   : > { %9349 = vmatprep.mubr.f32.mxu1 %v13146_v2  ;;  %v15500_v2 = vld [vmem:[#allocation7_spill] sm:$0xff] }
 0x456   : > { %9350 = vmatmul.mubr.f32.gmra.mrb[32].mxu1 %v13142_v16  ;;  %v15499_v16 = vld [vmem:[#allocation132_spill] sm:$0xff] }
 0x457   : > { %9352 = vmatprep.mubr.f32.mxu1 %v13166_v26  ;;  %v15498_v26 = vld [vmem:[#allocation102_spill] sm:$0xff] }
 0x45a   : > { %9353 = vmatmul.mubr.f32.gmra.mrb[34].mxu1 %v13162_v39  ;;  %v15497_v39 = vld [vmem:[#allocation22_spill] sm:$0xff] }
 0x45b   : > { %9355 = vmatprep.mubr.f32.mxu1 %v13186_v5  ;;  %v15496_v5 = vld [vmem:[#allocation103_spill] sm:$0xff] }
 0x45e   : > { %9356 = vmatmul.mubr.f32.gmra.mrb[36].mxu1 %v13182_v44  ;;  %v15495_v44 = vld [vmem:[#allocation89_spill] sm:$0xff] }
 0x45f   : > { %9358 = vmatprep.mubr.f32.mxu1 %v13206_v11  ;;  %v15494_v11 = vld [vmem:[#allocation18_spill] sm:$0xff] }
 0x462   : > { %9359 = vmatmul.mubr.f32.gmra.mrb[38].mxu1 %v13202_v6  ;;  %v15493_v6 = vld [vmem:[#allocation94_spill] sm:$0xff] }
 0x463   : > { %9361 = vmatprep.mubr.f32.mxu1 %v13226_v22  ;;  %v15492_v22 = vld [vmem:[#allocation80_spill] sm:$0xff] }
 0x466   : > { %9362 = vmatmul.mubr.f32.gmra.mrb[40].mxu1 %v15457_v49  ;;  %v15491_v49 = vld [vmem:[#allocation12_spill] sm:$0xff] }
 0x467   : > { %9364 = vmatprep.mubr.f32.mxu1 %v15458_v45  ;;  %v15469_v45 = vld [vmem:[#allocation108_spill] sm:$0xff] }
 0x46a   : > { %9365 = vmatmul.mubr.f32.gmra.mrb[42].mxu1 %v15459_v62  ;;  %v15470_v62 = vld [vmem:[#allocation122_spill] sm:$0xff] }
 0x46b   : > { %9367 = vmatprep.mubr.f32.mxu1 %v15460_v25  ;;  %v15471_v25 = vld [vmem:[#allocation120_spill] sm:$0xff] }
 0x46e   : > { %9368 = vmatmul.mubr.f32.gmra.mrb[44].mxu1 %v15461_v57  ;;  %v15472_v57 = vld [vmem:[#allocation130_spill] sm:$0xff] }
 0x46f   : > { %9370 = vmatprep.mubr.f32.mxu1 %v15462_v4  ;;  %v15473_v4 = vld [vmem:[#allocation128_spill] sm:$0xff] }
 0x472   : > { %9371 = vmatmul.mubr.f32.gmra.mrb[46].mxu1 %v15463_v55  ;;  %v15474_v55 = vld [vmem:[#allocation137_spill] sm:$0xff] }
 0x473   : > { %9373 = vmatprep.mubr.f32.mxu1 %v15464_v36  ;;  %v15475_v36 = vld [vmem:[#allocation135_spill] sm:$0xff] }
 0x476   : > { %9374 = vmatmul.mubr.f32.gmra.mrb[48].mxu1 %v15465_v43  ;;  %v15490_v43 = vld [vmem:[#allocation85_spill] sm:$0xff] }
 0x477   : > { %9376 = vmatprep.mubr.f32.mxu1 %v15466_v18  ;;  %v15489_v18 = vld [vmem:[#allocation70_spill] sm:$0xff] }
 0x47a   : > { %9377 = vmatmul.mubr.f32.gmra.mrb[50].mxu1 %v15467_v37  ;;  %v15488_v37 = vld [vmem:[#allocation9_spill] sm:$0xff] }
 0x47b   : > { %9379 = vmatprep.mubr.f32.mxu1 %v15468_v27  ;;  %v15487_v27 = vld [vmem:[#allocation74_spill] sm:$0xff] }
 0x47e   : > { %9380 = vmatmul.mubr.f32.gmra.mrb[52].mxu1 %v15469_v45  ;;  %v15476_v45 = vld [vmem:[#allocation39_spill] sm:$0xff] }
 0x47f   : > { %9382 = vmatprep.mubr.f32.mxu1 %v15470_v62  ;;  %v15477_v62 = vld [vmem:[#allocation36_spill] sm:$0xff] }
 0x482   : > { %9383 = vmatmul.mubr.f32.gmra.mrb[54].mxu1 %v15471_v25  ;;  %v15478_v25 = vld [vmem:[#allocation8_spill] sm:$0xff] }
 0x483   : > { %9385 = vmatprep.mubr.f32.mxu1 %v15472_v57  ;;  %v15486_v57 = vld [vmem:[#allocation63_spill] sm:$0xff] }
 0x486   : > { %9386 = vmatmul.mubr.f32.gmra.mrb[56].mxu1 %v15473_v4  ;;  %v15479_v4 = vld [vmem:[#allocation3_spill] sm:$0xff] }
 0x487   : > { %9388 = vmatprep.mubr.f32.mxu1 %v15474_v55  ;;  %v15480_v55 = vld [vmem:[#allocation47_spill] sm:$0xff] }
 0x48a   : > { %9389 = vmatmul.mubr.f32.gmra.mrb[58].mxu1 %v15475_v36  ;;  %v15481_v36 = vld [vmem:[#allocation54_spill] sm:$0xff] }
 0x48b   : > { %9391 = vmatprep.mubr.f32.mxu1 %v13426_v8  ;;  %v15485_v8 = vld [vmem:[#allocation5_spill] sm:$0xff] }
 0x48e   : > { %9392 = vmatmul.mubr.f32.gmra.mrb[60].mxu1 %v13422_v52  ;;  %v15482_v52 = vld [vmem:[#allocation4_spill] sm:$0xff] }
 0x48f   : > { %9394 = vmatprep.mubr.f32.mxu1 %v13445_v13  ;;  %v15483_v13 = vld [vmem:[#allocation51_spill] sm:$0xff] }
 0x492   : > { %9395 = vmatmul.mubr.f32.gmra.mrb[62].mxu1 %v13442_v41  ;;  %v15484_v41 = vld [vmem:[#allocation64_spill] sm:$0xff] }
 0x493   : > { %9429 = vmatprep.mubr.f32.mxu1 %v15476_v45 }
 0x496   : > { %9430 = vmatmul.mubr.f32.vlgmr.msra.gmra.mrb[0].mxu1 %v15477_v62 }
 0x497   : > { %9432 = vmatprep.mubr.f32.mxu1 %v15478_v25  ;;  %10200 = vmatpush3.bf16.msra.mxu1 %v15456_v50 }
 0x498   : > { %10202 = vmatprep.subr.bf16.mxu1 %v15479_v4 }
 0x49a   : > { %9433 = vmatmul.mubr.f32.gmra.mrb[2].mxu1 %v15480_v55 }
 0x49b   : > { %9435 = vmatprep.mubr.f32.mxu1 %v15481_v36  ;;  %10204 = vmatpush3.bf16.msra.mxu1 %v15479_v4  ;;  %v15536_v4 = vld [vmem:[#allocation112_spill] sm:$0xff] }
 0x49c   : > { %10206 = vmatprep.subr.bf16.mxu1 %v15482_v52 }
 0x49e   : > { %9436 = vmatmul.mubr.f32.gmra.mrb[4].mxu1 %v15483_v13 }
 0x49f   : > { %9438 = vmatprep.mubr.f32.mxu1 %v15484_v41  ;;  %10208 = vmatpush3.bf16.msra.mxu1 %v15482_v52  ;;  %v15533_v52 = vld [vmem:[#allocation95_spill] sm:$0xff] }
 0x4a0   : > { %10210 = vmatprep.subr.bf16.mxu1 %v15485_v8 }
 0x4a2   : > { %9439 = vmatmul.mubr.f32.gmra.mrb[6].mxu1 %v15486_v57 }
 0x4a3   : > { %9441 = vmatprep.mubr.f32.mxu1 %v15487_v27  ;;  %10212 = vmatpush3.bf16.msra.mxu1 %v15485_v8  ;;  %v15530_v8 = vld [vmem:[#allocation84_spill] sm:$0xff] }
 0x4a4   : > { %10214 = vmatprep.subr.bf16.mxu1 %v15488_v37 }
 0x4a6   : > { %9442 = vmatmul.mubr.f32.gmra.mrb[8].mxu1 %v15489_v18 }
 0x4a7   : > { %9444 = vmatprep.mubr.f32.mxu1 %v15490_v43  ;;  %10216 = vmatpush3.bf16.msra.mxu1 %v15488_v37  ;;  %v15527_v37 = vld [vmem:[#allocation66_spill] sm:$0xff] }
 0x4a8   : > { %10218 = vmatprep.subr.bf16.mxu1 %v15491_v49 }
 0x4aa   : > { %9445 = vmatmul.mubr.f32.gmra.mrb[10].mxu1 %v15492_v22 }
 0x4ab   : > { %9447 = vmatprep.mubr.f32.mxu1 %v15493_v6  ;;  %10220 = vmatpush3.bf16.msra.mxu1 %v15491_v49  ;;  %v15524_v49 = vld [vmem:[#allocation57_spill] sm:$0xff] }
 0x4ac   : > { %10222 = vmatprep.subr.bf16.mxu1 %v15494_v11 }
 0x4ae   : > { %9448 = vmatmul.mubr.f32.gmra.mrb[12].mxu1 %v15495_v44 }
 0x4af   : > { %9450 = vmatprep.mubr.f32.mxu1 %v15496_v5  ;;  %10224 = vmatpush3.bf16.msra.mxu1 %v15494_v11  ;;  %v15521_v11 = vld [vmem:[#allocation35_spill] sm:$0xff] }
 0x4b0   : > { %10226 = vmatprep.subr.bf16.mxu1 %v15497_v39 }
 0x4b2   : > { %9451 = vmatmul.mubr.f32.gmra.mrb[14].mxu1 %v15498_v26 }
 0x4b3   : > { %9453 = vmatprep.mubr.f32.mxu1 %v15499_v16  ;;  %10228 = vmatpush3.bf16.msra.mxu1 %v15497_v39  ;;  %v15518_v39 = vld [vmem:[#allocation27_spill] sm:$0xff] }
 0x4b4   : > { %10230 = vmatprep.subr.bf16.mxu1 %v15500_v2 }
 0x4b6   : > { %9454 = vmatmul.mubr.f32.gmra.mrb[16].mxu1 %v15501_v56 }
 0x4b7   : > { %9456 = vmatprep.mubr.f32.mxu1 %v15502_v54 }
 0x4ba   : > { %9457 = vmatmul.mubr.f32.gmra.mrb[18].mxu1 %v15503_v38 }
 0x4bb   : > { %9459 = vmatprep.mubr.f32.mxu1 %v15504_v40 }
 0x4be   : > { %9460 = vmatmul.mubr.f32.gmra.mrb[20].mxu1 %v15505_v35 }
 0x4bf   : > { %9462 = vmatprep.mubr.f32.mxu1 %v15506_v29 }
 0x4c2   : > { %9463 = vmatmul.mubr.f32.gmra.mrb[22].mxu1 %v15507_v14 }
 0x4c3   : > { %9465 = vmatprep.mubr.f32.mxu1 %v15508_v1 }
 0x4c6   : > { %9466 = vmatmul.mubr.f32.gmra.mrb[24].mxu1 %v15509_v48 }
 0x4c7   : > { %9468 = vmatprep.mubr.f32.mxu1 %v15510_v21 }
 0x4ca   : > { %9469 = vmatmul.mubr.f32.gmra.mrb[26].mxu1 %v15511_v12 }
 0x4cb   : > { %9471 = vmatprep.mubr.f32.mxu1 %v15512_v59 }
 0x4ce   : > { %9472 = vmatmul.mubr.f32.gmra.mrb[28].mxu1 %v15513_v47 }
 0x4cf   : > { %9474 = vmatprep.mubr.f32.mxu1 %v15514_v31 }
 0x4d2   : > { %9475 = vmatmul.mubr.f32.gmra.mrb[30].mxu1 %v15515_v34 }
 0x4d3   : > { %9477 = vmatprep.mubr.f32.mxu1 %v15516_v46 }
 0x4d6   : > { %9478 = vmatmul.mubr.f32.gmra.mrb[32].mxu1 %v15517_v15 }
 0x4d7   : > { %9480 = vmatprep.mubr.f32.mxu1 %v15518_v39 }
 0x4da   : > { %9481 = vmatmul.mubr.f32.gmra.mrb[34].mxu1 %v15519_v60 }
 0x4db   : > { %9483 = vmatprep.mubr.f32.mxu1 %v15520_v42 }
 0x4de   : > { %9484 = vmatmul.mubr.f32.gmra.mrb[36].mxu1 %v15521_v11 }
 0x4df   : > { %9486 = vmatprep.mubr.f32.mxu1 %v15522_v10 }
 0x4e2   : > { %9487 = vmatmul.mubr.f32.gmra.mrb[38].mxu1 %v15523_v53 }
 0x4e3   : > { %9489 = vmatprep.mubr.f32.mxu1 %v15524_v49 }
 0x4e6   : > { %9490 = vmatmul.mubr.f32.gmra.mrb[40].mxu1 %v15525_v9 }
 0x4e7   : > { %9492 = vmatprep.mubr.f32.mxu1 %v15526_v30 }
 0x4ea   : > { %9493 = vmatmul.mubr.f32.gmra.mrb[42].mxu1 %v15527_v37 }
 0x4eb   : > { %9495 = vmatprep.mubr.f32.mxu1 %v15528_v19 }
 0x4ee   : > { %9496 = vmatmul.mubr.f32.gmra.mrb[44].mxu1 %v15529_v33 }
 0x4ef   : > { %9498 = vmatprep.mubr.f32.mxu1 %v15530_v8  ;;  %v15540_v8 = vld [vmem:[#allocation131_spill] sm:$0xff] }
 0x4f2   : > { %9499 = vmatmul.mubr.f32.gmra.mrb[46].mxu1 %v15531_v32 }
 0x4f3   : > { %9501 = vmatprep.mubr.f32.mxu1 %v15532_v63  ;;  %v15541_v63 = vld [vmem:[#allocation138_spill] sm:$0xff] }
 0x4f6   : > { %9502 = vmatmul.mubr.f32.gmra.mrb[48].mxu1 %v15533_v52 }
 0x4f7   : > { %9504 = vmatprep.mubr.f32.mxu1 %v15534_v24 }
 0x4fa   : > { %9505 = vmatmul.mubr.f32.gmra.mrb[50].mxu1 %v15535_v23 }
 0x4fb   : > { %9507 = vmatprep.mubr.f32.mxu1 %v15536_v4 }
 0x4fe   : > { %9508 = vmatmul.mubr.f32.gmra.mrb[52].mxu1 %v15537_v51 }
 0x4ff   : > { %9510 = vmatprep.mubr.f32.mxu1 %v15538_v17  ;;  %v15542_v17 = vand.u32 4294901760, %v15476_v45  ;;  %v15548_v45 = vld [vmem:[#allocation17_spill] sm:$0xff] }
 0x502   : > { %9511 = vmatmul.mubr.f32.gmra.mrb[54].mxu1 %v15539_v20  ;;  %v15543_v20 = vand.u32 4294901760, %v15477_v62  ;;  %v15558_v62 = vand.u32 4294901760, %v15492_v22  ;;  %v15564_v22 = vand.u32 4294901760, %v15498_v26  ;;  %v15570_v26 = vand.u32 4294901760, %v15505_v35 }
 0x503   : > { %9513 = vmatprep.mubr.f32.mxu1 %v13397_v7  ;;  %v15577_v35 = vand.u32 4294901760, %v15512_v59  ;;  %v15584_v59 = vand.u32 4294901760, %v15519_v60  ;;  %v15591_v60 = vand.u32 4294901760, %v15526_v30  ;;  %v15600_v30 = vand.u32 4294901760, %v15533_v52 }
 0x504   : > { %v15609_v52 = vand.u32 4294901760, %v13397_v7  ;;  %v15620_v7 = vand.u32 4294901760, %v13449_v28 }
 0x506   : > { %9514 = vmatmul.mubr.f32.gmra.mrb[56].mxu1 %v15540_v8  ;;  %v15544_v8 = vand.u32 4294901760, %v15478_v25  ;;  %v15560_v25 = vld [vmem:[#allocation26_spill] sm:$0xff] }
 0x507   : > { %9516 = vmatprep.mubr.f32.mxu1 %v13417_v3 }
 0x50a   : > { %9517 = vmatmul.mubr.f32.gmra.mrb[58].mxu1 %v15541_v63  ;;  %v15545_v63 = vld [vmem:[#allocation14_spill] sm:$0xff] }
 0x50b   : > { %9519 = vmatprep.mubr.f32.mxu1 %v13437_v61  ;;  %v15546_v61 = vand.u32 4294901760, %v15480_v55  ;;  %v15563_v55 = vld [vmem:[#allocation29_spill] sm:$0xff] }
 0x50e   : > { %9520 = vmatmul.mubr.f32.gmra.mrb[60].mxu1 %v13431_v0 }
 0x50f   : > { %9522 = vmatprep.mubr.f32.mxu1 %v13455_v58  ;;  %v15547_v58 = vand.u32 4294901760, %v15481_v36  ;;  %v15568_v36 = vand.u32 4294901760, %v15503_v38  ;;  %v15575_v38 = vand.u32 4294901760, %v15510_v21  ;;  %v15582_v21 = vand.u32 4294901760, %v15517_v15 }
 0x510   : > { %v15589_v15 = vand.u32 4294901760, %v15524_v49  ;;  %v15597_v49 = vand.u32 4294901760, %v15531_v32  ;;  %v15605_v32 = vld [vmem:[#allocation126_spill] sm:$0xff] }
 0x512   : > { %9523 = vmatmul.mubr.f32.gmra.mrb[62].mxu1 %v13449_v28  ;;  %v15628_v28 = vld [vmem:[#allocation10_spill] sm:$0xff] }
 0x513   : > { %9557 = vmatprep.mubr.f32.mxu1 %v15542_v17  ;;  %v15549_v17 = vand.u32 4294901760, %v15483_v13  ;;  %v15555_v13 = vand.u32 4294901760, %v15489_v18  ;;  %v15561_v18 = vand.u32 4294901760, %v15495_v44  ;;  %v15566_v44 = vand.u32 4294901760, %v15501_v56 }
 0x514   : > { %v15573_v56 = vand.u32 4294901760, %v15508_v1  ;;  %v15580_v1 = vand.u32 4294901760, %v15515_v34  ;;  %v15587_v34 = vand.u32 4294901760, %v15522_v10  ;;  %v15594_v10 = vand.u32 4294901760, %v15529_v33 }
 0x515   : > { %v15603_v33 = vand.u32 4294901760, %v15536_v4  ;;  %v15613_v4 = vld [vmem:[#allocation138_spill] sm:$0xff] }
 0x516   : > { %9558 = vmatmul.mubr.f32.vlgmr.msra.gmra.mrb[0].mxu1 %v15543_v20  ;;  %v15550_v20 = vand.u32 4294901760, %v15484_v41  ;;  %v15556_v41 = vand.u32 4294901760, %v15490_v43  ;;  %v15569_v43 = vand.u32 4294901760, %v15504_v40  ;;  %v15576_v40 = vand.u32 4294901760, %v15511_v12 }
 0x517   : > { %9560 = vmatprep.mubr.f32.mxu1 %v15544_v8  ;;  %10232 = vmatpush3.bf16.msra.mxu1 %v15500_v2  ;;  %v15551_v2 = vld [vmem:[#allocation20_spill] sm:$0xff]  ;;  %v15552_v8 = vand.u32 4294901760, %v15486_v57  ;;  %v15562_v57 = vand.u32 4294901760, %v15496_v5  ;;  %v15567_v5 = vand.u32 4294901760, %v15502_v54  ;;  %v15574_v54 = vand.u32 4294901760, %v15509_v48 }
 0x518   : > { %10234 = vmatprep.subr.bf16.mxu1 %v15545_v63  ;;  %v15581_v48 = vand.u32 4294901760, %v15516_v46  ;;  %v15583_v12 = vand.u32 4294901760, %v15518_v39  ;;  %v15588_v46 = vand.u32 4294901760, %v15523_v53  ;;  %v15590_v39 = vand.u32 4294901760, %v15525_v9  ;;  %v15595_v53 = vld [vmem:[#allocation84_spill] sm:$0xff]  ;;  %v15598_v9 = vld [vmem:[#allocation97_spill] sm:$0xff] }
 0x51a   : > { %9561 = vmatmul.mubr.f32.gmra.mrb[2].mxu1 %v15546_v61  ;;  %v15553_v61 = vand.u32 4294901760, %v15487_v27  ;;  %v15559_v27 = vand.u32 4294901760, %v15493_v6  ;;  %v15565_v6 = vand.u32 4294901760, %v15499_v16  ;;  %v15571_v16 = vand.u32 4294901760, %v15506_v29 }
 0x51b   : > { %9563 = vmatprep.mubr.f32.mxu1 %v15547_v58  ;;  %10236 = vmatpush3.bf16.msra.mxu1 %v15545_v63  ;;  %v15554_v63 = vld [vmem:[#allocation21_spill] sm:$0xff]  ;;  %v15578_v29 = vand.u32 4294901760, %v15513_v47  ;;  %v15585_v47 = vand.u32 4294901760, %v15520_v42  ;;  %v15592_v42 = vand.u32 4294901760, %v15527_v37  ;;  %v15601_v37 = vand.u32 4294901760, %v15534_v24  ;;  %v15610_v24 = vld [vmem:[#allocation131_spill] sm:$0xff] }
 0x51c   : > { %10238 = vmatprep.subr.bf16.mxu1 %v15548_v45  ;;  %v15557_v58 = vld [vmem:[#allocation25_spill] sm:$0xff] }
 0x51e   : > { %9564 = vmatmul.mubr.f32.gmra.mrb[4].mxu1 %v15549_v17  ;;  %v15596_v17 = vand.u32 4294901760, %v15595_v53  ;;  %v15659_v53 = vld [vmem:[#allocation151_spill] sm:$0xff] }
 0x51f   : > { %9566 = vmatprep.mubr.f32.mxu1 %v15550_v20  ;;  %10240 = vmatpush3.bf16.msra.mxu1 %v15548_v45  ;;  %v15572_v45 = vand.u32 4294901760, %v15507_v14  ;;  %v15579_v14 = vand.u32 4294901760, %v15514_v31  ;;  %v15586_v31 = vand.u32 4294901760, %v15521_v11  ;;  %v15593_v11 = vand.u32 4294901760, %v15528_v19 }
 0x520   : > { %10242 = vmatprep.subr.bf16.mxu1 %v15551_v2  ;;  %v15599_v20 = vand.u32 4294901760, %v15598_v9  ;;  %v15602_v19 = vand.u32 4294901760, %v15535_v23  ;;  %v15612_v23 = vand.u32 4294901760, %v13417_v3  ;;  %v15623_v3 = vld [vmem:[#allocation46_spill] sm:$0xff]  ;;  %v15662_v9 = vld [vmem:[#allocation23_spill] sm:$0xff] }
 0x522   : > { %9567 = vmatmul.mubr.f32.gmra.mrb[6].mxu1 %v15552_v8  ;;  %v15606_v8 = vand.u32 4294901760, %v15605_v32  ;;  %v15669_v32 = vld [vmem:[#allocation50_spill] sm:$0xff] }
 0x523   : > { %9569 = vmatprep.mubr.f32.mxu1 %v15553_v61  ;;  %10244 = vmatpush3.bf16.msra.mxu1 %v15551_v2  ;;  %v15604_v2 = vand.u32 4294901760, %v15537_v51  ;;  %v15607_v61 = vld [vmem:[#allocation124_spill] sm:$0xff]  ;;  %v15615_v51 = vld [vmem:[#allocation145_spill] sm:$0xff] }
 0x524   : > { %10246 = vmatprep.subr.bf16.mxu1 %v15554_v63 }
 0x526   : > { %9570 = vmatmul.mubr.f32.gmra.mrb[8].mxu1 %v15555_v13  ;;  %v15611_v13 = vand.u32 4294901760, %v15610_v24  ;;  %v15674_v24 = vld [vmem:[#allocation82_spill] sm:$0xff] }
 0x527   : > { %9572 = vmatprep.mubr.f32.mxu1 %v15556_v41  ;;  %10248 = vmatpush3.bf16.msra.mxu1 %v15554_v63  ;;  %v15608_v63 = vand.u32 4294901760, %v15607_v61  ;;  %v15614_v41 = vand.u32 4294901760, %v15613_v4  ;;  %v15671_v61 = vld [vmem:[#allocation58_spill] sm:$0xff] }
 0x528   : > { %10250 = vmatprep.subr.bf16.mxu1 %v15557_v58  ;;  %v15677_v4 = vld [vmem:[#allocation90_spill] sm:$0xff] }
 0x52a   : > { %9573 = vmatmul.mubr.f32.gmra.mrb[10].mxu1 %v15558_v62  ;;  %v15617_v62 = vand.u32 4294901760, %v13431_v0  ;;  %v15626_v0 = vld [vmem:[#allocation49_spill] sm:$0xff] }
 0x52b   : > { %9575 = vmatprep.mubr.f32.mxu1 %v15559_v27  ;;  %10252 = vmatpush3.bf16.msra.mxu1 %v15557_v58  ;;  %v15616_v58 = vand.u32 4294901760, %v15615_v51  ;;  %v15618_v27 = vld [vmem:[#allocation152_spill] sm:$0xff]  ;;  %v15679_v51 = vld [vmem:[#allocation98_spill] sm:$0xff] }
 0x52c   : > { %10254 = vmatprep.subr.bf16.mxu1 %v15560_v25 }
 0x52e   : > { %9576 = vmatmul.mubr.f32.gmra.mrb[12].mxu1 %v15561_v18  ;;  %v15621_v18 = vld [vmem:[#allocation34_spill] sm:$0xff] }
 0x52f   : > { %9578 = vmatprep.mubr.f32.mxu1 %v15562_v57  ;;  %10256 = vmatpush3.bf16.msra.mxu1 %v15560_v25  ;;  %v15619_v25 = vand.u32 4294901760, %v15618_v27  ;;  %v15622_v57 = vld [vmem:[#allocation32_spill] sm:$0xff]  ;;  %v15682_v27 = vld [vmem:[#allocation122_spill] sm:$0xff] }
 0x530   : > { %10258 = vmatprep.subr.bf16.mxu1 %v15563_v55 }
 0x532   : > { %9579 = vmatmul.mubr.f32.gmra.mrb[14].mxu1 %v15564_v22  ;;  %v15625_v22 = vld [vmem:[#allocation44_spill] sm:$0xff] }
 0x533   : > { %9581 = vmatprep.mubr.f32.mxu1 %v15565_v6  ;;  %10260 = vmatpush3.bf16.msra.mxu1 %v15563_v55  ;;  %v15624_v55 = vld [vmem:[#allocation3_spill] sm:$0xff]  ;;  %v15627_v6 = vld [vmem:[#allocation4_spill] sm:$0xff] }
 0x534   : > { %10262 = vmatprep.subr.bf16.mxu1 %v15456_v50 }
 0x536   : > { %9582 = vmatmul.mubr.f32.gmra.mrb[16].mxu1 %v15566_v44  ;;  %v15629_v44 = vld [vmem:[#allocation61_spill] sm:$0xff] }
 0x537   : > { %9584 = vmatprep.mubr.f32.mxu1 %v15567_v5  ;;  %v15630_v5 = vld [vmem:[#allocation5_spill] sm:$0xff] }
 0x53a   : > { %9585 = vmatmul.mubr.f32.gmra.mrb[18].mxu1 %v15568_v36  ;;  %v15631_v36 = vld [vmem:[#allocation56_spill] sm:$0xff] }
 0x53b   : > { %9587 = vmatprep.mubr.f32.mxu1 %v15569_v43  ;;  %v15633_v43 = vld [vmem:[#allocation9_spill] sm:$0xff] }
 0x53e   : > { %9588 = vmatmul.mubr.f32.gmra.mrb[20].mxu1 %v15570_v26  ;;  %v15634_v26 = vld [vmem:[#allocation65_spill] sm:$0xff] }
 0x53f   : > { %9590 = vmatprep.mubr.f32.mxu1 %v15571_v16  ;;  %v15635_v16 = vld [vmem:[#allocation79_spill] sm:$0xff] }
 0x542   : > { %9591 = vmatmul.mubr.f32.gmra.mrb[22].mxu1 %v15572_v45  ;;  %v15636_v45 = vld [vmem:[#allocation12_spill] sm:$0xff] }
 0x543   : > { %9593 = vmatprep.mubr.f32.mxu1 %v15573_v56  ;;  %v15637_v56 = vld [vmem:[#allocation77_spill] sm:$0xff] }
 0x546   : > { %9594 = vmatmul.mubr.f32.gmra.mrb[24].mxu1 %v15574_v54  ;;  %v15638_v54 = vld [vmem:[#allocation88_spill] sm:$0xff] }
 0x547   : > { %9596 = vmatprep.mubr.f32.mxu1 %v15575_v38  ;;  %v15639_v38 = vld [vmem:[#allocation18_spill] sm:$0xff] }
 0x54a   : > { %9597 = vmatmul.mubr.f32.gmra.mrb[26].mxu1 %v15576_v40  ;;  %v15640_v40 = vld [vmem:[#allocation86_spill] sm:$0xff] }
 0x54b   : > { %9599 = vmatprep.mubr.f32.mxu1 %v15577_v35  ;;  %v15641_v35 = vld [vmem:[#allocation100_spill] sm:$0xff] }
 0x54e   : > { %9600 = vmatmul.mubr.f32.gmra.mrb[28].mxu1 %v15578_v29  ;;  %v15642_v29 = vld [vmem:[#allocation22_spill] sm:$0xff] }
 0x54f   : > { %9602 = vmatprep.mubr.f32.mxu1 %v15579_v14  ;;  %v15643_v14 = vld [vmem:[#allocation96_spill] sm:$0xff] }
 0x552   : > { %9603 = vmatmul.mubr.f32.gmra.mrb[30].mxu1 %v15580_v1  ;;  %v15644_v1 = vld [vmem:[#allocation127_spill] sm:$0xff] }
 0x553   : > { %9605 = vmatprep.mubr.f32.mxu1 %v15581_v48  ;;  %v15645_v48 = vld [vmem:[#allocation104_spill] sm:$0xff] }
 0x556   : > { %9606 = vmatmul.mubr.f32.gmra.mrb[32].mxu1 %v15582_v21  ;;  %v15646_v21 = vld [vmem:[#allocation136_spill] sm:$0xff] }
 0x557   : > { %9608 = vmatprep.mubr.f32.mxu1 %v15583_v12  ;;  %v15647_v12 = vld [vmem:[#allocation134_spill] sm:$0xff] }
 0x55a   : > { %9609 = vmatmul.mubr.f32.gmra.mrb[34].mxu1 %v15584_v59  ;;  %v15648_v59 = vld [vmem:[#allocation41_spill] sm:$0xff] }
 0x55b   : > { %9611 = vmatprep.mubr.f32.mxu1 %v15585_v47  ;;  %v15649_v47 = vld [vmem:[#allocation40_spill] sm:$0xff] }
 0x55e   : > { %9612 = vmatmul.mubr.f32.gmra.mrb[36].mxu1 %v15586_v31  ;;  %v15650_v31 = vld [vmem:[#allocation78_spill] sm:$0xff] }
 0x55f   : > { %9614 = vmatprep.mubr.f32.mxu1 %v15587_v34  ;;  %v15651_v34 = vld [vmem:[#allocation75_spill] sm:$0xff] }
 0x562   : > { %9615 = vmatmul.mubr.f32.gmra.mrb[38].mxu1 %v15588_v46  ;;  %v15652_v46 = vld [vmem:[#allocation109_spill] sm:$0xff] }
 0x563   : > { %9617 = vmatprep.mubr.f32.mxu1 %v15589_v15  ;;  %v15653_v15 = vld [vmem:[#allocation107_spill] sm:$0xff] }
 0x566   : > { %9618 = vmatmul.mubr.f32.gmra.mrb[40].mxu1 %v15590_v39  ;;  %v15654_v39 = vld [vmem:[#allocation118_spill] sm:$0xff] }
 0x567   : > { %9620 = vmatprep.mubr.f32.mxu1 %v15591_v60  ;;  %v15655_v60 = vld [vmem:[#allocation117_spill] sm:$0xff] }
 0x56a   : > { %9621 = vmatmul.mubr.f32.gmra.mrb[42].mxu1 %v15592_v42  ;;  %v15656_v42 = vld [vmem:[#allocation144_spill] sm:$0xff] }
 0x56b   : > { %9623 = vmatprep.mubr.f32.mxu1 %v15593_v11  ;;  %v15657_v11 = vld [vmem:[#allocation142_spill] sm:$0xff] }
 0x56e   : > { %9624 = vmatmul.mubr.f32.gmra.mrb[44].mxu1 %v15594_v10  ;;  %v15658_v10 = vld [vmem:[#allocation155_spill] sm:$0xff] }
 0x56f   : > { %9626 = vmatprep.mubr.f32.mxu1 %v15596_v17  ;;  %v15660_v17 = vld [vmem:[#allocation13_spill] sm:$0xff] }
 0x572   : > { %9627 = vmatmul.mubr.f32.gmra.mrb[46].mxu1 %v15597_v49  ;;  %v15661_v49 = vld [vmem:[#allocation11_spill] sm:$0xff] }
 0x573   : > { %9629 = vmatprep.mubr.f32.mxu1 %v15599_v20  ;;  %v15663_v20 = vld [vmem:[#allocation19_spill] sm:$0xff] }
 0x576   : > { %9630 = vmatmul.mubr.f32.gmra.mrb[48].mxu1 %v15600_v30  ;;  %v15664_v30 = vld [vmem:[#allocation31_spill] sm:$0xff] }
 0x577   : > { %9632 = vmatprep.mubr.f32.mxu1 %v15601_v37  ;;  %v15665_v37 = vld [vmem:[#allocation30_spill] sm:$0xff] }
 0x57a   : > { %9633 = vmatmul.mubr.f32.gmra.mrb[50].mxu1 %v15602_v19  ;;  %v15666_v19 = vld [vmem:[#allocation43_spill] sm:$0xff] }
 0x57b   : > { %9635 = vmatprep.mubr.f32.mxu1 %v15603_v33  ;;  %v15667_v33 = vld [vmem:[#allocation42_spill] sm:$0xff] }
 0x57e   : > { %9636 = vmatmul.mubr.f32.gmra.mrb[52].mxu1 %v15604_v2  ;;  %v15668_v2 = vld [vmem:[#allocation52_spill] sm:$0xff] }
 0x57f   : > { %9638 = vmatprep.mubr.f32.mxu1 %v15606_v8  ;;  %v15670_v8 = vld [vmem:[#allocation59_spill] sm:$0xff] }
 0x582   : > { %9639 = vmatmul.mubr.f32.gmra.mrb[54].mxu1 %v15608_v63  ;;  %v15672_v63 = vld [vmem:[#allocation72_spill] sm:$0xff] }
 0x583   : > { %9641 = vmatprep.mubr.f32.mxu1 %v15609_v52  ;;  %v15673_v52 = vld [vmem:[#allocation68_spill] sm:$0xff] }
 0x586   : > { %9642 = vmatmul.mubr.f32.gmra.mrb[56].mxu1 %v15611_v13  ;;  %v15675_v13 = vld [vmem:[#allocation81_spill] sm:$0xff] }
 0x587   : > { %9644 = vmatprep.mubr.f32.mxu1 %v15612_v23  ;;  %v15676_v23 = vld [vmem:[#allocation93_spill] sm:$0xff] }
 0x58a   : > { %9645 = vmatmul.mubr.f32.gmra.mrb[58].mxu1 %v15614_v41  ;;  %v15678_v41 = vld [vmem:[#allocation99_spill] sm:$0xff] }
 0x58b   : > { %9647 = vmatprep.mubr.f32.mxu1 %v15616_v58  ;;  %v15680_v58 = vld [vmem:[#allocation110_spill] sm:$0xff] }
 0x58e   : > { %9648 = vmatmul.mubr.f32.gmra.mrb[60].mxu1 %v15617_v62  ;;  %v15681_v62 = vld [vmem:[#allocation108_spill] sm:$0xff] }
 0x58f   : > { %9650 = vmatprep.mubr.f32.mxu1 %v15619_v25  ;;  %v15683_v25 = vld [vmem:[#allocation120_spill] sm:$0xff] }
 0x592   : > { %9651 = vmatmul.mubr.f32.gmra.mrb[62].mxu1 %v15620_v7  ;;  %v15684_v7 = vld [vmem:[#allocation130_spill] sm:$0xff] }
 0x593   : > { %9685 = vmatprep.mubr.f32.mxu1 %v15621_v18 }
 0x596   : > { %9686 = vmatmul.mubr.f32.vlgmr.msra.gmra.mrb[0].mxu1 %v15622_v57 }
 0x597   : > { %9688 = vmatprep.mubr.f32.mxu1 %v15623_v3  ;;  %10264 = vmatpush3.bf16.msra.mxu1 %v15456_v50  ;;  %v15632_v50 = vld [vmem:[#allocation69_spill] sm:$0xff] }
 0x598   : > { %10266 = vmatprep.subr.bf16.mxu1 %v15624_v55 }
 0x59a   : > { %9689 = vmatmul.mubr.f32.gmra.mrb[2].mxu1 %v15625_v22 }
 0x59b   : > { %9691 = vmatprep.mubr.f32.mxu1 %v15626_v0  ;;  %10268 = vmatpush3.bf16.msra.mxu1 %v15624_v55  ;;  %v15685_v55 = vld [vmem:[#allocation128_spill] sm:$0xff] }
 0x59c   : > { %10270 = vmatprep.subr.bf16.mxu1 %v15627_v6 }
 0x59e   : > { %9692 = vmatmul.mubr.f32.gmra.mrb[4].mxu1 %v15628_v28 }
 0x59f   : > { %9694 = vmatprep.mubr.f32.mxu1 %v15629_v44  ;;  %10272 = vmatpush3.bf16.msra.mxu1 %v15627_v6  ;;  %v15686_v6 = vld [vmem:[#allocation137_spill] sm:$0xff] }
 0x5a0   : > { %10274 = vmatprep.subr.bf16.mxu1 %v15630_v5 }
 0x5a2   : > { %9695 = vmatmul.mubr.f32.gmra.mrb[6].mxu1 %v15631_v36 }
 0x5a3   : > { %9697 = vmatprep.mubr.f32.mxu1 %v15632_v50  ;;  %10276 = vmatpush3.bf16.msra.mxu1 %v15630_v5  ;;  %v15687_v5 = vld [vmem:[#allocation135_spill] sm:$0xff] }
 0x5a4   : > { %10278 = vmatprep.subr.bf16.mxu1 %v15633_v43 }
 0x5a6   : > { %9698 = vmatmul.mubr.f32.gmra.mrb[8].mxu1 %v15634_v26 }
 0x5a7   : > { %9700 = vmatprep.mubr.f32.mxu1 %v15635_v16  ;;  %10280 = vmatpush3.bf16.msra.mxu1 %v15633_v43  ;;  %v15688_v43 = vld [vmem:[#allocation143_spill] sm:$0xff] }
 0x5a8   : > { %10282 = vmatprep.subr.bf16.mxu1 %v15636_v45 }
 0x5aa   : > { %9701 = vmatmul.mubr.f32.gmra.mrb[10].mxu1 %v15637_v56 }
 0x5ab   : > { %9703 = vmatprep.mubr.f32.mxu1 %v15638_v54  ;;  %10284 = vmatpush3.bf16.msra.mxu1 %v15636_v45  ;;  %v15689_v45 = vld [vmem:[#allocation141_spill] sm:$0xff] }
 0x5ac   : > { %10286 = vmatprep.subr.bf16.mxu1 %v15639_v38 }
 0x5ae   : > { %9704 = vmatmul.mubr.f32.gmra.mrb[12].mxu1 %v15640_v40 }
 0x5af   : > { %9706 = vmatprep.mubr.f32.mxu1 %v15641_v35  ;;  %10288 = vmatpush3.bf16.msra.mxu1 %v15639_v38  ;;  %v15690_v38 = vld [vmem:[#allocation149_spill] sm:$0xff] }
 0x5b0   : > { %10290 = vmatprep.subr.bf16.mxu1 %v15642_v29 }
 0x5b2   : > { %9707 = vmatmul.mubr.f32.gmra.mrb[14].mxu1 %v15643_v14 }
 0x5b3   : > { %9709 = vmatprep.mubr.f32.mxu1 %v15644_v1  ;;  %10292 = vmatpush3.bf16.msra.mxu1 %v15642_v29  ;;  %v15691_v29 = vld [vmem:[#allocation147_spill] sm:$0xff] }
 0x5b6   : > { %9710 = vmatmul.mubr.f32.gmra.mrb[16].mxu1 %v15645_v48 }
 0x5b7   : > { %9712 = vmatprep.mubr.f32.mxu1 %v15646_v21 }
 0x5ba   : > { %9713 = vmatmul.mubr.f32.gmra.mrb[18].mxu1 %v15647_v12 }
 0x5bb   : > { %9715 = vmatprep.mubr.f32.mxu1 %v15648_v59 }
 0x5be   : > { %9716 = vmatmul.mubr.f32.gmra.mrb[20].mxu1 %v15649_v47 }
 0x5bf   : > { %9718 = vmatprep.mubr.f32.mxu1 %v15650_v31 }
 0x5c2   : > { %9719 = vmatmul.mubr.f32.gmra.mrb[22].mxu1 %v15651_v34 }
 0x5c3   : > { %9721 = vmatprep.mubr.f32.mxu1 %v15652_v46 }
 0x5c6   : > { %9722 = vmatmul.mubr.f32.gmra.mrb[24].mxu1 %v15653_v15 }
 0x5c7   : > { %9724 = vmatprep.mubr.f32.mxu1 %v15654_v39 }
 0x5ca   : > { %9725 = vmatmul.mubr.f32.gmra.mrb[26].mxu1 %v15655_v60 }
 0x5cb   : > { %9727 = vmatprep.mubr.f32.mxu1 %v15656_v42 }
 0x5ce   : > { %9728 = vmatmul.mubr.f32.gmra.mrb[28].mxu1 %v15657_v11 }
 0x5cf   : > { %9730 = vmatprep.mubr.f32.mxu1 %v15658_v10 }
 0x5d2   : > { %9731 = vmatmul.mubr.f32.gmra.mrb[30].mxu1 %v15659_v53 }
 0x5d3   : > { %9733 = vmatprep.mubr.f32.mxu1 %v15660_v17 }
 0x5d6   : > { %9734 = vmatmul.mubr.f32.gmra.mrb[32].mxu1 %v15661_v49 }
 0x5d7   : > { %9736 = vmatprep.mubr.f32.mxu1 %v15662_v9 }
 0x5da   : > { %9737 = vmatmul.mubr.f32.gmra.mrb[34].mxu1 %v15663_v20 }
 0x5db   : > { %9739 = vmatprep.mubr.f32.mxu1 %v15664_v30 }
 0x5de   : > { %9740 = vmatmul.mubr.f32.gmra.mrb[36].mxu1 %v15665_v37 }
 0x5df   : > { %9742 = vmatprep.mubr.f32.mxu1 %v15666_v19 }
 0x5e2   : > { %9743 = vmatmul.mubr.f32.gmra.mrb[38].mxu1 %v15667_v33 }
 0x5e3   : > { %9745 = vmatprep.mubr.f32.mxu1 %v15668_v2 }
 0x5e6   : > { %9746 = vmatmul.mubr.f32.gmra.mrb[40].mxu1 %v15669_v32 }
 0x5e7   : > { %9748 = vmatprep.mubr.f32.mxu1 %v15670_v8 }
 0x5ea   : > { %9749 = vmatmul.mubr.f32.gmra.mrb[42].mxu1 %v15671_v61 }
 0x5eb   : > { %9751 = vmatprep.mubr.f32.mxu1 %v15672_v63 }
 0x5ee   : > { %9752 = vmatmul.mubr.f32.gmra.mrb[44].mxu1 %v15673_v52 }
 0x5ef   : > { %9754 = vmatprep.mubr.f32.mxu1 %v15674_v24 }
 0x5f2   : > { %9755 = vmatmul.mubr.f32.gmra.mrb[46].mxu1 %v15675_v13 }
 0x5f3   : > { %9757 = vmatprep.mubr.f32.mxu1 %v15676_v23 }
 0x5f6   : > { %9758 = vmatmul.mubr.f32.gmra.mrb[48].mxu1 %v15677_v4 }
 0x5f7   : > { %9760 = vmatprep.mubr.f32.mxu1 %v15678_v41 }
 0x5fa   : > { %9761 = vmatmul.mubr.f32.gmra.mrb[50].mxu1 %v15679_v51 }
 0x5fb   : > { %9763 = vmatprep.mubr.f32.mxu1 %v15680_v58 }
 0x5fe   : > { %9764 = vmatmul.mubr.f32.gmra.mrb[52].mxu1 %v15681_v62 }
 0x5ff   : > { %9766 = vmatprep.mubr.f32.mxu1 %v15682_v27 }
 0x602   : > { %9767 = vmatmul.mubr.f32.gmra.mrb[54].mxu1 %v15683_v25 }
 0x603   : > { %9769 = vmatprep.mubr.f32.mxu1 %v15684_v7 }
 0x606   : > { %9770 = vmatmul.mubr.f32.gmra.mrb[56].mxu1 %v15685_v55 }
 0x607   : > { %9772 = vmatprep.mubr.f32.mxu1 %v15686_v6 }
 0x60a   : > { %9773 = vmatmul.mubr.f32.gmra.mrb[58].mxu1 %v15687_v5 }
 0x60b   : > { %9775 = vmatprep.mubr.f32.mxu1 %v15688_v43 }
 0x60e   : > { %9776 = vmatmul.mubr.f32.gmra.mrb[60].mxu1 %v15689_v45 }
 0x60f   : > { %9778 = vmatprep.mubr.f32.mxu1 %v15690_v38 }
 0x612   : > { %9779 = vmatmul.mubr.f32.gmra.mrb[62].mxu1 %v15691_v29 }
 0x613   : > { %9813 = vmatprep.mubr.f32.mxu1 %v15621_v18 }
 0x616   : > { %9814 = vmatmul.mubr.f32.vlgmr.msra.gmra.mrb[0].mxu1 %v15622_v57 }
 0x617   : > { %9816 = vmatprep.mubr.f32.mxu1 %v15623_v3 }
 0x61a   : > { %9817 = vmatmul.mubr.f32.gmra.mrb[2].mxu1 %v15625_v22 }
 0x61b   : > { %9819 = vmatprep.mubr.f32.mxu1 %v15626_v0 }
 0x61e   : > { %9820 = vmatmul.mubr.f32.gmra.mrb[4].mxu1 %v15628_v28 }
 0x61f   : > { %9822 = vmatprep.mubr.f32.mxu1 %v15629_v44 }
 0x622   : > { %9823 = vmatmul.mubr.f32.gmra.mrb[6].mxu1 %v15631_v36 }
 0x623   : > { %9825 = vmatprep.mubr.f32.mxu1 %v15632_v50 }
 0x626   : > { %9826 = vmatmul.mubr.f32.gmra.mrb[8].mxu1 %v15634_v26 }
 0x627   : > { %9828 = vmatprep.mubr.f32.mxu1 %v15635_v16 }
 0x62a   : > { %9829 = vmatmul.mubr.f32.gmra.mrb[10].mxu1 %v15637_v56 }
 0x62b   : > { %9831 = vmatprep.mubr.f32.mxu1 %v15638_v54 }
 0x62e   : > { %9832 = vmatmul.mubr.f32.gmra.mrb[12].mxu1 %v15640_v40 }
 0x62f   : > { %9834 = vmatprep.mubr.f32.mxu1 %v15641_v35  ;;  %v13918_v35 = vld [vmem:[%s14123_s1] ss:$0 sm:$0xff] }
 0x632   : > { %9835 = vmatmul.mubr.f32.gmra.mrb[14].mxu1 %v15643_v14 }
 0x633   : > { %9837 = vmatprep.mubr.f32.mxu1 %v15644_v1 }
 0x636   : > { %9838 = vmatmul.mubr.f32.gmra.mrb[16].mxu1 %v15645_v48 }
 0x637   : > { %9840 = vmatprep.mubr.f32.mxu1 %v15646_v21  ;;  %v11197_v21 = vld [vmem:[%s11377_s11 + $0x8] sm:$0xff] }
 0x63a   : > { %9841 = vmatmul.mubr.f32.gmra.mrb[18].mxu1 %v15647_v12 }
 0x63b   : > { %9843 = vmatprep.mubr.f32.mxu1 %v15648_v59 }
 0x63e   : > { %9844 = vmatmul.mubr.f32.gmra.mrb[20].mxu1 %v15649_v47  ;;  %v11198_v47 = vld [vmem:[%s11377_s11] sm:$0xff] }
 0x63f   : > { %9846 = vmatprep.mubr.f32.mxu1 %v15650_v31 }
 0x642   : > { %9847 = vmatmul.mubr.f32.gmra.mrb[22].mxu1 %v15651_v34 }
 0x643   : > { %9849 = vmatprep.mubr.f32.mxu1 %v15652_v46 }
 0x646   : > { %9850 = vmatmul.mubr.f32.gmra.mrb[24].mxu1 %v15653_v15 }
 0x647   : > { %9852 = vmatprep.mubr.f32.mxu1 %v15654_v39 }
 0x64a   : > { %9853 = vmatmul.mubr.f32.gmra.mrb[26].mxu1 %v15655_v60 }
 0x64b   : > { %9855 = vmatprep.mubr.f32.mxu1 %v15656_v42 }
 0x64e   : > { %9856 = vmatmul.mubr.f32.gmra.mrb[28].mxu1 %v15657_v11 }
 0x64f   : > { %9858 = vmatprep.mubr.f32.mxu1 %v15658_v10  ;;  %v11199_v10 = vld [vmem:[%s11377_s11 + $0x18] sm:$0xff] }
 0x652   : > { %9859 = vmatmul.mubr.f32.gmra.mrb[30].mxu1 %v15659_v53 }
 0x653   : > { %9861 = vmatprep.mubr.f32.mxu1 %v15660_v17 }
 0x656   : > { %9862 = vmatmul.mubr.f32.gmra.mrb[32].mxu1 %v15661_v49  ;;  %v11200_v49 = vld [vmem:[%s11377_s11 + $0x10] sm:$0xff] }
 0x657   : > { %9864 = vmatprep.mubr.f32.mxu1 %v15662_v9 }
 0x65a   : > { %9865 = vmatmul.mubr.f32.gmra.mrb[34].mxu1 %v15663_v20 }
 0x65b   : > { %9867 = vmatprep.mubr.f32.mxu1 %v15664_v30 }
 0x65e   : > { %9868 = vmatmul.mubr.f32.gmra.mrb[36].mxu1 %v15665_v37 }
 0x65f   : > { %9870 = vmatprep.mubr.f32.mxu1 %v15666_v19 }
 0x662   : > { %9871 = vmatmul.mubr.f32.gmra.mrb[38].mxu1 %v15667_v33 }
 0x663   : > { %9873 = vmatprep.mubr.f32.mxu1 %v15668_v2 }
 0x666   : > { %9874 = vmatmul.mubr.f32.gmra.mrb[40].mxu1 %v15669_v32 }
 0x667   : > { %9876 = vmatprep.mubr.f32.mxu1 %v15670_v8  ;;  %v11201_v8 = vld [vmem:[%s11377_s11 + $0x28] sm:$0xff] }
 0x66a   : > { %9877 = vmatmul.mubr.f32.gmra.mrb[42].mxu1 %v15671_v61 }
 0x66b   : > { %9879 = vmatprep.mubr.f32.mxu1 %v15672_v63 }
 0x66e   : > { %9880 = vmatmul.mubr.f32.gmra.mrb[44].mxu1 %v15673_v52  ;;  %v11202_v52 = vld [vmem:[%s11377_s11 + $0x20] sm:$0xff] }
 0x66f   : > { %9882 = vmatprep.mubr.f32.mxu1 %v15674_v24 }
 0x672   : > { %9883 = vmatmul.mubr.f32.gmra.mrb[46].mxu1 %v15675_v13 }
 0x673   : > { %9885 = vmatprep.mubr.f32.mxu1 %v15676_v23 }
 0x676   : > { %9886 = vmatmul.mubr.f32.gmra.mrb[48].mxu1 %v15677_v4 }
 0x677   : > { %9888 = vmatprep.mubr.f32.mxu1 %v15678_v41 }
 0x67a   : > { %9889 = vmatmul.mubr.f32.gmra.mrb[50].mxu1 %v15679_v51 }
 0x67b   : > { %9891 = vmatprep.mubr.f32.mxu1 %v15680_v58 }
 0x67e   : > { %9892 = vmatmul.mubr.f32.gmra.mrb[52].mxu1 %v15681_v62 }
 0x67f   : > { %9894 = vmatprep.mubr.f32.mxu1 %v15682_v27  ;;  %v11203_v27 = vld [vmem:[%s11377_s11 + $0x38] sm:$0xff] }
 0x682   : > { %9895 = vmatmul.mubr.f32.gmra.mrb[54].mxu1 %v15683_v25 }
 0x683   : > { %9897 = vmatprep.mubr.f32.mxu1 %v15684_v7 }
 0x686   : > { %9898 = vmatmul.mubr.f32.gmra.mrb[56].mxu1 %v15685_v55  ;;  %v11204_v55 = vld [vmem:[%s11377_s11 + $0x30] sm:$0xff] }
 0x687   : > { %9900 = vmatprep.mubr.f32.mxu1 %v15686_v6 }
 0x68a   : > { %9901 = vmatmul.mubr.f32.gmra.mrb[58].mxu1 %v15687_v5 }
 0x68b   : > { %9903 = vmatprep.mubr.f32.mxu1 %v15688_v43 }
 0x68e   : > { %9904 = vmatmul.mubr.f32.gmra.mrb[60].mxu1 %v15689_v45 }
 0x68f   : > { %9906 = vmatprep.mubr.f32.mxu1 %v15690_v38 }
 0x692   : > { %9907 = vmatmul.mubr.f32.gmra.mrb[62].mxu1 %v15691_v29 }
 0x6e9   : > { %v9815_v18 = vpop.f32.mrb[0].mxu1 }
 0x6ea   : > { %v10293_v57 = vadd.f32 1e-05, %v9815_v18  ;;  %v6700_v3 = vpop.f32.mrb[1].mxu1 }
 0x6eb   : > { %v10294_v22 = vadd.f32 1e-05, %v6700_v3  ;;  %v11205_v3 = vld [vmem:[%s11377_s11 + $0x48] sm:$0xff] }
 0x6ec   : > { %11005 = vrsqrt.f32 %v10293_v57 }
 0x6ed   : > { %11007 = vrsqrt.f32 %v10294_v22  ;;  %v9818_v0 = vpop.f32.mrb[2].mxu1 }
 0x6ee   : > { %v10295_v28 = vadd.f32 1e-05, %v9818_v0  ;;  %v6712_v44 = vpop.f32.mrb[3].mxu1 }
 0x6ef   : > { %v10296_v36 = vadd.f32 1e-05, %v6712_v44 }
 0x6f0   : > { %11009 = vrsqrt.f32 %v10295_v28  ;;  %v11206_v28 = vld [vmem:[%s11377_s11 + $0x40] sm:$0xff] }
 0x6f1   : > { %11011 = vrsqrt.f32 %v10296_v36  ;;  %v9821_v50 = vpop.f32.mrb[4].mxu1 }
 0x6f2   : > { %v10297_v26 = vadd.f32 1e-05, %v9821_v50  ;;  %v6724_v16 = vpop.f32.mrb[5].mxu1 }
 0x6f3   : > { %v10298_v56 = vadd.f32 1e-05, %v6724_v16 }
 0x6f4   : > { %11013 = vrsqrt.f32 %v10297_v26 }
 0x6f5   : > { %11015 = vrsqrt.f32 %v10298_v56  ;;  %v9824_v54 = vpop.f32.mrb[6].mxu1 }
 0x6f6   : > { %v11006_v40 = vpop.eup %11005  ;;  %v10299_v14 = vadd.f32 1e-05, %v9824_v54  ;;  %v6736_v1 = vpop.f32.mrb[7].mxu1 }
 0x6f7   : > { %v11008_v48 = vpop.eup %11007  ;;  %v7147_v12 = vmul.f32 %v11197_v21, %v11006_v40  ;;  %v10300_v59 = vadd.f32 1e-05, %v6736_v1  ;;  %v11208_v21 = vld [vmem:[%s11377_s11 + $0x50] sm:$0xff] }
 0x6f8   : > { %v7146_v31 = vmul.f32 %v11198_v47, %v11008_v48  ;;  %11017 = vrsqrt.f32 %v10299_v14  ;;  %v11207_v14 = vld [vmem:[%s11377_s11 + $0x58] sm:$0xff] }
 0x6f9   : > { %v7218_v34 = vmul.f32 %v13918_v35, %v7147_v12  ;;  %11019 = vrsqrt.f32 %v10300_v59  ;;  %v9827_v46 = vpop.f32.mrb[8].mxu1 }
 0x6fa   : > { %v11010_v15 = vpop.eup %11009  ;;  %v7217_v39 = vmul.f32 %v13918_v35, %v7146_v31  ;;  %v10301_v60 = vadd.f32 1e-05, %v9827_v46  ;;  %v6748_v42 = vpop.f32.mrb[9].mxu1 }
 0x6fb   : > { %v11012_v11 = vpop.eup %11011  ;;  %7282 = vst [vmem:[%s13926_s30 + $0x8] sm:$0xff] %v7218_v34  ;;  %v7149_v53 = vmul.f32 %v11199_v10, %v11010_v15  ;;  %v10302_v17 = vadd.f32 1e-05, %v6748_v42  ;;  %v11210_v10 = vld [vmem:[%s11377_s11 + $0x60] sm:$0xff] }
 0x6fc   : > { %7281 = vst [vmem:[%s13926_s30] sm:$0xff] %v7217_v39  ;;  %v7148_v9 = vmul.f32 %v11200_v49, %v11012_v11  ;;  %11021 = vrsqrt.f32 %v10301_v60  ;;  %v11209_v60 = vld [vmem:[%s11377_s11 + $0x68] sm:$0xff] }
 0x6fd   : > { %v7220_v20 = vmul.f32 %v13918_v35, %v7149_v53  ;;  %11023 = vrsqrt.f32 %v10302_v17  ;;  %v9830_v30 = vpop.f32.mrb[10].mxu1 }
 0x6fe   : > { %v11014_v37 = vpop.eup %11013  ;;  %v7219_v19 = vmul.f32 %v13918_v35, %v7148_v9  ;;  %v10303_v33 = vadd.f32 1e-05, %v9830_v30  ;;  %v6760_v2 = vpop.f32.mrb[11].mxu1 }
 0x6ff   : > { %v11016_v32 = vpop.eup %11015  ;;  %7284 = vst [vmem:[%s13926_s30 + $0x18] sm:$0xff] %v7220_v20  ;;  %v7151_v61 = vmul.f32 %v11201_v8, %v11014_v37  ;;  %v10304_v63 = vadd.f32 1e-05, %v6760_v2  ;;  %v11212_v8 = vld [vmem:[%s11377_s11 + $0x70] sm:$0xff] }
 0x700   : > { %7283 = vst [vmem:[%s13926_s30 + $0x10] sm:$0xff] %v7219_v19  ;;  %v7150_v24 = vmul.f32 %v11202_v52, %v11016_v32  ;;  %11025 = vrsqrt.f32 %v10303_v33  ;;  %v11211_v33 = vld [vmem:[%s11377_s11 + $0x78] sm:$0xff] }
 0x701   : > { %v7222_v13 = vmul.f32 %v13918_v35, %v7151_v61  ;;  %11027 = vrsqrt.f32 %v10304_v63  ;;  %v9833_v23 = vpop.f32.mrb[12].mxu1 }
 0x702   : > { %v11018_v4 = vpop.eup %11017  ;;  %v7221_v41 = vmul.f32 %v13918_v35, %v7150_v24  ;;  %v10305_v51 = vadd.f32 1e-05, %v9833_v23  ;;  %v6772_v58 = vpop.f32.mrb[13].mxu1 }
 0x703   : > { %v11020_v62 = vpop.eup %11019  ;;  %7286 = vst [vmem:[%s13926_s30 + $0x28] sm:$0xff] %v7222_v13  ;;  %v7153_v25 = vmul.f32 %v11203_v27, %v11018_v4  ;;  %v10306_v7 = vadd.f32 1e-05, %v6772_v58  ;;  %v11214_v27 = vld [vmem:[%s11377_s11 + $0x80] sm:$0xff] }
 0x704   : > { %7285 = vst [vmem:[%s13926_s30 + $0x20] sm:$0xff] %v7221_v41  ;;  %v7152_v6 = vmul.f32 %v11204_v55, %v11020_v62  ;;  %11029 = vrsqrt.f32 %v10305_v51  ;;  %v11213_v51 = vld [vmem:[%s11377_s11 + $0x88] sm:$0xff] }
 0x705   : > { %v7224_v5 = vmul.f32 %v13918_v35, %v7153_v25  ;;  %11031 = vrsqrt.f32 %v10306_v7  ;;  %v9836_v43 = vpop.f32.mrb[14].mxu1 }
 0x706   : > { %v11022_v45 = vpop.eup %11021  ;;  %v7223_v38 = vmul.f32 %v13918_v35, %v7152_v6  ;;  %v10307_v29 = vadd.f32 1e-05, %v9836_v43  ;;  %v6784_v18 = vpop.f32.mrb[15].mxu1 }
 0x707   : > { %v11024_v57 = vpop.eup %11023  ;;  %7288 = vst [vmem:[%s13926_s30 + $0x38] sm:$0xff] %v7224_v5  ;;  %v7155_v22 = vmul.f32 %v11205_v3, %v11022_v45  ;;  %v10308_v0 = vadd.f32 1e-05, %v6784_v18  ;;  %v11216_v3 = vld [vmem:[%s11377_s11 + $0x90] sm:$0xff] }
 0x708   : > { %7287 = vst [vmem:[%s13926_s30 + $0x30] sm:$0xff] %v7223_v38  ;;  %v7154_v44 = vmul.f32 %v11206_v28, %v11024_v57  ;;  %11033 = vrsqrt.f32 %v10307_v29  ;;  %v11215_v29 = vld [vmem:[%s11377_s11 + $0x98] sm:$0xff] }
 0x709   : > { %v7226_v36 = vmul.f32 %v13918_v35, %v7155_v22  ;;  %11035 = vrsqrt.f32 %v10308_v0  ;;  %v9839_v50 = vpop.f32.mrb[16].mxu1 }
 0x70a   : > { %v11026_v26 = vpop.eup %11025  ;;  %v7225_v16 = vmul.f32 %v13918_v35, %v7154_v44  ;;  %v10309_v56 = vadd.f32 1e-05, %v9839_v50  ;;  %v6796_v54 = vpop.f32.mrb[17].mxu1 }
 0x70b   : > { %v11028_v40 = vpop.eup %11027  ;;  %7290 = vst [vmem:[%s13926_s30 + $0x48] sm:$0xff] %v7226_v36  ;;  %v7157_v1 = vmul.f32 %v11207_v14, %v11026_v26  ;;  %v10310_v48 = vadd.f32 1e-05, %v6796_v54  ;;  %v11218_v14 = vld [vmem:[%s11377_s11 + $0xa0] sm:$0xff] }
 0x70c   : > { %7289 = vst [vmem:[%s13926_s30 + $0x40] sm:$0xff] %v7225_v16  ;;  %v7156_v12 = vmul.f32 %v11208_v21, %v11028_v40  ;;  %11037 = vrsqrt.f32 %v10309_v56  ;;  %v11217_v56 = vld [vmem:[%s11377_s11 + $0xa8] sm:$0xff] }
 0x70d   : > { %v7228_v59 = vmul.f32 %v13918_v35, %v7157_v1  ;;  %11039 = vrsqrt.f32 %v10310_v48  ;;  %v9842_v47 = vpop.f32.mrb[18].mxu1 }
 0x70e   : > { %v11030_v31 = vpop.eup %11029  ;;  %v7227_v34 = vmul.f32 %v13918_v35, %v7156_v12  ;;  %v10311_v46 = vadd.f32 1e-05, %v9842_v47  ;;  %v6808_v15 = vpop.f32.mrb[19].mxu1 }
 0x70f   : > { %v11032_v39 = vpop.eup %11031  ;;  %7292 = vst [vmem:[%s13926_s30 + $0x58] sm:$0xff] %v7228_v59  ;;  %v7159_v42 = vmul.f32 %v11209_v60, %v11030_v31  ;;  %v10312_v11 = vadd.f32 1e-05, %v6808_v15  ;;  %v11220_v60 = vld [vmem:[%s11377_s11 + $0xb0] sm:$0xff] }
 0x710   : > { %7291 = vst [vmem:[%s13926_s30 + $0x50] sm:$0xff] %v7227_v34  ;;  %v7158_v53 = vmul.f32 %v11210_v10, %v11032_v39  ;;  %11041 = vrsqrt.f32 %v10311_v46  ;;  %v11219_v46 = vld [vmem:[%s11377_s11 + $0xb8] sm:$0xff] }
 0x711   : > { %v7230_v17 = vmul.f32 %v13918_v35, %v7159_v42  ;;  %11043 = vrsqrt.f32 %v10312_v11  ;;  %v9845_v49 = vpop.f32.mrb[20].mxu1 }
 0x712   : > { %v11034_v9 = vpop.eup %11033  ;;  %v7229_v20 = vmul.f32 %v13918_v35, %v7158_v53  ;;  %v10313_v30 = vadd.f32 1e-05, %v9845_v49  ;;  %v6820_v37 = vpop.f32.mrb[21].mxu1 }
 0x713   : > { %v11036_v19 = vpop.eup %11035  ;;  %7294 = vst [vmem:[%s13926_s30 + $0x68] sm:$0xff] %v7230_v17  ;;  %v7161_v2 = vmul.f32 %v11211_v33, %v11034_v9  ;;  %v10314_v32 = vadd.f32 1e-05, %v6820_v37  ;;  %v11222_v33 = vld [vmem:[%s11377_s11 + $0xc0] sm:$0xff] }
 0x714   : > { %7293 = vst [vmem:[%s13926_s30 + $0x60] sm:$0xff] %v7229_v20  ;;  %v7160_v61 = vmul.f32 %v11212_v8, %v11036_v19  ;;  %11045 = vrsqrt.f32 %v10313_v30  ;;  %v11221_v30 = vld [vmem:[%s11377_s11 + $0xc8] sm:$0xff] }
 0x715   : > { %v7232_v63 = vmul.f32 %v13918_v35, %v7161_v2  ;;  %11047 = vrsqrt.f32 %v10314_v32  ;;  %v9848_v52 = vpop.f32.mrb[22].mxu1 }
 0x716   : > { %v11038_v24 = vpop.eup %11037  ;;  %v7231_v13 = vmul.f32 %v13918_v35, %v7160_v61  ;;  %v10315_v23 = vadd.f32 1e-05, %v9848_v52  ;;  %v6832_v4 = vpop.f32.mrb[23].mxu1 }
 0x717   : > { %v11040_v41 = vpop.eup %11039  ;;  %7296 = vst [vmem:[%s13926_s30 + $0x78] sm:$0xff] %v7232_v63  ;;  %v7163_v58 = vmul.f32 %v11213_v51, %v11038_v24  ;;  %v10316_v62 = vadd.f32 1e-05, %v6832_v4  ;;  %v11224_v51 = vld [vmem:[%s11377_s11 + $0xd0] sm:$0xff] }
 0x718   : > { %7295 = vst [vmem:[%s13926_s30 + $0x70] sm:$0xff] %v7231_v13  ;;  %v7162_v25 = vmul.f32 %v11214_v27, %v11040_v41  ;;  %11049 = vrsqrt.f32 %v10315_v23  ;;  %v11223_v23 = vld [vmem:[%s11377_s11 + $0xd8] sm:$0xff] }
 0x719   : > { %v7234_v7 = vmul.f32 %v13918_v35, %v7163_v58  ;;  %11051 = vrsqrt.f32 %v10316_v62  ;;  %v9851_v55 = vpop.f32.mrb[24].mxu1 }
 0x71a   : > { %v11042_v6 = vpop.eup %11041  ;;  %v7233_v5 = vmul.f32 %v13918_v35, %v7162_v25  ;;  %v10317_v43 = vadd.f32 1e-05, %v9851_v55  ;;  %v6844_v45 = vpop.f32.mrb[25].mxu1 }
 0x71b   : > { %v11044_v38 = vpop.eup %11043  ;;  %7298 = vst [vmem:[%s13926_s30 + $0x88] sm:$0xff] %v7234_v7  ;;  %v7165_v18 = vmul.f32 %v11215_v29, %v11042_v6  ;;  %v10318_v57 = vadd.f32 1e-05, %v6844_v45  ;;  %v11226_v29 = vld [vmem:[%s11377_s11 + $0xe0] sm:$0xff] }
 0x71c   : > { %7297 = vst [vmem:[%s13926_s30 + $0x80] sm:$0xff] %v7233_v5  ;;  %v7164_v22 = vmul.f32 %v11216_v3, %v11044_v38  ;;  %11053 = vrsqrt.f32 %v10317_v43  ;;  %v11225_v43 = vld [vmem:[%s11377_s11 + $0xe8] sm:$0xff] }
 0x71d   : > { %v7236_v0 = vmul.f32 %v13918_v35, %v7165_v18  ;;  %11055 = vrsqrt.f32 %v10318_v57  ;;  %v9854_v28 = vpop.f32.mrb[26].mxu1 }
 0x71e   : > { %v11046_v44 = vpop.eup %11045  ;;  %v7235_v36 = vmul.f32 %v13918_v35, %v7164_v22  ;;  %v10319_v50 = vadd.f32 1e-05, %v9854_v28  ;;  %v6856_v26 = vpop.f32.mrb[27].mxu1 }
 0x71f   : > { %v11048_v16 = vpop.eup %11047  ;;  %7300 = vst [vmem:[%s13926_s30 + $0x98] sm:$0xff] %v7236_v0  ;;  %v7167_v54 = vmul.f32 %v11217_v56, %v11046_v44  ;;  %v10320_v40 = vadd.f32 1e-05, %v6856_v26  ;;  %v11228_v56 = vld [vmem:[%s11377_s11 + $0xf0] sm:$0xff] }
 0x720   : > { %7299 = vst [vmem:[%s13926_s30 + $0x90] sm:$0xff] %v7235_v36  ;;  %v7166_v1 = vmul.f32 %v11218_v14, %v11048_v16  ;;  %11057 = vrsqrt.f32 %v10319_v50  ;;  %v11227_v50 = vld [vmem:[%s11377_s11 + $0xf8] sm:$0xff] }
 0x721   : > { %v7238_v48 = vmul.f32 %v13918_v35, %v7167_v54  ;;  %11059 = vrsqrt.f32 %v10320_v40  ;;  %v9857_v21 = vpop.f32.mrb[28].mxu1 }
 0x722   : > { %v11050_v12 = vpop.eup %11049  ;;  %v7237_v59 = vmul.f32 %v13918_v35, %v7166_v1  ;;  %v10321_v47 = vadd.f32 1e-05, %v9857_v21  ;;  %v6868_v31 = vpop.f32.mrb[29].mxu1 }
 0x723   : > { %v11052_v34 = vpop.eup %11051  ;;  %7302 = vst [vmem:[%s13926_s30 + $0xa8] sm:$0xff] %v7238_v48  ;;  %v7169_v15 = vmul.f32 %v11219_v46, %v11050_v12  ;;  %v10322_v39 = vadd.f32 1e-05, %v6868_v31  ;;  %v11230_v46 = vld [vmem:[%s11377_s11 + $0x100] sm:$0xff] }
 0x724   : > { %7301 = vst [vmem:[%s13926_s30 + $0xa0] sm:$0xff] %v7237_v59  ;;  %v7168_v42 = vmul.f32 %v11220_v60, %v11052_v34  ;;  %11061 = vrsqrt.f32 %v10321_v47  ;;  %v11229_v47 = vld [vmem:[%s11377_s11 + $0x108] sm:$0xff] }
 0x725   : > { %v7240_v11 = vmul.f32 %v13918_v35, %v7169_v15  ;;  %11063 = vrsqrt.f32 %v10322_v39  ;;  %v9860_v10 = vpop.f32.mrb[30].mxu1 }
 0x726   : > { %v11054_v53 = vpop.eup %11053  ;;  %v7239_v17 = vmul.f32 %v13918_v35, %v7168_v42  ;;  %v10323_v49 = vadd.f32 1e-05, %v9860_v10  ;;  %v6880_v9 = vpop.f32.mrb[31].mxu1 }
 0x727   : > { %v11056_v20 = vpop.eup %11055  ;;  %7304 = vst [vmem:[%s13926_s30 + $0xb8] sm:$0xff] %v7240_v11  ;;  %v7171_v37 = vmul.f32 %v11221_v30, %v11054_v53  ;;  %v10324_v19 = vadd.f32 1e-05, %v6880_v9  ;;  %v11232_v30 = vld [vmem:[%s11377_s11 + $0x110] sm:$0xff] }
 0x728   : > { %7303 = vst [vmem:[%s13926_s30 + $0xb0] sm:$0xff] %v7239_v17  ;;  %v7170_v2 = vmul.f32 %v11222_v33, %v11056_v20  ;;  %11065 = vrsqrt.f32 %v10323_v49  ;;  %v11231_v49 = vld [vmem:[%s11377_s11 + $0x118] sm:$0xff] }
 0x729   : > { %v7242_v32 = vmul.f32 %v13918_v35, %v7171_v37  ;;  %11067 = vrsqrt.f32 %v10324_v19  ;;  %v9863_v8 = vpop.f32.mrb[32].mxu1 }
 0x72a   : > { %v11058_v61 = vpop.eup %11057  ;;  %v7241_v63 = vmul.f32 %v13918_v35, %v7170_v2  ;;  %v10325_v52 = vadd.f32 1e-05, %v9863_v8  ;;  %v6892_v24 = vpop.f32.mrb[33].mxu1 }
 0x72b   : > { %v11060_v13 = vpop.eup %11059  ;;  %7306 = vst [vmem:[%s13926_s30 + $0xc8] sm:$0xff] %v7242_v32  ;;  %v7173_v4 = vmul.f32 %v11223_v23, %v11058_v61  ;;  %v10326_v41 = vadd.f32 1e-05, %v6892_v24  ;;  %v11234_v23 = vld [vmem:[%s11377_s11 + $0x120] sm:$0xff] }
 0x72c   : > { %7305 = vst [vmem:[%s13926_s30 + $0xc0] sm:$0xff] %v7241_v63  ;;  %v7172_v58 = vmul.f32 %v11224_v51, %v11060_v13  ;;  %11069 = vrsqrt.f32 %v10325_v52  ;;  %v11233_v52 = vld [vmem:[%s11377_s11 + $0x128] sm:$0xff] }
 0x72d   : > { %v7244_v62 = vmul.f32 %v13918_v35, %v7173_v4  ;;  %11071 = vrsqrt.f32 %v10326_v41  ;;  %v9866_v27 = vpop.f32.mrb[34].mxu1 }
 0x72e   : > { %v11062_v25 = vpop.eup %11061  ;;  %v7243_v7 = vmul.f32 %v13918_v35, %v7172_v58  ;;  %v10327_v55 = vadd.f32 1e-05, %v9866_v27  ;;  %v6904_v6 = vpop.f32.mrb[35].mxu1 }
 0x72f   : > { %v11064_v5 = vpop.eup %11063  ;;  %7308 = vst [vmem:[%s13926_s30 + $0xd8] sm:$0xff] %v7244_v62  ;;  %v7175_v45 = vmul.f32 %v11225_v43, %v11062_v25  ;;  %v10328_v38 = vadd.f32 1e-05, %v6904_v6  ;;  %v11236_v43 = vld [vmem:[%s11377_s11 + $0x130] sm:$0xff] }
 0x730   : > { %7307 = vst [vmem:[%s13926_s30 + $0xd0] sm:$0xff] %v7243_v7  ;;  %v7174_v18 = vmul.f32 %v11226_v29, %v11064_v5  ;;  %11073 = vrsqrt.f32 %v10327_v55  ;;  %v11235_v55 = vld [vmem:[%s11377_s11 + $0x138] sm:$0xff] }
 0x731   : > { %v7246_v57 = vmul.f32 %v13918_v35, %v7175_v45  ;;  %11075 = vrsqrt.f32 %v10328_v38  ;;  %v9869_v3 = vpop.f32.mrb[36].mxu1 }
 0x732   : > { %v11066_v22 = vpop.eup %11065  ;;  %v7245_v0 = vmul.f32 %v13918_v35, %v7174_v18  ;;  %v10329_v28 = vadd.f32 1e-05, %v9869_v3  ;;  %v6916_v44 = vpop.f32.mrb[37].mxu1 }
 0x733   : > { %v11068_v36 = vpop.eup %11067  ;;  %7310 = vst [vmem:[%s13926_s30 + $0xe8] sm:$0xff] %v7246_v57  ;;  %v7177_v26 = vmul.f32 %v11227_v50, %v11066_v22  ;;  %v10330_v16 = vadd.f32 1e-05, %v6916_v44  ;;  %v11238_v50 = vld [vmem:[%s11377_s11 + $0x140] sm:$0xff] }
 0x734   : > { %7309 = vst [vmem:[%s13926_s30 + $0xe0] sm:$0xff] %v7245_v0  ;;  %v7176_v54 = vmul.f32 %v11228_v56, %v11068_v36  ;;  %11077 = vrsqrt.f32 %v10329_v28  ;;  %v11237_v28 = vld [vmem:[%s11377_s11 + $0x148] sm:$0xff] }
 0x735   : > { %v7248_v40 = vmul.f32 %v13918_v35, %v7177_v26  ;;  %11079 = vrsqrt.f32 %v10330_v16  ;;  %v9872_v14 = vpop.f32.mrb[38].mxu1 }
 0x736   : > { %v11070_v1 = vpop.eup %11069  ;;  %v7247_v48 = vmul.f32 %v13918_v35, %v7176_v54  ;;  %v10331_v21 = vadd.f32 1e-05, %v9872_v14  ;;  %v6928_v12 = vpop.f32.mrb[39].mxu1 }
 0x737   : > { %v11072_v59 = vpop.eup %11071  ;;  %7312 = vst [vmem:[%s13926_s30 + $0xf8] sm:$0xff] %v7248_v40  ;;  %v7179_v31 = vmul.f32 %v11229_v47, %v11070_v1  ;;  %v10332_v34 = vadd.f32 1e-05, %v6928_v12  ;;  %v11240_v47 = vld [vmem:[%s11377_s11 + $0x150] sm:$0xff] }
 0x738   : > { %7311 = vst [vmem:[%s13926_s30 + $0xf0] sm:$0xff] %v7247_v48  ;;  %v7178_v15 = vmul.f32 %v11230_v46, %v11072_v59  ;;  %11081 = vrsqrt.f32 %v10331_v21  ;;  %v11239_v21 = vld [vmem:[%s11377_s11 + $0x158] sm:$0xff] }
 0x739   : > { %v7250_v39 = vmul.f32 %v13918_v35, %v7179_v31  ;;  %11083 = vrsqrt.f32 %v10332_v34  ;;  %v9875_v60 = vpop.f32.mrb[40].mxu1 }
 0x73a   : > { %v11074_v42 = vpop.eup %11073  ;;  %v7249_v11 = vmul.f32 %v13918_v35, %v7178_v15  ;;  %v10333_v10 = vadd.f32 1e-05, %v9875_v60  ;;  %v6940_v53 = vpop.f32.mrb[41].mxu1 }
 0x73b   : > { %v11076_v17 = vpop.eup %11075  ;;  %7314 = vst [vmem:[%s13926_s30 + $0x108] sm:$0xff] %v7250_v39  ;;  %v7181_v9 = vmul.f32 %v11231_v49, %v11074_v42  ;;  %v10334_v20 = vadd.f32 1e-05, %v6940_v53  ;;  %v11242_v49 = vld [vmem:[%s11377_s11 + $0x160] sm:$0xff] }
 0x73c   : > { %7313 = vst [vmem:[%s13926_s30 + $0x100] sm:$0xff] %v7249_v11  ;;  %v7180_v37 = vmul.f32 %v11232_v30, %v11076_v17  ;;  %11085 = vrsqrt.f32 %v10333_v10  ;;  %v11241_v10 = vld [vmem:[%s11377_s11 + $0x168] sm:$0xff] }
 0x73d   : > { %v7252_v19 = vmul.f32 %v13918_v35, %v7181_v9  ;;  %11087 = vrsqrt.f32 %v10334_v20  ;;  %v9878_v33 = vpop.f32.mrb[42].mxu1 }
 0x73e   : > { %v11078_v2 = vpop.eup %11077  ;;  %v7251_v32 = vmul.f32 %v13918_v35, %v7180_v37  ;;  %v10335_v8 = vadd.f32 1e-05, %v9878_v33  ;;  %v6952_v61 = vpop.f32.mrb[43].mxu1 }
 0x73f   : > { %v11080_v63 = vpop.eup %11079  ;;  %7316 = vst [vmem:[%s13926_s30 + $0x118] sm:$0xff] %v7252_v19  ;;  %v7183_v24 = vmul.f32 %v11233_v52, %v11078_v2  ;;  %v10336_v13 = vadd.f32 1e-05, %v6952_v61  ;;  %v11244_v52 = vld [vmem:[%s11377_s11 + $0x170] sm:$0xff] }
 0x740   : > { %7315 = vst [vmem:[%s13926_s30 + $0x110] sm:$0xff] %v7251_v32  ;;  %v7182_v4 = vmul.f32 %v11234_v23, %v11080_v63  ;;  %11089 = vrsqrt.f32 %v10335_v8  ;;  %v11243_v8 = vld [vmem:[%s11377_s11 + $0x178] sm:$0xff] }
 0x741   : > { %v7254_v41 = vmul.f32 %v13918_v35, %v7183_v24  ;;  %11091 = vrsqrt.f32 %v10336_v13  ;;  %v9881_v51 = vpop.f32.mrb[44].mxu1 }
 0x742   : > { %v11082_v58 = vpop.eup %11081  ;;  %v7253_v62 = vmul.f32 %v13918_v35, %v7182_v4  ;;  %v10337_v27 = vadd.f32 1e-05, %v9881_v51  ;;  %v6964_v25 = vpop.f32.mrb[45].mxu1 }
 0x743   : > { %v11084_v7 = vpop.eup %11083  ;;  %7318 = vst [vmem:[%s13926_s30 + $0x128] sm:$0xff] %v7254_v41  ;;  %v7185_v6 = vmul.f32 %v11235_v55, %v11082_v58  ;;  %v10338_v5 = vadd.f32 1e-05, %v6964_v25  ;;  %v11246_v55 = vld [vmem:[%s11377_s11 + $0x180] sm:$0xff] }
 0x744   : > { %7317 = vst [vmem:[%s13926_s30 + $0x120] sm:$0xff] %v7253_v62  ;;  %v7184_v45 = vmul.f32 %v11236_v43, %v11084_v7  ;;  %11093 = vrsqrt.f32 %v10337_v27  ;;  %v11245_v27 = vld [vmem:[%s11377_s11 + $0x188] sm:$0xff] }
 0x745   : > { %v7256_v38 = vmul.f32 %v13918_v35, %v7185_v6  ;;  %11095 = vrsqrt.f32 %v10338_v5  ;;  %v9884_v29 = vpop.f32.mrb[46].mxu1 }
 0x746   : > { %v11086_v18 = vpop.eup %11085  ;;  %v7255_v57 = vmul.f32 %v13918_v35, %v7184_v45  ;;  %v10339_v3 = vadd.f32 1e-05, %v9884_v29  ;;  %v6976_v22 = vpop.f32.mrb[47].mxu1 }
 0x747   : > { %v11088_v0 = vpop.eup %11087  ;;  %7320 = vst [vmem:[%s13926_s30 + $0x138] sm:$0xff] %v7256_v38  ;;  %v7187_v44 = vmul.f32 %v11237_v28, %v11086_v18  ;;  %v10340_v36 = vadd.f32 1e-05, %v6976_v22  ;;  %v11248_v28 = vld [vmem:[%s11377_s11 + $0x190] sm:$0xff] }
 0x748   : > { %7319 = vst [vmem:[%s13926_s30 + $0x130] sm:$0xff] %v7255_v57  ;;  %v7186_v26 = vmul.f32 %v11238_v50, %v11088_v0  ;;  %11097 = vrsqrt.f32 %v10339_v3  ;;  %v11247_v3 = vld [vmem:[%s11377_s11 + $0x198] sm:$0xff] }
 0x749   : > { %v7258_v16 = vmul.f32 %v13918_v35, %v7187_v44  ;;  %11099 = vrsqrt.f32 %v10340_v36  ;;  %v9887_v56 = vpop.f32.mrb[48].mxu1 }
 0x74a   : > { %v11090_v54 = vpop.eup %11089  ;;  %v7257_v40 = vmul.f32 %v13918_v35, %v7186_v26  ;;  %v10341_v14 = vadd.f32 1e-05, %v9887_v56  ;;  %v6988_v1 = vpop.f32.mrb[49].mxu1 }
 0x74b   : > { %v11092_v48 = vpop.eup %11091  ;;  %7322 = vst [vmem:[%s13926_s30 + $0x148] sm:$0xff] %v7258_v16  ;;  %v7189_v12 = vmul.f32 %v11239_v21, %v11090_v54  ;;  %v10342_v59 = vadd.f32 1e-05, %v6988_v1  ;;  %v11250_v21 = vld [vmem:[%s11377_s11 + $0x1a0] sm:$0xff] }
 0x74c   : > { %7321 = vst [vmem:[%s13926_s30 + $0x140] sm:$0xff] %v7257_v40  ;;  %v7188_v31 = vmul.f32 %v11240_v47, %v11092_v48  ;;  %11101 = vrsqrt.f32 %v10341_v14  ;;  %v11249_v14 = vld [vmem:[%s11377_s11 + $0x1a8] sm:$0xff] }
 0x74d   : > { %v7260_v34 = vmul.f32 %v13918_v35, %v7189_v12  ;;  %11103 = vrsqrt.f32 %v10342_v59  ;;  %v9890_v46 = vpop.f32.mrb[50].mxu1 }
 0x74e   : > { %v11094_v15 = vpop.eup %11093  ;;  %v7259_v39 = vmul.f32 %v13918_v35, %v7188_v31  ;;  %v10343_v60 = vadd.f32 1e-05, %v9890_v46  ;;  %v7000_v42 = vpop.f32.mrb[51].mxu1 }
 0x74f   : > { %v11096_v11 = vpop.eup %11095  ;;  %7324 = vst [vmem:[%s13926_s30 + $0x158] sm:$0xff] %v7260_v34  ;;  %v7191_v53 = vmul.f32 %v11241_v10, %v11094_v15  ;;  %v10344_v17 = vadd.f32 1e-05, %v7000_v42  ;;  %v11252_v10 = vld [vmem:[%s11377_s11 + $0x1b0] sm:$0xff] }
 0x750   : > { %7323 = vst [vmem:[%s13926_s30 + $0x150] sm:$0xff] %v7259_v39  ;;  %v7190_v9 = vmul.f32 %v11242_v49, %v11096_v11  ;;  %11105 = vrsqrt.f32 %v10343_v60  ;;  %v11251_v60 = vld [vmem:[%s11377_s11 + $0x1b8] sm:$0xff] }
 0x751   : > { %v7262_v20 = vmul.f32 %v13918_v35, %v7191_v53  ;;  %11107 = vrsqrt.f32 %v10344_v17  ;;  %v9893_v30 = vpop.f32.mrb[52].mxu1 }
 0x752   : > { %v11098_v37 = vpop.eup %11097  ;;  %v7261_v19 = vmul.f32 %v13918_v35, %v7190_v9  ;;  %v10345_v33 = vadd.f32 1e-05, %v9893_v30  ;;  %v7012_v2 = vpop.f32.mrb[53].mxu1 }
 0x753   : > { %v11100_v32 = vpop.eup %11099  ;;  %7326 = vst [vmem:[%s13926_s30 + $0x168] sm:$0xff] %v7262_v20  ;;  %v7193_v61 = vmul.f32 %v11243_v8, %v11098_v37  ;;  %v10346_v63 = vadd.f32 1e-05, %v7012_v2  ;;  %v11254_v8 = vld [vmem:[%s11377_s11 + $0x1c0] sm:$0xff] }
 0x754   : > { %7325 = vst [vmem:[%s13926_s30 + $0x160] sm:$0xff] %v7261_v19  ;;  %v7192_v24 = vmul.f32 %v11244_v52, %v11100_v32  ;;  %11109 = vrsqrt.f32 %v10345_v33  ;;  %v11253_v33 = vld [vmem:[%s11377_s11 + $0x1c8] sm:$0xff] }
 0x755   : > { %v7264_v13 = vmul.f32 %v13918_v35, %v7193_v61  ;;  %11111 = vrsqrt.f32 %v10346_v63  ;;  %v9896_v23 = vpop.f32.mrb[54].mxu1 }
 0x756   : > { %v11102_v4 = vpop.eup %11101  ;;  %v7263_v41 = vmul.f32 %v13918_v35, %v7192_v24  ;;  %v10347_v51 = vadd.f32 1e-05, %v9896_v23  ;;  %v7024_v58 = vpop.f32.mrb[55].mxu1  ;;  %v11255_v23 = vld [vmem:[%s11377_s11 + $0x1d8] sm:$0xff] }
 0x757   : > { %v11104_v62 = vpop.eup %11103  ;;  %7328 = vst [vmem:[%s13926_s30 + $0x178] sm:$0xff] %v7264_v13  ;;  %v7195_v25 = vmul.f32 %v11245_v27, %v11102_v4  ;;  %v10348_v7 = vadd.f32 1e-05, %v7024_v58 }
 0x758   : > { %7327 = vst [vmem:[%s13926_s30 + $0x170] sm:$0xff] %v7263_v41  ;;  %v7194_v6 = vmul.f32 %v11246_v55, %v11104_v62  ;;  %11113 = vrsqrt.f32 %v10347_v51  ;;  %v11256_v41 = vld [vmem:[%s11377_s11 + $0x1d0] sm:$0xff] }
 0x759   : > { %v7266_v5 = vmul.f32 %v13918_v35, %v7195_v25  ;;  %11115 = vrsqrt.f32 %v10348_v7  ;;  %v9899_v43 = vpop.f32.mrb[56].mxu1  ;;  %v11257_v7 = vld [vmem:[%s11377_s11 + $0x1e8] sm:$0xff] }
 0x75a   : > { %v11106_v45 = vpop.eup %11105  ;;  %v7265_v38 = vmul.f32 %v13918_v35, %v7194_v6  ;;  %v10349_v29 = vadd.f32 1e-05, %v9899_v43  ;;  %v7036_v18 = vpop.f32.mrb[57].mxu1  ;;  %v11258_v6 = vld [vmem:[%s11377_s11 + $0x1e0] sm:$0xff] }
 0x75b   : > { %v11108_v57 = vpop.eup %11107  ;;  %7330 = vst [vmem:[%s13926_s30 + $0x188] sm:$0xff] %v7266_v5  ;;  %v7197_v22 = vmul.f32 %v11247_v3, %v11106_v45  ;;  %v10350_v0 = vadd.f32 1e-05, %v7036_v18  ;;  %v11259_v18 = vld [vmem:[%s11377_s11 + $0x1f8] sm:$0xff]  ;;  %v11260_v3 = vld [vmem:[%s11377_s11 + $0x1f0] sm:$0xff] }
 0x75c   : > { %7329 = vst [vmem:[%s13926_s30 + $0x180] sm:$0xff] %v7265_v38  ;;  %v7196_v44 = vmul.f32 %v11248_v28, %v11108_v57  ;;  %11117 = vrsqrt.f32 %v10349_v29 }
 0x75d   : > { %v7268_v36 = vmul.f32 %v13918_v35, %v7197_v22  ;;  %11119 = vrsqrt.f32 %v10350_v0  ;;  %v9902_v50 = vpop.f32.mrb[58].mxu1 }
 0x75e   : > { %v11110_v26 = vpop.eup %11109  ;;  %v7267_v16 = vmul.f32 %v13918_v35, %v7196_v44  ;;  %v10351_v56 = vadd.f32 1e-05, %v9902_v50  ;;  %v7048_v54 = vpop.f32.mrb[59].mxu1 }
 0x75f   : > { %v11112_v40 = vpop.eup %11111  ;;  %7332 = vst [vmem:[%s13926_s30 + $0x198] sm:$0xff] %v7268_v36  ;;  %v7199_v1 = vmul.f32 %v11249_v14, %v11110_v26  ;;  %v10352_v48 = vadd.f32 1e-05, %v7048_v54 }
 0x760   : > { %7331 = vst [vmem:[%s13926_s30 + $0x190] sm:$0xff] %v7267_v16  ;;  %v7198_v12 = vmul.f32 %v11250_v21, %v11112_v40  ;;  %11121 = vrsqrt.f32 %v10351_v56 }
 0x761   : > { %v7270_v59 = vmul.f32 %v13918_v35, %v7199_v1  ;;  %11123 = vrsqrt.f32 %v10352_v48  ;;  %v9905_v47 = vpop.f32.mrb[60].mxu1 }
 0x762   : > { %v11114_v31 = vpop.eup %11113  ;;  %v7269_v34 = vmul.f32 %v13918_v35, %v7198_v12  ;;  %v10353_v46 = vadd.f32 1e-05, %v9905_v47  ;;  %v7060_v15 = vpop.f32.mrb[61].mxu1 }
 0x763   : > { %v11116_v39 = vpop.eup %11115  ;;  %7334 = vst [vmem:[%s13926_s30 + $0x1a8] sm:$0xff] %v7270_v59  ;;  %v7201_v42 = vmul.f32 %v11251_v60, %v11114_v31  ;;  %v10354_v11 = vadd.f32 1e-05, %v7060_v15 }
 0x764   : > { %7333 = vst [vmem:[%s13926_s30 + $0x1a0] sm:$0xff] %v7269_v34  ;;  %v7200_v53 = vmul.f32 %v11252_v10, %v11116_v39  ;;  %11125 = vrsqrt.f32 %v10353_v46 }
 0x765   : > { %v7272_v17 = vmul.f32 %v13918_v35, %v7201_v42  ;;  %11127 = vrsqrt.f32 %v10354_v11  ;;  %v9908_v49 = vpop.f32.mrb[62].mxu1 }
 0x766   : > { %v11118_v9 = vpop.eup %11117  ;;  %v7271_v20 = vmul.f32 %v13918_v35, %v7200_v53  ;;  %v10355_v30 = vadd.f32 1e-05, %v9908_v49  ;;  %v7072_v37 = vpop.f32.mrb[63].mxu1 }
 0x767   : > { %v11120_v19 = vpop.eup %11119  ;;  %7336 = vst [vmem:[%s13926_s30 + $0x1b8] sm:$0xff] %v7272_v17  ;;  %v7203_v2 = vmul.f32 %v11253_v33, %v11118_v9  ;;  %v10356_v32 = vadd.f32 1e-05, %v7072_v37 }
 0x768   : > { %7335 = vst [vmem:[%s13926_s30 + $0x1b0] sm:$0xff] %v7271_v20  ;;  %v7202_v61 = vmul.f32 %v11254_v8, %v11120_v19  ;;  %11129 = vrsqrt.f32 %v10355_v30 }
 0x769   : > { %v7274_v63 = vmul.f32 %v13918_v35, %v7203_v2  ;;  %11131 = vrsqrt.f32 %v10356_v32 }
 0x76a   : > { %v11122_v52 = vpop.eup %11121  ;;  %v7273_v24 = vmul.f32 %v13918_v35, %v7202_v61 }
 0x76b   : > { %v11124_v13 = vpop.eup %11123  ;;  %7338 = vst [vmem:[%s13926_s30 + $0x1c8] sm:$0xff] %v7274_v63  ;;  %v7205_v4 = vmul.f32 %v11255_v23, %v11122_v52 }
 0x76c   : > { %7337 = vst [vmem:[%s13926_s30 + $0x1c0] sm:$0xff] %v7273_v24  ;;  %v7204_v51 = vmul.f32 %v11256_v41, %v11124_v13 }
 0x76d   : > { %v7276_v58 = vmul.f32 %v13918_v35, %v7205_v4 }
 0x76e   : > { %v11126_v62 = vpop.eup %11125  ;;  %v7275_v27 = vmul.f32 %v13918_v35, %v7204_v51 }
 0x76f   : > { %v11128_v25 = vpop.eup %11127  ;;  %7340 = vst [vmem:[%s13926_s30 + $0x1d8] sm:$0xff] %v7276_v58  ;;  %v7207_v55 = vmul.f32 %v11257_v7, %v11126_v62 }
 0x770   : > { %7339 = vst [vmem:[%s13926_s30 + $0x1d0] sm:$0xff] %v7275_v27  ;;  %v7206_v5 = vmul.f32 %v11258_v6, %v11128_v25 }
 0x771   : > { %v7278_v43 = vmul.f32 %v13918_v35, %v7207_v55 }
 0x772   : > { %v11130_v45 = vpop.eup %11129  ;;  %v7277_v38 = vmul.f32 %v13918_v35, %v7206_v5 }
 0x773   : > { %v11132_v29 = vpop.eup %11131  ;;  %7342 = vst [vmem:[%s13926_s30 + $0x1e8] sm:$0xff] %v7278_v43  ;;  %v7209_v57 = vmul.f32 %v11259_v18, %v11130_v45 }
 0x774   : > { %7341 = vst [vmem:[%s13926_s30 + $0x1e0] sm:$0xff] %v7277_v38  ;;  %v7208_v22 = vmul.f32 %v11260_v3, %v11132_v29 }
 0x775   : > { %v7280_v0 = vmul.f32 %v13918_v35, %v7209_v57 }
 0x776   : > { %v7279_v28 = vmul.f32 %v13918_v35, %v7208_v22 }
 0x777   : > { %7344 = vst [vmem:[%s13926_s30 + $0x1f8] sm:$0xff] %v7280_v0 }
 0x778   : > { %7343 = vst [vmem:[%s13926_s30 + $0x1f0] sm:$0xff] %v7279_v28 }
 0x779 PF: > { %s13_s12 = sadd.s32 1, %s11267_s12  }
 0x77a   : > { %p10_p4 = scmp.ge.s32.totalorder %s13_s12, 4  }
 0x77c   :  { %12 = sbr.rel (!%p10_p4) target bundleno = 1 (0x1), region = 62 }

</bundles_post_ra>
